<compile_context>
chip_gen: v5e
topology: v5e:2x2
jax: 0.10.0
libtpu: 0.0.40
codegen_flags: <defaults>
</compile_context>

<pallas_src>
import jax
import jax.numpy as jnp
from jax.experimental import pallas as pl
from jax.experimental.pallas import tpu as pltpu


# ---------------------------------------------------------------------------
# Kernel 1: fused conv (im2col matmul) + bias + ReLU + 2x2 max-pool, batched
# ---------------------------------------------------------------------------
def conv_relu_pool_kernel(p_ref, w_ref, b_ref, o_ref):
    # p_ref: (G, 4, 196, 25) -- 4 conv positions sharing one 2x2 pool window
    # w_ref: (25, 32), b_ref: (1, 32), o_ref: (G, 196, 32) bf16
    w = w_ref[...]
    b = b_ref[...]
    G = o_ref.shape[0]
    for g in range(G):                 # static unroll over the batch group
        y = None
        for k in range(4):             # 4 small MXU matmuls, max-reduced
            yk = jnp.dot(p_ref[g, k], w, preferred_element_type=jnp.float32)
            y = yk if y is None else jnp.maximum(y, yk)
        # max_k relu(x_k + b) == relu(max_k(x_k) + b)  (bias const, relu monotone)
        o_ref[g] = jnp.maximum(y + b, 0.0).astype(o_ref.dtype)


def conv_relu_pool(patches4, w_col, b_conv, group=8):
    B = patches4.shape[0]
    G = min(group, B)
    Bp = ((B + G - 1) // G) * G
    if Bp != B:
        patches4 = jnp.pad(patches4, ((0, Bp - B), (0, 0), (0, 0), (0, 0)))
    out = pl.pallas_call(
        conv_relu_pool_kernel,
        out_shape=jax.ShapeDtypeStruct((Bp, 196, 32), jnp.bfloat16),
        grid_spec=pltpu.PrefetchScalarGridSpec(
            num_scalar_prefetch=0,
            grid=(Bp // G,),
            in_specs=[
                pl.BlockSpec((G, 4, 196, 25), lambda b: (b, 0, 0, 0)),
                pl.BlockSpec((25, 32), lambda b: (0, 0)),
                pl.BlockSpec((1, 32), lambda b: (0, 0)),
            ],
            out_specs=pl.BlockSpec((G, 196, 32), lambda b: (b, 0, 0)),
        ),
        compiler_params=pltpu.CompilerParams(dimension_semantics=("parallel",)),
    )(patches4, w_col, b_conv.reshape(1, 32))
    return out[:B]


# ---------------------------------------------------------------------------
# Kernel 2: fused FC head.
#   fc1 (6272 -> 1024, K-tiled bf16 weight stream, f32 VMEM accumulator)
#   + bias + ReLU + [dropout=identity] + fc2 (1024 -> 10) + bias + argmax,
#   all in the last-K epilogue.  Output: int32 predictions (B, 1).
# ---------------------------------------------------------------------------
def fc_head_kernel(x_ref, w1_ref, b1_ref, w2_ref, b2_ref, o_ref, acc_ref):
    k = pl.program_id(1)

    @pl.when(k == 0)
    def _():
        acc_ref[...] = jnp.zeros_like(acc_ref)

    acc_ref[...] += jnp.dot(x_ref[...], w1_ref[...],
                            preferred_element_type=jnp.float32)

    @pl.when(k == pl.num_programs(1) - 1)
    def _():
        h = jnp.maximum(acc_ref[...] + b1_ref[...], 0.0)        # (bm, 1024) f32
        # TODO(synk): Dropout(0.5) implemented as identity (eval-mode semantics).
        logits = jnp.dot(h, w2_ref[...],
                         preferred_element_type=jnp.float32) + b2_ref[...]
        Bq, C = logits.shape
        iota = jax.lax.broadcasted_iota(jnp.int32, (Bq, C), 1)
        maxv = jnp.max(logits, axis=-1, keepdims=True)
        cand = jnp.where(logits == maxv, iota, C)               # first max wins
        o_ref[...] = jnp.min(cand, axis=-1, keepdims=True)


def fc_head(x_flat, w1, b1, w2, b2, *, tk=896, bm=128):
    B, K = x_flat.shape
    N1 = w1.shape[1]
    C = w2.shape[1]
    assert K % tk == 0 and tk % 128 == 0
    bm = min(bm, B)
    Bp = ((B + bm - 1) // bm) * bm
    if Bp != B:
        x_flat = jnp.pad(x_flat, ((0, Bp - B), (0, 0)))
    out = pl.pallas_call(
        fc_head_kernel,
        out_shape=jax.ShapeDtypeStruct((Bp, 1), jnp.int32),
        grid_spec=pltpu.PrefetchScalarGridSpec(
            num_scalar_prefetch=0,
            grid=(Bp // bm, K // tk),
            in_specs=[
                pl.BlockSpec((bm, tk), lambda b, k: (b, k)),     # x   (bf16)
                pl.BlockSpec((tk, N1), lambda b, k: (k, 0)),     # w1  (bf16)
                pl.BlockSpec((1, N1), lambda b, k: (0, 0)),      # b1  (f32)
                pl.BlockSpec((N1, C), lambda b, k: (0, 0)),      # w2  (f32)
                pl.BlockSpec((1, C), lambda b, k: (0, 0)),       # b2  (f32)
            ],
            out_specs=pl.BlockSpec((bm, 1), lambda b, k: (b, 0)),
            scratch_shapes=[pltpu.VMEM((bm, N1), jnp.float32)],
        ),
        compiler_params=pltpu.CompilerParams(
            dimension_semantics=("parallel", "arbitrary")),
    )(x_flat.astype(jnp.bfloat16), w1, b1.reshape(1, N1), w2, b2.reshape(1, C))
    return out[:B, 0]


# ---------------------------------------------------------------------------
# JAX glue: im2col + pool-window regrouping (host side, tiny tensors)
# ---------------------------------------------------------------------------
def im2col_5x5_pad2(x):
    # x: [B, 1, 28, 28] -> patches: [B, 28, 28, 25]  (kh*5 + kw order)
    xp = jnp.pad(x[:, 0], ((0, 0), (2, 2), (2, 2)))  # [B, 32, 32]
    cols = []
    for kh in range(5):
        for kw in range(5):
            cols.append(xp[:, kh:kh + 28, kw:kw + 28])
    return jnp.stack(cols, axis=-1)


def cnn_forward(x, params):
    B = x.shape[0]
    patches = im2col_5x5_pad2(x)                                   # [B,28,28,25]
    # group the 4 conv positions of each 2x2 pool window together:
    patches4 = (patches.reshape(B, 14, 2, 14, 2, 25)
                .transpose(0, 2, 4, 1, 3, 5)
                .reshape(B, 4, 196, 25))
    pooled = conv_relu_pool(patches4, params["w_col"], params["b_conv"])  # [B,196,32] bf16
    # flatten in natural (p, c) order; the NCHW permutation lives in w1 already
    x_flat = pooled.reshape(B, 32 * 14 * 14)                       # [B, 6272] bf16
    return fc_head(x_flat, params["w1"], params["b1"],
                   params["w2"], params["b2"])                     # [B] int32


def init_params(key):
    k0, k1, k2, k3 = jax.random.split(key, 4)
    w_conv = 0.1 * jax.random.normal(k0, (32, 1, 5, 5), jnp.float32)
    b_conv = jnp.zeros((32,), jnp.float32)
    # PyTorch fc1 weight (transposed to (in, out)): rows indexed c*196 + (h*14+w)
    w1_torch = 0.02 * jax.random.normal(k1, (32 * 14 * 14, 1024), jnp.float32)
    b1 = 0.01 * jax.random.normal(k2, (1024,), jnp.float32)
    w2 = 0.05 * jax.random.normal(k3, (1024, 10), jnp.float32)
    b2 = jnp.zeros((10,), jnp.float32)
    # fold the NCHW-flatten permutation into w1: new row index = p*32 + c
    w1_perm = (w1_torch.reshape(32, 196, 1024)
               .transpose(1, 0, 2)
               .reshape(32 * 196, 1024))
    return {
        "w_col": w_conv.reshape(32, 25).T,          # (25, 32), kh*5+kw row order
        "b_conv": b_conv,
        "w1": w1_perm.astype(jnp.bfloat16),         # streamed in bf16, f32 accum
        "b1": b1,
        "w2": w2, "b2": b2,
    }


if __name__ == "__main__":
    key = jax.random.PRNGKey(0)
    kx, kp = jax.random.split(key)
    params = init_params(kp)
    # MNIST-like input implied by fc1 (32*14*14): [B, 1, 28, 28]
    x = jax.random.normal(kx, (2, 1, 28, 28), jnp.float32)

    preds = jax.jit(cnn_forward)(x, params)
    preds = jax.block_until_ready(preds)
    assert preds.shape == (2,) and preds.dtype == jnp.int32
    print("KERNEL_OK")
</pallas_src>

<mosaic_0001>
module attributes {stable_mosaic.version = 11 : i64} {
  func.func @conv_relu_pool_kernel(%arg0: i32, %arg1: memref<2x4x196x25xf32, #tpu.memory_space<vmem>>, %arg2: memref<25x32xf32, #tpu.memory_space<vmem>>, %arg3: memref<1x32xf32, #tpu.memory_space<vmem>>, %arg4: memref<2x196x32xbf16, #tpu.memory_space<vmem>>) attributes {dimension_semantics = [#tpu.dimension_semantics<parallel>], iteration_bounds = array<i64: 1>, scalar_prefetch = 0 : i64, scratch_operands = 0 : i64, tpu.core_type = #tpu.core_type<tc>, window_params = [{transform_indices = @transform_0, window_bounds = array<i64: 2, 4, 196, 25>}, {pipeline_mode = #tpu.pipeline_mode<synchronous>, transform_indices = @transform_1, window_bounds = array<i64: 25, 32>}, {pipeline_mode = #tpu.pipeline_mode<synchronous>, transform_indices = @transform_2, window_bounds = array<i64: 1, 32>}, {transform_indices = @transform_3, window_bounds = array<i64: 2, 196, 32>}]} {
    %c0 = arith.constant 0 : index
    %c0_0 = arith.constant 0 : index
    %0 = vector.load %arg2[%c0, %c0_0] : memref<25x32xf32, #tpu.memory_space<vmem>>, vector<25x32xf32>
    %c0_1 = arith.constant 0 : index
    %c0_2 = arith.constant 0 : index
    %1 = vector.load %arg3[%c0_1, %c0_2] : memref<1x32xf32, #tpu.memory_space<vmem>>, vector<1x32xf32>
    %c0_3 = arith.constant 0 : index
    %c0_4 = arith.constant 0 : index
    %c0_5 = arith.constant 0 : index
    %c0_6 = arith.constant 0 : index
    %2 = vector.load %arg1[%c0_3, %c0_4, %c0_5, %c0_6] : memref<2x4x196x25xf32, #tpu.memory_space<vmem>>, vector<1x1x196x25xf32>
    %3 = vector.shape_cast %2 : vector<1x1x196x25xf32> to vector<196x25xf32>
    %cst = arith.constant dense<0.000000e+00> : vector<196x32xf32>
    %4 = tpu.matmul %3, %0, %cst {dimension_numbers = #tpu.dot_dimension_numbers<[1], [0], [0], [1], [0, 0, 1, 1], [], []>} : vector<196x25xf32>, vector<25x32xf32>, vector<196x32xf32> -> vector<196x32xf32>
    %c0_7 = arith.constant 0 : index
    %c1 = arith.constant 1 : index
    %c0_8 = arith.constant 0 : index
    %c0_9 = arith.constant 0 : index
    %5 = vector.load %arg1[%c0_7, %c1, %c0_8, %c0_9] : memref<2x4x196x25xf32, #tpu.memory_space<vmem>>, vector<1x1x196x25xf32>
    %6 = vector.shape_cast %5 : vector<1x1x196x25xf32> to vector<196x25xf32>
    %cst_10 = arith.constant dense<0.000000e+00> : vector<196x32xf32>
    %7 = tpu.matmul %6, %0, %cst_10 {dimension_numbers = #tpu.dot_dimension_numbers<[1], [0], [0], [1], [0, 0, 1, 1], [], []>} : vector<196x25xf32>, vector<25x32xf32>, vector<196x32xf32> -> vector<196x32xf32>
    %8 = arith.maximumf %4, %7 : vector<196x32xf32>
    %c0_11 = arith.constant 0 : index
    %c2 = arith.constant 2 : index
    %c0_12 = arith.constant 0 : index
    %c0_13 = arith.constant 0 : index
    %9 = vector.load %arg1[%c0_11, %c2, %c0_12, %c0_13] : memref<2x4x196x25xf32, #tpu.memory_space<vmem>>, vector<1x1x196x25xf32>
    %10 = vector.shape_cast %9 : vector<1x1x196x25xf32> to vector<196x25xf32>
    %cst_14 = arith.constant dense<0.000000e+00> : vector<196x32xf32>
    %11 = tpu.matmul %10, %0, %cst_14 {dimension_numbers = #tpu.dot_dimension_numbers<[1], [0], [0], [1], [0, 0, 1, 1], [], []>} : vector<196x25xf32>, vector<25x32xf32>, vector<196x32xf32> -> vector<196x32xf32>
    %12 = arith.maximumf %8, %11 : vector<196x32xf32>
    %c0_15 = arith.constant 0 : index
    %c3 = arith.constant 3 : index
    %c0_16 = arith.constant 0 : index
    %c0_17 = arith.constant 0 : index
    %13 = vector.load %arg1[%c0_15, %c3, %c0_16, %c0_17] : memref<2x4x196x25xf32, #tpu.memory_space<vmem>>, vector<1x1x196x25xf32>
    %14 = vector.shape_cast %13 : vector<1x1x196x25xf32> to vector<196x25xf32>
    %cst_18 = arith.constant dense<0.000000e+00> : vector<196x32xf32>
    %15 = tpu.matmul %14, %0, %cst_18 {dimension_numbers = #tpu.dot_dimension_numbers<[1], [0], [0], [1], [0, 0, 1, 1], [], []>} : vector<196x25xf32>, vector<25x32xf32>, vector<196x32xf32> -> vector<196x32xf32>
    %16 = arith.maximumf %12, %15 : vector<196x32xf32>
    %17 = vector.broadcast %1 : vector<1x32xf32> to vector<196x32xf32>
    %18 = arith.addf %16, %17 : vector<196x32xf32>
    %cst_19 = arith.constant 0.000000e+00 : f32
    %19 = vector.broadcast %cst_19 : f32 to vector<196x32xf32>
    %20 = arith.maximumf %18, %19 : vector<196x32xf32>
    %21 = arith.truncf %20 : vector<196x32xf32> to vector<196x32xbf16>
    %c0_20 = arith.constant 0 : index
    %c0_21 = arith.constant 0 : index
    %c0_22 = arith.constant 0 : index
    %22 = vector.load %arg4[%c0_20, %c0_21, %c0_22] : memref<2x196x32xbf16, #tpu.memory_space<vmem>>, vector<1x196x32xbf16>
    %23 = vector.shape_cast %22 : vector<1x196x32xbf16> to vector<196x32xbf16>
    %24 = vector.shape_cast %21 : vector<196x32xbf16> to vector<1x196x32xbf16>
    tpu.vector_store %arg4[%c0_20, %c0_21, %c0_22], %24 {strides = array<i32>} : memref<2x196x32xbf16, #tpu.memory_space<vmem>>, vector<1x196x32xbf16>,
    %c1_23 = arith.constant 1 : index
    %c0_24 = arith.constant 0 : index
    %c0_25 = arith.constant 0 : index
    %c0_26 = arith.constant 0 : index
    %25 = vector.load %arg1[%c1_23, %c0_24, %c0_25, %c0_26] : memref<2x4x196x25xf32, #tpu.memory_space<vmem>>, vector<1x1x196x25xf32>
    %26 = vector.shape_cast %25 : vector<1x1x196x25xf32> to vector<196x25xf32>
    %cst_27 = arith.constant dense<0.000000e+00> : vector<196x32xf32>
    %27 = tpu.matmul %26, %0, %cst_27 {dimension_numbers = #tpu.dot_dimension_numbers<[1], [0], [0], [1], [0, 0, 1, 1], [], []>} : vector<196x25xf32>, vector<25x32xf32>, vector<196x32xf32> -> vector<196x32xf32>
    %c1_28 = arith.constant 1 : index
    %c1_29 = arith.constant 1 : index
    %c0_30 = arith.constant 0 : index
    %c0_31 = arith.constant 0 : index
    %28 = vector.load %arg1[%c1_28, %c1_29, %c0_30, %c0_31] : memref<2x4x196x25xf32, #tpu.memory_space<vmem>>, vector<1x1x196x25xf32>
    %29 = vector.shape_cast %28 : vector<1x1x196x25xf32> to vector<196x25xf32>
    %cst_32 = arith.constant dense<0.000000e+00> : vector<196x32xf32>
    %30 = tpu.matmul %29, %0, %cst_32 {dimension_numbers = #tpu.dot_dimension_numbers<[1], [0], [0], [1], [0, 0, 1, 1], [], []>} : vector<196x25xf32>, vector<25x32xf32>, vector<196x32xf32> -> vector<196x32xf32>
    %31 = arith.maximumf %27, %30 : vector<196x32xf32>
    %c1_33 = arith.constant 1 : index
    %c2_34 = arith.constant 2 : index
    %c0_35 = arith.constant 0 : index
    %c0_36 = arith.constant 0 : index
    %32 = vector.load %arg1[%c1_33, %c2_34, %c0_35, %c0_36] : memref<2x4x196x25xf32, #tpu.memory_space<vmem>>, vector<1x1x196x25xf32>
    %33 = vector.shape_cast %32 : vector<1x1x196x25xf32> to vector<196x25xf32>
    %cst_37 = arith.constant dense<0.000000e+00> : vector<196x32xf32>
    %34 = tpu.matmul %33, %0, %cst_37 {dimension_numbers = #tpu.dot_dimension_numbers<[1], [0], [0], [1], [0, 0, 1, 1], [], []>} : vector<196x25xf32>, vector<25x32xf32>, vector<196x32xf32> -> vector<196x32xf32>
    %35 = arith.maximumf %31, %34 : vector<196x32xf32>
    %c1_38 = arith.constant 1 : index
    %c3_39 = arith.constant 3 : index
    %c0_40 = arith.constant 0 : index
    %c0_41 = arith.constant 0 : index
    %36 = vector.load %arg1[%c1_38, %c3_39, %c0_40, %c0_41] : memref<2x4x196x25xf32, #tpu.memory_space<vmem>>, vector<1x1x196x25xf32>
    %37 = vector.shape_cast %36 : vector<1x1x196x25xf32> to vector<196x25xf32>
    %cst_42 = arith.constant dense<0.000000e+00> : vector<196x32xf32>
    %38 = tpu.matmul %37, %0, %cst_42 {dimension_numbers = #tpu.dot_dimension_numbers<[1], [0], [0], [1], [0, 0, 1, 1], [], []>} : vector<196x25xf32>, vector<25x32xf32>, vector<196x32xf32> -> vector<196x32xf32>
    %39 = arith.maximumf %35, %38 : vector<196x32xf32>
    %40 = vector.broadcast %1 : vector<1x32xf32> to vector<196x32xf32>
    %41 = arith.addf %39, %40 : vector<196x32xf32>
    %cst_43 = arith.constant 0.000000e+00 : f32
    %42 = vector.broadcast %cst_43 : f32 to vector<196x32xf32>
    %43 = arith.maximumf %41, %42 : vector<196x32xf32>
    %44 = arith.truncf %43 : vector<196x32xf32> to vector<196x32xbf16>
    %c1_44 = arith.constant 1 : index
    %c0_45 = arith.constant 0 : index
    %c0_46 = arith.constant 0 : index
    %45 = vector.load %arg4[%c1_44, %c0_45, %c0_46] : memref<2x196x32xbf16, #tpu.memory_space<vmem>>, vector<1x196x32xbf16>
    %46 = vector.shape_cast %45 : vector<1x196x32xbf16> to vector<196x32xbf16>
    %47 = vector.shape_cast %44 : vector<196x32xbf16> to vector<1x196x32xbf16>
    tpu.vector_store %arg4[%c1_44, %c0_45, %c0_46], %47 {strides = array<i32>} : memref<2x196x32xbf16, #tpu.memory_space<vmem>>, vector<1x196x32xbf16>,
    return
  }
  func.func @transform_0(%arg0: i32) -> (i32, i32, i32, i32) {
    %c0_i32 = arith.constant 0 : i32
    %c0_i32_0 = arith.constant 0 : i32
    %c0_i32_1 = arith.constant 0 : i32
    %c0_i32_2 = arith.constant 0 : i32
    return %arg0, %c0_i32, %c0_i32_0, %c0_i32_1 : i32, i32, i32, i32
  }
  func.func @transform_1(%arg0: i32) -> (i32, i32) {
    %c0_i32 = arith.constant 0 : i32
    %c0_i32_0 = arith.constant 0 : i32
    %c0_i32_1 = arith.constant 0 : i32
    return %c0_i32, %c0_i32_0 : i32, i32
  }
  func.func @transform_2(%arg0: i32) -> (i32, i32) {
    %c0_i32 = arith.constant 0 : i32
    %c0_i32_0 = arith.constant 0 : i32
    %c0_i32_1 = arith.constant 0 : i32
    return %c0_i32, %c0_i32_0 : i32, i32
  }
  func.func @transform_3(%arg0: i32) -> (i32, i32, i32) {
    %c0_i32 = arith.constant 0 : i32
    %c0_i32_0 = arith.constant 0 : i32
    %c0_i32_1 = arith.constant 0 : i32
    return %arg0, %c0_i32, %c0_i32_0 : i32, i32, i32
  }
}

module attributes {stable_mosaic.version = 11 : i64} {
  func.func @fc_head_kernel(%arg0: i32, %arg1: i32, %arg2: memref<2x896xbf16, #tpu.memory_space<vmem>>, %arg3: memref<896x1024xbf16, #tpu.memory_space<vmem>>, %arg4: memref<1x1024xf32, #tpu.memory_space<vmem>>, %arg5: memref<1024x10xf32, #tpu.memory_space<vmem>>, %arg6: memref<1x10xf32, #tpu.memory_space<vmem>>, %arg7: memref<2x1xi32, #tpu.memory_space<vmem>>, %arg8: memref<2x1024xf32, #tpu.memory_space<vmem>>) attributes {dimension_semantics = [#tpu.dimension_semantics<parallel>, #tpu.dimension_semantics<arbitrary>], iteration_bounds = array<i64: 1, 7>, scalar_prefetch = 0 : i64, scratch_operands = 1 : i64, tpu.core_type = #tpu.core_type<tc>, window_params = [{transform_indices = @transform_0, window_bounds = array<i64: 2, 896>}, {transform_indices = @transform_1, window_bounds = array<i64: 896, 1024>}, {pipeline_mode = #tpu.pipeline_mode<synchronous>, transform_indices = @transform_2, window_bounds = array<i64: 1, 1024>}, {pipeline_mode = #tpu.pipeline_mode<synchronous>, transform_indices = @transform_3, window_bounds = array<i64: 1024, 10>}, {pipeline_mode = #tpu.pipeline_mode<synchronous>, transform_indices = @transform_4, window_bounds = array<i64: 1, 10>}, {transform_indices = @transform_5, window_bounds = array<i64: 2, 1>}]} {
    %c0_i32 = arith.constant 0 : i32
    %0 = arith.cmpi eq, %arg1, %c0_i32 : i32
    %1 = arith.extui %0 : i1 to i32
    %c0_i32_0 = arith.constant 0 : i32
    %2 = arith.cmpi ne, %1, %c0_i32_0 : i32
    scf.if %2 {
      %cst_9 = arith.constant 0.000000e+00 : f32
      %12 = vector.broadcast %cst_9 : f32 to vector<2x1024xf32>
      %c0_10 = arith.constant 0 : index
      %c0_11 = arith.constant 0 : index
      %13 = vector.load %arg8[%c0_10, %c0_11] : memref<2x1024xf32, #tpu.memory_space<vmem>>, vector<2x1024xf32>
      tpu.vector_store %arg8[%c0_10, %c0_11], %12 {strides = array<i32>} : memref<2x1024xf32, #tpu.memory_space<vmem>>, vector<2x1024xf32>,
    } else {
    }
    %c0 = arith.constant 0 : index
    %c0_1 = arith.constant 0 : index
    %3 = vector.load %arg8[%c0, %c0_1] : memref<2x1024xf32, #tpu.memory_space<vmem>>, vector<2x1024xf32>
    %c0_2 = arith.constant 0 : index
    %c0_3 = arith.constant 0 : index
    %4 = vector.load %arg2[%c0_2, %c0_3] : memref<2x896xbf16, #tpu.memory_space<vmem>>, vector<2x896xbf16>
    %c0_4 = arith.constant 0 : index
    %c0_5 = arith.constant 0 : index
    %5 = vector.load %arg3[%c0_4, %c0_5] : memref<896x1024xbf16, #tpu.memory_space<vmem>>, vector<896x1024xbf16>
    %cst = arith.constant dense<0.000000e+00> : vector<2x1024xf32>
    %6 = tpu.matmul %4, %5, %cst {dimension_numbers = #tpu.dot_dimension_numbers<[1], [0], [0], [1], [0, 0, 1, 1], [], []>} : vector<2x896xbf16>, vector<896x1024xbf16>, vector<2x1024xf32> -> vector<2x1024xf32>
    %7 = arith.addf %3, %6 : vector<2x1024xf32>
    %c0_6 = arith.constant 0 : index
    %c0_7 = arith.constant 0 : index
    %8 = vector.load %arg8[%c0_6, %c0_7] : memref<2x1024xf32, #tpu.memory_space<vmem>>, vector<2x1024xf32>
    tpu.vector_store %arg8[%c0_6, %c0_7], %7 {strides = array<i32>} : memref<2x1024xf32, #tpu.memory_space<vmem>>, vector<2x1024xf32>,
    %c6_i32 = arith.constant 6 : i32
    %9 = arith.cmpi eq, %arg1, %c6_i32 : i32
    %10 = arith.extui %9 : i1 to i32
    %c0_i32_8 = arith.constant 0 : i32
    %11 = arith.cmpi ne, %10, %c0_i32_8 : i32
    scf.if %11 {
      %c0_9 = arith.constant 0 : index
      %c0_10 = arith.constant 0 : index
      %12 = vector.load %arg8[%c0_9, %c0_10] : memref<2x1024xf32, #tpu.memory_space<vmem>>, vector<2x1024xf32>
      %c0_11 = arith.constant 0 : index
      %c0_12 = arith.constant 0 : index
      %13 = vector.load %arg4[%c0_11, %c0_12] : memref<1x1024xf32, #tpu.memory_space<vmem>>, vector<1x1024xf32>
      %14 = vector.broadcast %13 : vector<1x1024xf32> to vector<2x1024xf32>
      %15 = arith.addf %12, %14 : vector<2x1024xf32>
      %cst_13 = arith.constant 0.000000e+00 : f32
      %16 = vector.broadcast %cst_13 : f32 to vector<2x1024xf32>
      %17 = arith.maximumf %15, %16 : vector<2x1024xf32>
      %c0_14 = arith.constant 0 : index
      %c0_15 = arith.constant 0 : index
      %18 = vector.load %arg5[%c0_14, %c0_15] : memref<1024x10xf32, #tpu.memory_space<vmem>>, vector<1024x10xf32>
      %cst_16 = arith.constant dense<0.000000e+00> : vector<2x10xf32>
      %19 = tpu.matmul %17, %18, %cst_16 {dimension_numbers = #tpu.dot_dimension_numbers<[1], [0], [0], [1], [0, 0, 1, 1], [], []>} : vector<2x1024xf32>, vector<1024x10xf32>, vector<2x10xf32> -> vector<2x10xf32>
      %c0_17 = arith.constant 0 : index
      %c0_18 = arith.constant 0 : index
      %20 = vector.load %arg6[%c0_17, %c0_18] : memref<1x10xf32, #tpu.memory_space<vmem>>, vector<1x10xf32>
      %21 = vector.broadcast %20 : vector<1x10xf32> to vector<2x10xf32>
      %22 = arith.addf %19, %21 : vector<2x10xf32>
      %23 = tpu.iota {dimensions = array<i32: 1>} : vector<2x10xi32>
      %cst_19 = arith.constant dense<0xFF800000> : vector<2xf32>
      %24 = vector.multi_reduction <maximumf>, %22, %cst_19 [1] : vector<2x10xf32> to vector<2xf32>
      %25 = vector.shape_cast %24 : vector<2xf32> to vector<2x1xf32>
      %26 = vector.broadcast %25 : vector<2x1xf32> to vector<2x10xf32>
      %27 = arith.cmpf oeq, %22, %26 : vector<2x10xf32>
      %c10_i32 = arith.constant 10 : i32
      %28 = vector.broadcast %c10_i32 : i32 to vector<2x10xi32>
      %29 = arith.select %27, %23, %28 : vector<2x10xi1>, vector<2x10xi32>
      %cst_20 = arith.constant dense<2147483647> : vector<2xi32>
      %30 = vector.multi_reduction <minsi>, %29, %cst_20 [1] : vector<2x10xi32> to vector<2xi32>
      %31 = vector.shape_cast %30 : vector<2xi32> to vector<2x1xi32>
      %c0_21 = arith.constant 0 : index
      %c0_22 = arith.constant 0 : index
      %32 = vector.load %arg7[%c0_21, %c0_22] : memref<2x1xi32, #tpu.memory_space<vmem>>, vector<2x1xi32>
      tpu.vector_store %arg7[%c0_21, %c0_22], %31 {strides = array<i32>} : memref<2x1xi32, #tpu.memory_space<vmem>>, vector<2x1xi32>,
    } else {
    }
    return
  }
  func.func @transform_0(%arg0: i32, %arg1: i32) -> (i32, i32) {
    %c0_i32 = arith.constant 0 : i32
    return %arg0, %arg1 : i32, i32
  }
  func.func @transform_1(%arg0: i32, %arg1: i32) -> (i32, i32) {
    %c0_i32 = arith.constant 0 : i32
    %c0_i32_0 = arith.constant 0 : i32
    return %arg1, %c0_i32 : i32, i32
  }
  func.func @transform_2(%arg0: i32, %arg1: i32) -> (i32, i32) {
    %c0_i32 = arith.constant 0 : i32
    %c0_i32_0 = arith.constant 0 : i32
    %c0_i32_1 = arith.constant 0 : i32
    return %c0_i32, %c0_i32_0 : i32, i32
  }
  func.func @transform_3(%arg0: i32, %arg1: i32) -> (i32, i32) {
    %c0_i32 = arith.constant 0 : i32
    %c0_i32_0 = arith.constant 0 : i32
    %c0_i32_1 = arith.constant 0 : i32
    return %c0_i32, %c0_i32_0 : i32, i32
  }
  func.func @transform_4(%arg0: i32, %arg1: i32) -> (i32, i32) {
    %c0_i32 = arith.constant 0 : i32
    %c0_i32_0 = arith.constant 0 : i32
    %c0_i32_1 = arith.constant 0 : i32
    return %c0_i32, %c0_i32_0 : i32, i32
  }
  func.func @transform_5(%arg0: i32, %arg1: i32) -> (i32, i32) {
    %c0_i32 = arith.constant 0 : i32
    %c0_i32_0 = arith.constant 0 : i32
    return %arg0, %c0_i32 : i32, i32
  }
}

</mosaic_0001>

<bundles_post_ra>
// kernel: cnn_forward.2
= control target key start
LH: loop header
LB: loop body
LE: loop exit
PB: predicated region body
PF: predicated region fallthrough
CT: control target
= control target key end

     0   :  { %vm120_vm0 = vcmask 1040384   ;;  %vm44_vm1 = vcmask 203776   ;;  %vm948_vm2 = vcmask 257024   ;;  %vm973_vm3 = vcmask 254976   ;;  %s3437_s1 = inlined_call_operand.vmem [shape: f32[25,32], index: 1, kind: input, shape index: {}]   ;;  %s3438_s0 = inlined_call_operand.vmem [shape: f32[2,4,196,25], index: 0, kind: input, shape index: {}]   ;;  %s3439_s2 = inlined_call_operand.vmem [shape: f32[1,32], index: 2, kind: input, shape index: {}]   ;;  %s3440_s3 = inlined_call_operand.vmem [shape: bf16[2,196,32], index: 3, kind: output, shape index: {}]  }
   0x1   :  { %v17_v0 = vld [vmem:[%s3437_s1 + $0x18] sm:$0x1]  ;;  %v16_v1 = vld [vmem:[%s3437_s1 + $0x10] sm:$0xff]  ;;  %v15_v2 = vld [vmem:[%s3437_s1 + $0x8] sm:$0xff] }
   0x2   :  { %2029 = vmatpush.msk.msra.mxu2 %vm120_vm0, %v17_v0  ;;  %2080 = vmatpush.msk.msra.mxu3 %vm120_vm0, %v17_v0  ;;  %v14_v3 = vld [vmem:[%s3437_s1] sm:$0xff]  ;;  %v2004_v4 = vld [vmem:[%s3438_s0 + $0x190] sm:$0xff]  ;;  %v2055_v5 = vld [vmem:[%s3438_s0 + $0x258] sm:$0xff] }
   0x3   :  { %1927 = vmatpush.msk.msra.mxu0 %vm120_vm0, %v17_v0  ;;  %1978 = vmatpush.msk.msra.mxu1 %vm120_vm0, %v17_v0  ;;  %v19_v6 = vld [vmem:[%s3438_s0] sm:$0xff]  ;;  %v1953_v7 = vld [vmem:[%s3438_s0 + $0xc8] sm:$0xff]  ;;  %v2005_v8 = vld [vmem:[%s3438_s0 + $0x198] sm:$0xff] }
   0x4   :  { %548 = vmatpush.msra.mxu2 %v16_v1  ;;  %766 = vmatpush.msra.mxu3 %v16_v1  ;;  %v2056_v9 = vld [vmem:[%s3438_s0 + $0x260] sm:$0xff]  ;;  %v20_v10 = vld [vmem:[%s3438_s0 + $0x8] sm:$0xff]  ;;  %v1954_v11 = vld [vmem:[%s3438_s0 + $0xd0] sm:$0xff] }
   0x5   :  { %137 = vmatpush.msra.mxu0 %v16_v1  ;;  %330 = vmatpush.msra.mxu1 %v16_v1  ;;  %v2006_v12 = vld [vmem:[%s3438_s0 + $0x1a0] sm:$0xff]  ;;  %v2057_v13 = vld [vmem:[%s3438_s0 + $0x268] sm:$0xff]  ;;  %v21_v14 = vld [vmem:[%s3438_s0 + $0x10] sm:$0xff] }
   0x6   :  { %549 = vmatpush.msra.mxu2 %v15_v2  ;;  %767 = vmatpush.msra.mxu3 %v15_v2  ;;  %v1955_v15 = vld [vmem:[%s3438_s0 + $0xd8] sm:$0xff]  ;;  %v2007_v16 = vld [vmem:[%s3438_s0 + $0x1a8] sm:$0xff]  ;;  %v2058_v17 = vld [vmem:[%s3438_s0 + $0x270] sm:$0xff] }
   0x7   :  { %138 = vmatpush.msra.mxu0 %v15_v2  ;;  %331 = vmatpush.msra.mxu1 %v15_v2  ;;  %v22_v18 = vld [vmem:[%s3438_s0 + $0x18] sm:$0xff]  ;;  %v1956_v19 = vld [vmem:[%s3438_s0 + $0xe0] sm:$0xff]  ;;  %v2008_v20 = vld [vmem:[%s3438_s0 + $0x1b0] sm:$0xff] }
   0x8   :  { %550 = vmatpush.msra.mxu2 %v14_v3  ;;  %768 = vmatpush.msra.mxu3 %v14_v3  ;;  %v2059_v21 = vld [vmem:[%s3438_s0 + $0x278] sm:$0xff]  ;;  %v23_v22 = vld [vmem:[%s3438_s0 + $0x20] sm:$0xff]  ;;  %v1957_v23 = vld [vmem:[%s3438_s0 + $0xe8] sm:$0xff] }
   0x9   :  { %2030 = vmatmul.msk.f32.vlgmr.msra.gmra.mxu2 %vm44_vm1, %v2004_v4  ;;  %2081 = vmatmul.msk.f32.vlgmr.msra.gmra.mxu3 %vm44_vm1, %v2055_v5  ;;  %v2009_v24 = vld [vmem:[%s3438_s0 + $0x1b8] sm:$0xff]  ;;  %v2060_v25 = vld [vmem:[%s3438_s0 + $0x280] sm:$0xff]  ;;  %v24_v26 = vld [vmem:[%s3438_s0 + $0x28] sm:$0xff] }
   0xa   :  { %2233 = vmatpush.msk.msrb.mxu2 %vm120_vm0, %v17_v0  ;;  %2284 = vmatpush.msk.msrb.mxu3 %vm120_vm0, %v17_v0  ;;  %v1958_v27 = vld [vmem:[%s3438_s0 + $0xf0] sm:$0xff]  ;;  %v2010_v28 = vld [vmem:[%s3438_s0 + $0x1c0] sm:$0xff]  ;;  %v2061_v29 = vld [vmem:[%s3438_s0 + $0x288] sm:$0xff] }
   0xb   :  { %139 = vmatpush.msra.mxu0 %v14_v3  ;;  %332 = vmatpush.msra.mxu1 %v14_v3  ;;  %v25_v30 = vld [vmem:[%s3438_s0 + $0x30] sm:$0xff]  ;;  %v1959_v31 = vld [vmem:[%s3438_s0 + $0xf8] sm:$0xff]  ;;  %v2011_v32 = vld [vmem:[%s3438_s0 + $0x1c8] sm:$0xff] }
   0xc   :  { %1928 = vmatmul.msk.f32.vlgmr.msra.gmra.mxu0 %vm44_vm1, %v19_v6  ;;  %1979 = vmatmul.msk.f32.vlgmr.msra.gmra.mxu1 %vm44_vm1, %v1953_v7  ;;  %v2062_v33 = vld [vmem:[%s3438_s0 + $0x290] sm:$0xff]  ;;  %v26_v34 = vld [vmem:[%s3438_s0 + $0x38] sm:$0xff]  ;;  %v1960_v35 = vld [vmem:[%s3438_s0 + $0x100] sm:$0xff] }
   0xd   :  { %2131 = vmatpush.msk.msrb.mxu0 %vm120_vm0, %v17_v0  ;;  %2182 = vmatpush.msk.msrb.mxu1 %vm120_vm0, %v17_v0  ;;  %v2012_v36 = vld [vmem:[%s3438_s0 + $0x1d0] sm:$0xff]  ;;  %v2063_v37 = vld [vmem:[%s3438_s0 + $0x298] sm:$0xff]  ;;  %v27_v38 = vld [vmem:[%s3438_s0 + $0x40] sm:$0xff] }
   0xe   :  { %1500 = vmatpush.msrb.mxu2 %v16_v1  ;;  %1718 = vmatpush.msrb.mxu3 %v16_v1  ;;  %v1961_v39 = vld [vmem:[%s3438_s0 + $0x108] sm:$0xff]  ;;  %v2013_v40 = vld [vmem:[%s3438_s0 + $0x1d8] sm:$0xff]  ;;  %v2064_v41 = vld [vmem:[%s3438_s0 + $0x2a0] sm:$0xff] }
   0xf   :  { %1089 = vmatpush.msrb.mxu0 %v16_v1  ;;  %1282 = vmatpush.msrb.mxu1 %v16_v1  ;;  %v28_v42 = vld [vmem:[%s3438_s0 + $0x48] sm:$0xff]  ;;  %v1962_v43 = vld [vmem:[%s3438_s0 + $0x110] sm:$0xff]  ;;  %v2014_v44 = vld [vmem:[%s3438_s0 + $0x1e0] sm:$0xff] }
  0x10   :  { %1501 = vmatpush.msrb.mxu2 %v15_v2  ;;  %1719 = vmatpush.msrb.mxu3 %v15_v2  ;;  %v2065_v45 = vld [vmem:[%s3438_s0 + $0x2a8] sm:$0xff]  ;;  %v29_v46 = vld [vmem:[%s3438_s0 + $0x50] sm:$0xff]  ;;  %v1963_v47 = vld [vmem:[%s3438_s0 + $0x118] sm:$0xff] }
  0x11   :  { %2031 = vmatmul.msk.f32.gmra.mxu2 %vm44_vm1, %v2005_v8  ;;  %2082 = vmatmul.msk.f32.gmra.mxu3 %vm44_vm1, %v2056_v9  ;;  %v2015_v48 = vld [vmem:[%s3438_s0 + $0x1e8] sm:$0xff]  ;;  %v2066_v49 = vld [vmem:[%s3438_s0 + $0x2b0] sm:$0xff]  ;;  %v30_v50 = vld [vmem:[%s3438_s0 + $0x58] sm:$0xff] }
  0x12   :  { %1090 = vmatpush.msrb.mxu0 %v15_v2  ;;  %1283 = vmatpush.msrb.mxu1 %v15_v2  ;;  %v1964_v51 = vld [vmem:[%s3438_s0 + $0x120] sm:$0xff]  ;;  %v2016_v52 = vld [vmem:[%s3438_s0 + $0x1f0] sm:$0xff]  ;;  %v2067_v53 = vld [vmem:[%s3438_s0 + $0x2b8] sm:$0xff] }
  0x13   :  { %1502 = vmatpush.msrb.mxu2 %v14_v3  ;;  %1720 = vmatpush.msrb.mxu3 %v14_v3  ;;  %v31_v54 = vld [vmem:[%s3438_s0 + $0x60] sm:$0xff]  ;;  %v1965_v55 = vld [vmem:[%s3438_s0 + $0x128] sm:$0xff]  ;;  %v2017_v56 = vld [vmem:[%s3438_s0 + $0x1f8] sm:$0xff] }
  0x14   :  { %1929 = vmatmul.msk.f32.gmra.mxu0 %vm44_vm1, %v20_v10  ;;  %1980 = vmatmul.msk.f32.gmra.mxu1 %vm44_vm1, %v1954_v11  ;;  %v2068_v57 = vld [vmem:[%s3438_s0 + $0x2c0] sm:$0xff]  ;;  %v32_v58 = vld [vmem:[%s3438_s0 + $0x68] sm:$0xff]  ;;  %v1966_v59 = vld [vmem:[%s3438_s0 + $0x130] sm:$0xff] }
  0x15   :  { %1091 = vmatpush.msrb.mxu0 %v14_v3  ;;  %1284 = vmatpush.msrb.mxu1 %v14_v3  ;;  %v2018_v60 = vld [vmem:[%s3438_s0 + $0x200] sm:$0xff]  ;;  %v2069_v61 = vld [vmem:[%s3438_s0 + $0x2c8] sm:$0xff]  ;;  %v33_v62 = vld [vmem:[%s3438_s0 + $0x70] sm:$0xff] }
  0x16   :  { %v1967_v63 = vld [vmem:[%s3438_s0 + $0x138] sm:$0xff]  ;;  %v2019_v0 = vld [vmem:[%s3438_s0 + $0x208] sm:$0xff]  ;;  %v2070_v1 = vld [vmem:[%s3438_s0 + $0x2d0] sm:$0xff] }
  0x17   :  { %v34_v2 = vld [vmem:[%s3438_s0 + $0x78] sm:$0xff]  ;;  %v1968_v3 = vld [vmem:[%s3438_s0 + $0x140] sm:$0xff]  ;;  %v2020_v4 = vld [vmem:[%s3438_s0 + $0x210] sm:$0xff] }
  0x18   :  { %v2071_v5 = vld [vmem:[%s3438_s0 + $0x2d8] sm:$0xff]  ;;  %v35_v8 = vld [vmem:[%s3438_s0 + $0x80] sm:$0xff]  ;;  %v1969_v9 = vld [vmem:[%s3438_s0 + $0x148] sm:$0xff] }
  0x19   :  { %2032 = vmatmul.msk.f32.gmra.mxu2 %vm44_vm1, %v2006_v12  ;;  %2083 = vmatmul.msk.f32.gmra.mxu3 %vm44_vm1, %v2057_v13 }
  0x1c   :  { %1930 = vmatmul.msk.f32.gmra.mxu0 %vm44_vm1, %v21_v14  ;;  %1981 = vmatmul.msk.f32.gmra.mxu1 %vm44_vm1, %v1955_v15  ;;  %v2652_v14 = vld [vmem:[%s3439_s2] ss:$0 sm:$0xff]  ;;  %v2021_v15 = vld [vmem:[%s3438_s0 + $0x218] sm:$0xff] }
  0x21   :  { %2033 = vmatmul.msk.f32.gmra.mxu2 %vm44_vm1, %v2007_v16  ;;  %2084 = vmatmul.msk.f32.gmra.mxu3 %vm44_vm1, %v2058_v17  ;;  %v2072_v16 = vld [vmem:[%s3438_s0 + $0x2e0] sm:$0xff] }
  0x24   :  { %1931 = vmatmul.msk.f32.gmra.mxu0 %vm44_vm1, %v22_v18  ;;  %1982 = vmatmul.msk.f32.gmra.mxu1 %vm44_vm1, %v1956_v19 }
  0x29   :  { %2034 = vmatmul.msk.f32.gmra.mxu2 %vm44_vm1, %v2008_v20  ;;  %2085 = vmatmul.msk.f32.gmra.mxu3 %vm44_vm1, %v2059_v21  ;;  %v36_v21 = vld [vmem:[%s3438_s0 + $0x88] sm:$0xff] }
  0x2c   :  { %1932 = vmatmul.msk.f32.gmra.mxu0 %vm44_vm1, %v23_v22  ;;  %1983 = vmatmul.msk.f32.gmra.mxu1 %vm44_vm1, %v1957_v23  ;;  %v1970_v22 = vld [vmem:[%s3438_s0 + $0x150] sm:$0xff] }
  0x31   :  { %2035 = vmatmul.msk.f32.gmra.mxu2 %vm44_vm1, %v2009_v24  ;;  %2086 = vmatmul.msk.f32.gmra.mxu3 %vm44_vm1, %v2060_v25 }
  0x34   :  { %1933 = vmatmul.msk.f32.gmra.mxu0 %vm44_vm1, %v24_v26  ;;  %1984 = vmatmul.msk.f32.gmra.mxu1 %vm44_vm1, %v1958_v27 }
  0x39   :  { %2036 = vmatmul.msk.f32.gmra.mxu2 %vm44_vm1, %v2010_v28  ;;  %2087 = vmatmul.msk.f32.gmra.mxu3 %vm44_vm1, %v2061_v29  ;;  %v2022_v29 = vld [vmem:[%s3438_s0 + $0x220] sm:$0xff] }
  0x3c   :  { %1934 = vmatmul.msk.f32.gmra.mxu0 %vm44_vm1, %v25_v30  ;;  %1985 = vmatmul.msk.f32.gmra.mxu1 %vm44_vm1, %v1959_v31  ;;  %v2073_v30 = vld [vmem:[%s3438_s0 + $0x2e8] sm:$0xff] }
  0x41   :  { %2037 = vmatmul.msk.f32.gmra.mxu2 %vm44_vm1, %v2011_v32  ;;  %2088 = vmatmul.msk.f32.gmra.mxu3 %vm44_vm1, %v2062_v33 }
  0x44   :  { %1935 = vmatmul.msk.f32.gmra.mxu0 %vm44_vm1, %v26_v34  ;;  %1986 = vmatmul.msk.f32.gmra.mxu1 %vm44_vm1, %v1960_v35  ;;  %v37_v35 = vld [vmem:[%s3438_s0 + $0x90] sm:$0xff] }
  0x49   :  { %2038 = vmatmul.msk.f32.gmra.mxu2 %vm44_vm1, %v2012_v36  ;;  %2089 = vmatmul.msk.f32.gmra.mxu3 %vm44_vm1, %v2063_v37  ;;  %v1971_v36 = vld [vmem:[%s3438_s0 + $0x158] sm:$0xff] }
  0x4c   :  { %1936 = vmatmul.msk.f32.gmra.mxu0 %vm44_vm1, %v27_v38  ;;  %1987 = vmatmul.msk.f32.gmra.mxu1 %vm44_vm1, %v1961_v39 }
  0x51   :  { %2039 = vmatmul.msk.f32.gmra.mxu2 %vm44_vm1, %v2013_v40  ;;  %2090 = vmatmul.msk.f32.gmra.mxu3 %vm44_vm1, %v2064_v41 }
  0x54   :  { %1937 = vmatmul.msk.f32.gmra.mxu0 %vm44_vm1, %v28_v42  ;;  %1988 = vmatmul.msk.f32.gmra.mxu1 %vm44_vm1, %v1962_v43  ;;  %v2023_v43 = vld [vmem:[%s3438_s0 + $0x228] sm:$0xff] }
  0x59   :  { %2040 = vmatmul.msk.f32.gmra.mxu2 %vm44_vm1, %v2014_v44  ;;  %2091 = vmatmul.msk.f32.gmra.mxu3 %vm44_vm1, %v2065_v45  ;;  %v2074_v44 = vld [vmem:[%s3438_s0 + $0x2f0] sm:$0xff] }
  0x5c   :  { %1938 = vmatmul.msk.f32.gmra.mxu0 %vm44_vm1, %v29_v46  ;;  %1989 = vmatmul.msk.f32.gmra.mxu1 %vm44_vm1, %v1963_v47 }
  0x61   :  { %2041 = vmatmul.msk.f32.gmra.mxu2 %vm44_vm1, %v2015_v48  ;;  %2092 = vmatmul.msk.f32.gmra.mxu3 %vm44_vm1, %v2066_v49  ;;  %v38_v49 = vld [vmem:[%s3438_s0 + $0x98] sm:$0xff] }
  0x64   :  { %1939 = vmatmul.msk.f32.gmra.mxu0 %vm44_vm1, %v30_v50  ;;  %1990 = vmatmul.msk.f32.gmra.mxu1 %vm44_vm1, %v1964_v51  ;;  %v1972_v50 = vld [vmem:[%s3438_s0 + $0x160] sm:$0xff] }
  0x69   :  { %2042 = vmatmul.msk.f32.gmra.mxu2 %vm44_vm1, %v2016_v52  ;;  %2093 = vmatmul.msk.f32.gmra.mxu3 %vm44_vm1, %v2067_v53 }
  0x6c   :  { %1940 = vmatmul.msk.f32.gmra.mxu0 %vm44_vm1, %v31_v54  ;;  %1991 = vmatmul.msk.f32.gmra.mxu1 %vm44_vm1, %v1965_v55 }
  0x71   :  { %2043 = vmatmul.msk.f32.gmra.mxu2 %vm44_vm1, %v2017_v56  ;;  %2094 = vmatmul.msk.f32.gmra.mxu3 %vm44_vm1, %v2068_v57  ;;  %v2024_v57 = vld [vmem:[%s3438_s0 + $0x230] sm:$0xff] }
  0x74   :  { %1941 = vmatmul.msk.f32.gmra.mxu0 %vm44_vm1, %v32_v58  ;;  %1992 = vmatmul.msk.f32.gmra.mxu1 %vm44_vm1, %v1966_v59  ;;  %v2075_v58 = vld [vmem:[%s3438_s0 + $0x2f8] sm:$0xff] }
  0x79   :  { %2044 = vmatmul.msk.f32.gmra.mxu2 %vm44_vm1, %v2018_v60  ;;  %2095 = vmatmul.msk.f32.gmra.mxu3 %vm44_vm1, %v2069_v61 }
  0x7c   :  { %1942 = vmatmul.msk.f32.gmra.mxu0 %vm44_vm1, %v33_v62  ;;  %1993 = vmatmul.msk.f32.gmra.mxu1 %vm44_vm1, %v1967_v63  ;;  %v39_v63 = vld [vmem:[%s3438_s0 + $0xa0] sm:$0xff] }
  0x81   :  { %2045 = vmatmul.msk.f32.gmra.mxu2 %vm44_vm1, %v2019_v0  ;;  %2096 = vmatmul.msk.f32.gmra.mxu3 %vm44_vm1, %v2070_v1  ;;  %v1973_v0 = vld [vmem:[%s3438_s0 + $0x168] sm:$0xff] }
  0x84   :  { %1943 = vmatmul.msk.f32.gmra.mxu0 %vm44_vm1, %v34_v2  ;;  %1994 = vmatmul.msk.f32.gmra.mxu1 %vm44_vm1, %v1968_v3 }
  0x89   :  { %2046 = vmatmul.msk.f32.gmra.mxu2 %vm44_vm1, %v2020_v4  ;;  %v141_v6 = vpop.f32.mrf.mxu0  ;;  %v334_v7 = vpop.f32.mrf.mxu1  ;;  %2097 = vmatmul.msk.f32.gmra.mxu3 %vm44_vm1, %v2071_v5 }
  0x8a   :  { %v409_v10 = vmax.f32 %v141_v6, %v334_v7  ;;  %v2025_v7 = vld [vmem:[%s3438_s0 + $0x238] sm:$0xff] }
  0x8c   :  { %v552_v11 = vpop.f32.mrf.mxu2  ;;  %1944 = vmatmul.msk.f32.gmra.mxu0 %vm44_vm1, %v35_v8  ;;  %1995 = vmatmul.msk.f32.gmra.mxu1 %vm44_vm1, %v1969_v9  ;;  %v770_v12 = vpop.f32.mrf.mxu3  ;;  %v2076_v8 = vld [vmem:[%s3438_s0 + $0x300] sm:$0xff] }
  0x8d   :  { %v627_v13 = vmax.f32 %v409_v10, %v552_v11 }
  0x8f   :  { %v845_v17 = vmax.f32 %v627_v13, %v770_v12  ;;  %v40_v13 = vld [vmem:[%s3438_s0 + $0xa8] sm:$0xff] }
  0x91   :  { %v873_v18 = vadd.f32 %v2652_v14, %v845_v17  ;;  %2047 = vmatmul.msk.f32.gmra.mxu2 %vm44_vm1, %v2021_v15  ;;  %v144_v19 = vpop.f32.mrf.mxu0  ;;  %v337_v20 = vpop.f32.mrf.mxu1  ;;  %2098 = vmatmul.msk.f32.gmra.mxu3 %vm44_vm1, %v2072_v16  ;;  %v1974_v15 = vld [vmem:[%s3438_s0 + $0x170] sm:$0xff] }
  0x92   :  { %v410_v23 = vmax.f32 %v144_v19, %v337_v20 }
  0x93   :  { %v898_v24 = vmax.f32 %v873_v18, 0.0 }
  0x94   :  { %v555_v25 = vpop.f32.mrf.mxu2  ;;  %1945 = vmatmul.msk.f32.gmra.mxu0 %vm44_vm1, %v36_v21  ;;  %1996 = vmatmul.msk.f32.gmra.mxu1 %vm44_vm1, %v1970_v22  ;;  %v773_v26 = vpop.f32.mrf.mxu3  ;;  %v2026_v22 = vld [vmem:[%s3438_s0 + $0x240] sm:$0xff] }
  0x95   :  { %v923_v27 = vpack.c.bf16 %v898_v24, %v898_v24  ;;  %v628_v28 = vmax.f32 %v410_v23, %v555_v25  ;;  %v2077_v23 = vld [vmem:[%s3438_s0 + $0x308] sm:$0xff] }
  0x97   :  { %949 = vst.msk [vmem:[%s3440_s3] sm:$0xf] %vm948_vm2, %v923_v27  ;;  %v846_v31 = vmax.f32 %v628_v28, %v773_v26  ;;  %v41_v28 = vld [vmem:[%s3438_s0 + $0xb0] sm:$0xff] }
  0x99   :  { %v874_v32 = vadd.f32 %v2652_v14, %v846_v31  ;;  %2048 = vmatmul.msk.f32.gmra.mxu2 %vm44_vm1, %v2022_v29  ;;  %v147_v33 = vpop.f32.mrf.mxu0  ;;  %v340_v34 = vpop.f32.mrf.mxu1  ;;  %2099 = vmatmul.msk.f32.gmra.mxu3 %vm44_vm1, %v2073_v30  ;;  %v1975_v29 = vld [vmem:[%s3438_s0 + $0x178] sm:$0xff] }
  0x9a   :  { %v411_v37 = vmax.f32 %v147_v33, %v340_v34 }
  0x9b   :  { %v899_v38 = vmax.f32 %v874_v32, 0.0 }
  0x9c   :  { %v558_v39 = vpop.f32.mrf.mxu2  ;;  %1946 = vmatmul.msk.f32.gmra.mxu0 %vm44_vm1, %v37_v35  ;;  %1997 = vmatmul.msk.f32.gmra.mxu1 %vm44_vm1, %v1971_v36  ;;  %v776_v40 = vpop.f32.mrf.mxu3  ;;  %v2027_v36 = vld [vmem:[%s3438_s0 + $0x248] sm:$0xff] }
  0x9d   :  { %v924_v41 = vpack.c.bf16 %v899_v38, %v899_v38  ;;  %v629_v42 = vmax.f32 %v411_v37, %v558_v39  ;;  %v2078_v37 = vld [vmem:[%s3438_s0 + $0x310] sm:$0xff] }
  0x9f   :  { %950 = vst.msk [vmem:[%s3440_s3 + $0x4] sm:$0xf] %vm948_vm2, %v924_v41  ;;  %v847_v45 = vmax.f32 %v629_v42, %v776_v40  ;;  %v42_v42 = vld [vmem:[%s3438_s0 + $0xb8] sm:$0xff] }
  0xa1   :  { %v875_v46 = vadd.f32 %v2652_v14, %v847_v45  ;;  %2049 = vmatmul.msk.f32.gmra.mxu2 %vm44_vm1, %v2023_v43  ;;  %v150_v47 = vpop.f32.mrf.mxu0  ;;  %v343_v48 = vpop.f32.mrf.mxu1  ;;  %2100 = vmatmul.msk.f32.gmra.mxu3 %vm44_vm1, %v2074_v44  ;;  %v1976_v43 = vld [vmem:[%s3438_s0 + $0x180] sm:$0xff] }
  0xa2   :  { %v412_v51 = vmax.f32 %v150_v47, %v343_v48 }
  0xa3   :  { %v900_v52 = vmax.f32 %v875_v46, 0.0 }
  0xa4   :  { %v561_v53 = vpop.f32.mrf.mxu2  ;;  %1947 = vmatmul.msk.f32.gmra.mxu0 %vm44_vm1, %v38_v49  ;;  %1998 = vmatmul.msk.f32.gmra.mxu1 %vm44_vm1, %v1972_v50  ;;  %v779_v54 = vpop.f32.mrf.mxu3  ;;  %v2028_v50 = vld [vmem:[%s3438_s0 + $0x250] sm:$0xf] }
  0xa5   :  { %v925_v55 = vpack.c.bf16 %v900_v52, %v900_v52  ;;  %v630_v56 = vmax.f32 %v412_v51, %v561_v53  ;;  %v2079_v51 = vld [vmem:[%s3438_s0 + $0x318] sm:$0xf] }
  0xa7   :  { %951 = vst.msk [vmem:[%s3440_s3 + $0x8] sm:$0xf] %vm948_vm2, %v925_v55  ;;  %v848_v59 = vmax.f32 %v630_v56, %v779_v54  ;;  %v43_v56 = vld [vmem:[%s3438_s0 + $0xc0] sm:$0xf] }
  0xa9   :  { %v876_v60 = vadd.f32 %v2652_v14, %v848_v59  ;;  %2050 = vmatmul.msk.f32.gmra.mxu2 %vm44_vm1, %v2024_v57  ;;  %v153_v61 = vpop.f32.mrf.mxu0  ;;  %v346_v62 = vpop.f32.mrf.mxu1  ;;  %2101 = vmatmul.msk.f32.gmra.mxu3 %vm44_vm1, %v2075_v58  ;;  %v1977_v57 = vld [vmem:[%s3438_s0 + $0x188] sm:$0xf] }
  0xaa   :  { %v413_v1 = vmax.f32 %v153_v61, %v346_v62 }
  0xab   :  { %v901_v2 = vmax.f32 %v876_v60, 0.0 }
  0xac   :  { %v564_v3 = vpop.f32.mrf.mxu2  ;;  %1948 = vmatmul.msk.f32.gmra.mxu0 %vm44_vm1, %v39_v63  ;;  %1999 = vmatmul.msk.f32.gmra.mxu1 %vm44_vm1, %v1973_v0  ;;  %v782_v4 = vpop.f32.mrf.mxu3  ;;  %v2208_v0 = vld [vmem:[%s3438_s0 + $0x4b0] sm:$0xff] }
  0xad   :  { %v926_v5 = vpack.c.bf16 %v901_v2, %v901_v2  ;;  %v631_v6 = vmax.f32 %v413_v1, %v564_v3  ;;  %v2259_v1 = vld [vmem:[%s3438_s0 + $0x578] sm:$0xff] }
  0xaf   :  { %952 = vst.msk [vmem:[%s3440_s3 + $0xc] sm:$0xf] %vm948_vm2, %v926_v5  ;;  %v849_v9 = vmax.f32 %v631_v6, %v782_v4  ;;  %v2106_v6 = vld [vmem:[%s3438_s0 + $0x320] sm:$0xff] }
  0xb1   :  { %v877_v10 = vadd.f32 %v2652_v14, %v849_v9  ;;  %2051 = vmatmul.msk.f32.gmra.mxu2 %vm44_vm1, %v2025_v7  ;;  %v156_v11 = vpop.f32.mrf.mxu0  ;;  %v349_v12 = vpop.f32.mrf.mxu1  ;;  %2102 = vmatmul.msk.f32.gmra.mxu3 %vm44_vm1, %v2076_v8  ;;  %v2157_v7 = vld [vmem:[%s3438_s0 + $0x3e8] sm:$0xff] }
  0xb2   :  { %v414_v16 = vmax.f32 %v156_v11, %v349_v12 }
  0xb3   :  { %v902_v17 = vmax.f32 %v877_v10, 0.0 }
  0xb4   :  { %v567_v18 = vpop.f32.mrf.mxu2  ;;  %1949 = vmatmul.msk.f32.gmra.mxu0 %vm44_vm1, %v40_v13  ;;  %2000 = vmatmul.msk.f32.gmra.mxu1 %vm44_vm1, %v1974_v15  ;;  %v785_v19 = vpop.f32.mrf.mxu3  ;;  %v2209_v15 = vld [vmem:[%s3438_s0 + $0x4b8] sm:$0xff] }
  0xb5   :  { %v927_v20 = vpack.c.bf16 %v902_v17, %v902_v17  ;;  %v632_v21 = vmax.f32 %v414_v16, %v567_v18  ;;  %v2260_v16 = vld [vmem:[%s3438_s0 + $0x580] sm:$0xff] }
  0xb7   :  { %953 = vst.msk [vmem:[%s3440_s3 + $0x10] sm:$0xf] %vm948_vm2, %v927_v20  ;;  %v850_v24 = vmax.f32 %v632_v21, %v785_v19  ;;  %v2107_v21 = vld [vmem:[%s3438_s0 + $0x328] sm:$0xff] }
  0xb9   :  { %v878_v25 = vadd.f32 %v2652_v14, %v850_v24  ;;  %2052 = vmatmul.msk.f32.gmra.mxu2 %vm44_vm1, %v2026_v22  ;;  %v159_v26 = vpop.f32.mrf.mxu0  ;;  %v352_v27 = vpop.f32.mrf.mxu1  ;;  %2103 = vmatmul.msk.f32.gmra.mxu3 %vm44_vm1, %v2077_v23  ;;  %v2158_v22 = vld [vmem:[%s3438_s0 + $0x3f0] sm:$0xff] }
  0xba   :  { %v415_v30 = vmax.f32 %v159_v26, %v352_v27 }
  0xbb   :  { %v903_v31 = vmax.f32 %v878_v25, 0.0 }
  0xbc   :  { %v570_v32 = vpop.f32.mrf.mxu2  ;;  %1950 = vmatmul.msk.f32.gmra.mxu0 %vm44_vm1, %v41_v28  ;;  %2001 = vmatmul.msk.f32.gmra.mxu1 %vm44_vm1, %v1975_v29  ;;  %v788_v33 = vpop.f32.mrf.mxu3  ;;  %v2210_v29 = vld [vmem:[%s3438_s0 + $0x4c0] sm:$0xff] }
  0xbd   :  { %v928_v34 = vpack.c.bf16 %v903_v31, %v903_v31  ;;  %v633_v35 = vmax.f32 %v415_v30, %v570_v32  ;;  %v2261_v30 = vld [vmem:[%s3438_s0 + $0x588] sm:$0xff] }
  0xbf   :  { %954 = vst.msk [vmem:[%s3440_s3 + $0x14] sm:$0xf] %vm948_vm2, %v928_v34  ;;  %v851_v38 = vmax.f32 %v633_v35, %v788_v33  ;;  %v2108_v35 = vld [vmem:[%s3438_s0 + $0x330] sm:$0xff] }
  0xc1   :  { %v879_v39 = vadd.f32 %v2652_v14, %v851_v38  ;;  %2053 = vmatmul.msk.f32.gmra.mxu2 %vm44_vm1, %v2027_v36  ;;  %v162_v40 = vpop.f32.mrf.mxu0  ;;  %v355_v41 = vpop.f32.mrf.mxu1  ;;  %2104 = vmatmul.msk.f32.gmra.mxu3 %vm44_vm1, %v2078_v37  ;;  %v2159_v36 = vld [vmem:[%s3438_s0 + $0x3f8] sm:$0xff] }
  0xc2   :  { %v416_v44 = vmax.f32 %v162_v40, %v355_v41 }
  0xc3   :  { %v904_v45 = vmax.f32 %v879_v39, 0.0 }
  0xc4   :  { %v573_v46 = vpop.f32.mrf.mxu2  ;;  %1951 = vmatmul.msk.f32.gmra.mxu0 %vm44_vm1, %v42_v42  ;;  %2002 = vmatmul.msk.f32.gmra.mxu1 %vm44_vm1, %v1976_v43  ;;  %v791_v47 = vpop.f32.mrf.mxu3  ;;  %v2211_v43 = vld [vmem:[%s3438_s0 + $0x4c8] sm:$0xff] }
  0xc5   :  { %v929_v48 = vpack.c.bf16 %v904_v45, %v904_v45  ;;  %v634_v49 = vmax.f32 %v416_v44, %v573_v46  ;;  %v2262_v44 = vld [vmem:[%s3438_s0 + $0x590] sm:$0xff] }
  0xc7   :  { %955 = vst.msk [vmem:[%s3440_s3 + $0x18] sm:$0xf] %vm948_vm2, %v929_v48  ;;  %v852_v52 = vmax.f32 %v634_v49, %v791_v47  ;;  %v2109_v49 = vld [vmem:[%s3438_s0 + $0x338] sm:$0xff] }
  0xc9   :  { %v880_v53 = vadd.f32 %v2652_v14, %v852_v52  ;;  %2054 = vmatmul.msk.f32.gmra.mxu2 %vm44_vm1, %v2028_v50  ;;  %v165_v54 = vpop.f32.mrf.mxu0  ;;  %v358_v55 = vpop.f32.mrf.mxu1  ;;  %2105 = vmatmul.msk.f32.gmra.mxu3 %vm44_vm1, %v2079_v51  ;;  %v2160_v50 = vld [vmem:[%s3438_s0 + $0x400] sm:$0xff] }
  0xca   :  { %v417_v58 = vmax.f32 %v165_v54, %v358_v55 }
  0xcb   :  { %v905_v59 = vmax.f32 %v880_v53, 0.0 }
  0xcc   :  { %v576_v60 = vpop.f32.mrf.mxu2  ;;  %1952 = vmatmul.msk.f32.gmra.mxu0 %vm44_vm1, %v43_v56  ;;  %2003 = vmatmul.msk.f32.gmra.mxu1 %vm44_vm1, %v1977_v57  ;;  %v794_v61 = vpop.f32.mrf.mxu3  ;;  %v2212_v57 = vld [vmem:[%s3438_s0 + $0x4d0] sm:$0xff] }
  0xcd   :  { %v930_v62 = vpack.c.bf16 %v905_v59, %v905_v59  ;;  %v635_v63 = vmax.f32 %v417_v58, %v576_v60  ;;  %v2263_v58 = vld [vmem:[%s3438_s0 + $0x598] sm:$0xff] }
  0xcf   :  { %956 = vst.msk [vmem:[%s3440_s3 + $0x1c] sm:$0xf] %vm948_vm2, %v930_v62  ;;  %v853_v2 = vmax.f32 %v635_v63, %v794_v61  ;;  %v2110_v63 = vld [vmem:[%s3438_s0 + $0x340] sm:$0xff] }
  0xd1   :  { %v881_v3 = vadd.f32 %v2652_v14, %v853_v2  ;;  %2234 = vmatmul.msk.f32.vlgmr.msrb.gmra.mxu2 %vm44_vm1, %v2208_v0  ;;  %v168_v4 = vpop.f32.mrf.mxu0  ;;  %v361_v5 = vpop.f32.mrf.mxu1  ;;  %2285 = vmatmul.msk.f32.vlgmr.msrb.gmra.mxu3 %vm44_vm1, %v2259_v1  ;;  %v2161_v0 = vld [vmem:[%s3438_s0 + $0x408] sm:$0xff] }
  0xd2   :  { %v418_v8 = vmax.f32 %v168_v4, %v361_v5 }
  0xd3   :  { %v906_v9 = vmax.f32 %v881_v3, 0.0 }
  0xd4   :  { %v579_v10 = vpop.f32.mrf.mxu2  ;;  %2132 = vmatmul.msk.f32.vlgmr.msrb.gmra.mxu0 %vm44_vm1, %v2106_v6  ;;  %2183 = vmatmul.msk.f32.vlgmr.msrb.gmra.mxu1 %vm44_vm1, %v2157_v7  ;;  %v797_v11 = vpop.f32.mrf.mxu3  ;;  %v2213_v7 = vld [vmem:[%s3438_s0 + $0x4d8] sm:$0xff] }
  0xd5   :  { %v931_v12 = vpack.c.bf16 %v906_v9, %v906_v9  ;;  %v636_v13 = vmax.f32 %v418_v8, %v579_v10  ;;  %v2264_v8 = vld [vmem:[%s3438_s0 + $0x5a0] sm:$0xff] }
  0xd7   :  { %957 = vst.msk [vmem:[%s3440_s3 + $0x20] sm:$0xf] %vm948_vm2, %v931_v12  ;;  %v854_v17 = vmax.f32 %v636_v13, %v797_v11  ;;  %v2111_v13 = vld [vmem:[%s3438_s0 + $0x348] sm:$0xff] }
  0xd9   :  { %v882_v18 = vadd.f32 %v2652_v14, %v854_v17  ;;  %2235 = vmatmul.msk.f32.gmra.mxu2 %vm44_vm1, %v2209_v15  ;;  %v171_v19 = vpop.f32.mrf.mxu0  ;;  %v364_v20 = vpop.f32.mrf.mxu1  ;;  %2286 = vmatmul.msk.f32.gmra.mxu3 %vm44_vm1, %v2260_v16  ;;  %v2162_v15 = vld [vmem:[%s3438_s0 + $0x410] sm:$0xff] }
  0xda   :  { %v419_v23 = vmax.f32 %v171_v19, %v364_v20 }
  0xdb   :  { %v907_v24 = vmax.f32 %v882_v18, 0.0 }
  0xdc   :  { %v582_v25 = vpop.f32.mrf.mxu2  ;;  %2133 = vmatmul.msk.f32.gmra.mxu0 %vm44_vm1, %v2107_v21  ;;  %2184 = vmatmul.msk.f32.gmra.mxu1 %vm44_vm1, %v2158_v22  ;;  %v800_v26 = vpop.f32.mrf.mxu3  ;;  %v2214_v22 = vld [vmem:[%s3438_s0 + $0x4e0] sm:$0xff] }
  0xdd   :  { %v932_v27 = vpack.c.bf16 %v907_v24, %v907_v24  ;;  %v637_v28 = vmax.f32 %v419_v23, %v582_v25  ;;  %v2265_v23 = vld [vmem:[%s3438_s0 + $0x5a8] sm:$0xff] }
  0xdf   :  { %958 = vst.msk [vmem:[%s3440_s3 + $0x24] sm:$0xf] %vm948_vm2, %v932_v27  ;;  %v855_v31 = vmax.f32 %v637_v28, %v800_v26  ;;  %v2112_v28 = vld [vmem:[%s3438_s0 + $0x350] sm:$0xff] }
  0xe1   :  { %v883_v32 = vadd.f32 %v2652_v14, %v855_v31  ;;  %2236 = vmatmul.msk.f32.gmra.mxu2 %vm44_vm1, %v2210_v29  ;;  %v174_v33 = vpop.f32.mrf.mxu0  ;;  %v367_v34 = vpop.f32.mrf.mxu1  ;;  %2287 = vmatmul.msk.f32.gmra.mxu3 %vm44_vm1, %v2261_v30  ;;  %v2163_v29 = vld [vmem:[%s3438_s0 + $0x418] sm:$0xff] }
  0xe2   :  { %v420_v37 = vmax.f32 %v174_v33, %v367_v34 }
  0xe3   :  { %v908_v38 = vmax.f32 %v883_v32, 0.0 }
  0xe4   :  { %v585_v39 = vpop.f32.mrf.mxu2  ;;  %2134 = vmatmul.msk.f32.gmra.mxu0 %vm44_vm1, %v2108_v35  ;;  %2185 = vmatmul.msk.f32.gmra.mxu1 %vm44_vm1, %v2159_v36  ;;  %v803_v40 = vpop.f32.mrf.mxu3  ;;  %v2215_v36 = vld [vmem:[%s3438_s0 + $0x4e8] sm:$0xff] }
  0xe5   :  { %v933_v41 = vpack.c.bf16 %v908_v38, %v908_v38  ;;  %v638_v42 = vmax.f32 %v420_v37, %v585_v39  ;;  %v2266_v37 = vld [vmem:[%s3438_s0 + $0x5b0] sm:$0xff] }
  0xe7   :  { %959 = vst.msk [vmem:[%s3440_s3 + $0x28] sm:$0xf] %vm948_vm2, %v933_v41  ;;  %v856_v45 = vmax.f32 %v638_v42, %v803_v40  ;;  %v2113_v42 = vld [vmem:[%s3438_s0 + $0x358] sm:$0xff] }
  0xe9   :  { %v884_v46 = vadd.f32 %v2652_v14, %v856_v45  ;;  %2237 = vmatmul.msk.f32.gmra.mxu2 %vm44_vm1, %v2211_v43  ;;  %v177_v47 = vpop.f32.mrf.mxu0  ;;  %v370_v48 = vpop.f32.mrf.mxu1  ;;  %2288 = vmatmul.msk.f32.gmra.mxu3 %vm44_vm1, %v2262_v44  ;;  %v2164_v43 = vld [vmem:[%s3438_s0 + $0x420] sm:$0xff] }
  0xea   :  { %v421_v51 = vmax.f32 %v177_v47, %v370_v48 }
  0xeb   :  { %v909_v52 = vmax.f32 %v884_v46, 0.0 }
  0xec   :  { %v588_v53 = vpop.f32.mrf.mxu2  ;;  %2135 = vmatmul.msk.f32.gmra.mxu0 %vm44_vm1, %v2109_v49  ;;  %2186 = vmatmul.msk.f32.gmra.mxu1 %vm44_vm1, %v2160_v50  ;;  %v806_v54 = vpop.f32.mrf.mxu3  ;;  %v2216_v50 = vld [vmem:[%s3438_s0 + $0x4f0] sm:$0xff] }
  0xed   :  { %v934_v55 = vpack.c.bf16 %v909_v52, %v909_v52  ;;  %v639_v56 = vmax.f32 %v421_v51, %v588_v53  ;;  %v2267_v51 = vld [vmem:[%s3438_s0 + $0x5b8] sm:$0xff] }
  0xef   :  { %960 = vst.msk [vmem:[%s3440_s3 + $0x2c] sm:$0xf] %vm948_vm2, %v934_v55  ;;  %v857_v59 = vmax.f32 %v639_v56, %v806_v54  ;;  %v2114_v56 = vld [vmem:[%s3438_s0 + $0x360] sm:$0xff] }
  0xf1   :  { %v885_v60 = vadd.f32 %v2652_v14, %v857_v59  ;;  %2238 = vmatmul.msk.f32.gmra.mxu2 %vm44_vm1, %v2212_v57  ;;  %v180_v61 = vpop.f32.mrf.mxu0  ;;  %v373_v62 = vpop.f32.mrf.mxu1  ;;  %2289 = vmatmul.msk.f32.gmra.mxu3 %vm44_vm1, %v2263_v58  ;;  %v2165_v57 = vld [vmem:[%s3438_s0 + $0x428] sm:$0xff] }
  0xf2   :  { %v422_v1 = vmax.f32 %v180_v61, %v373_v62 }
  0xf3   :  { %v910_v2 = vmax.f32 %v885_v60, 0.0 }
  0xf4   :  { %v591_v3 = vpop.f32.mrf.mxu2  ;;  %2136 = vmatmul.msk.f32.gmra.mxu0 %vm44_vm1, %v2110_v63  ;;  %2187 = vmatmul.msk.f32.gmra.mxu1 %vm44_vm1, %v2161_v0  ;;  %v809_v4 = vpop.f32.mrf.mxu3  ;;  %v2217_v0 = vld [vmem:[%s3438_s0 + $0x4f8] sm:$0xff] }
  0xf5   :  { %v935_v5 = vpack.c.bf16 %v910_v2, %v910_v2  ;;  %v640_v6 = vmax.f32 %v422_v1, %v591_v3  ;;  %v2268_v1 = vld [vmem:[%s3438_s0 + $0x5c0] sm:$0xff] }
  0xf7   :  { %961 = vst.msk [vmem:[%s3440_s3 + $0x30] sm:$0xf] %vm948_vm2, %v935_v5  ;;  %v858_v9 = vmax.f32 %v640_v6, %v809_v4  ;;  %v2115_v6 = vld [vmem:[%s3438_s0 + $0x368] sm:$0xff] }
  0xf9   :  { %v886_v10 = vadd.f32 %v2652_v14, %v858_v9  ;;  %2239 = vmatmul.msk.f32.gmra.mxu2 %vm44_vm1, %v2213_v7  ;;  %v183_v11 = vpop.f32.mrf.mxu0  ;;  %v376_v12 = vpop.f32.mrf.mxu1  ;;  %2290 = vmatmul.msk.f32.gmra.mxu3 %vm44_vm1, %v2264_v8  ;;  %v2166_v7 = vld [vmem:[%s3438_s0 + $0x430] sm:$0xff] }
  0xfa   :  { %v423_v16 = vmax.f32 %v183_v11, %v376_v12 }
  0xfb   :  { %v911_v17 = vmax.f32 %v886_v10, 0.0 }
  0xfc   :  { %v594_v18 = vpop.f32.mrf.mxu2  ;;  %2137 = vmatmul.msk.f32.gmra.mxu0 %vm44_vm1, %v2111_v13  ;;  %2188 = vmatmul.msk.f32.gmra.mxu1 %vm44_vm1, %v2162_v15  ;;  %v812_v19 = vpop.f32.mrf.mxu3  ;;  %v2218_v15 = vld [vmem:[%s3438_s0 + $0x500] sm:$0xff] }
  0xfd   :  { %v936_v20 = vpack.c.bf16 %v911_v17, %v911_v17  ;;  %v641_v21 = vmax.f32 %v423_v16, %v594_v18  ;;  %v2269_v16 = vld [vmem:[%s3438_s0 + $0x5c8] sm:$0xff] }
  0xff   :  { %962 = vst.msk [vmem:[%s3440_s3 + $0x34] sm:$0xf] %vm948_vm2, %v936_v20  ;;  %v859_v24 = vmax.f32 %v641_v21, %v812_v19  ;;  %v2116_v21 = vld [vmem:[%s3438_s0 + $0x370] sm:$0xff] }
 0x101   :  { %v887_v25 = vadd.f32 %v2652_v14, %v859_v24  ;;  %2240 = vmatmul.msk.f32.gmra.mxu2 %vm44_vm1, %v2214_v22  ;;  %v186_v26 = vpop.f32.mrf.mxu0  ;;  %v379_v27 = vpop.f32.mrf.mxu1  ;;  %2291 = vmatmul.msk.f32.gmra.mxu3 %vm44_vm1, %v2265_v23  ;;  %v2167_v22 = vld [vmem:[%s3438_s0 + $0x438] sm:$0xff] }
 0x102   :  { %v424_v30 = vmax.f32 %v186_v26, %v379_v27 }
 0x103   :  { %v912_v31 = vmax.f32 %v887_v25, 0.0 }
 0x104   :  { %v597_v32 = vpop.f32.mrf.mxu2  ;;  %2138 = vmatmul.msk.f32.gmra.mxu0 %vm44_vm1, %v2112_v28  ;;  %2189 = vmatmul.msk.f32.gmra.mxu1 %vm44_vm1, %v2163_v29  ;;  %v815_v33 = vpop.f32.mrf.mxu3  ;;  %v2219_v29 = vld [vmem:[%s3438_s0 + $0x508] sm:$0xff] }
 0x105   :  { %v937_v34 = vpack.c.bf16 %v912_v31, %v912_v31  ;;  %v642_v35 = vmax.f32 %v424_v30, %v597_v32  ;;  %v2270_v30 = vld [vmem:[%s3438_s0 + $0x5d0] sm:$0xff] }
 0x107   :  { %963 = vst.msk [vmem:[%s3440_s3 + $0x38] sm:$0xf] %vm948_vm2, %v937_v34  ;;  %v860_v38 = vmax.f32 %v642_v35, %v815_v33  ;;  %v2117_v35 = vld [vmem:[%s3438_s0 + $0x378] sm:$0xff] }
 0x109   :  { %v888_v39 = vadd.f32 %v2652_v14, %v860_v38  ;;  %2241 = vmatmul.msk.f32.gmra.mxu2 %vm44_vm1, %v2215_v36  ;;  %v189_v40 = vpop.f32.mrf.mxu0  ;;  %v382_v41 = vpop.f32.mrf.mxu1  ;;  %2292 = vmatmul.msk.f32.gmra.mxu3 %vm44_vm1, %v2266_v37  ;;  %v2168_v36 = vld [vmem:[%s3438_s0 + $0x440] sm:$0xff] }
 0x10a   :  { %v425_v44 = vmax.f32 %v189_v40, %v382_v41 }
 0x10b   :  { %v913_v45 = vmax.f32 %v888_v39, 0.0 }
 0x10c   :  { %v600_v46 = vpop.f32.mrf.mxu2  ;;  %2139 = vmatmul.msk.f32.gmra.mxu0 %vm44_vm1, %v2113_v42  ;;  %2190 = vmatmul.msk.f32.gmra.mxu1 %vm44_vm1, %v2164_v43  ;;  %v818_v47 = vpop.f32.mrf.mxu3  ;;  %v2220_v43 = vld [vmem:[%s3438_s0 + $0x510] sm:$0xff] }
 0x10d   :  { %v938_v48 = vpack.c.bf16 %v913_v45, %v913_v45  ;;  %v643_v49 = vmax.f32 %v425_v44, %v600_v46  ;;  %v2271_v44 = vld [vmem:[%s3438_s0 + $0x5d8] sm:$0xff] }
 0x10f   :  { %964 = vst.msk [vmem:[%s3440_s3 + $0x3c] sm:$0xf] %vm948_vm2, %v938_v48  ;;  %v861_v52 = vmax.f32 %v643_v49, %v818_v47  ;;  %v2118_v49 = vld [vmem:[%s3438_s0 + $0x380] sm:$0xff] }
 0x111   :  { %v889_v53 = vadd.f32 %v2652_v14, %v861_v52  ;;  %2242 = vmatmul.msk.f32.gmra.mxu2 %vm44_vm1, %v2216_v50  ;;  %v192_v54 = vpop.f32.mrf.mxu0  ;;  %v385_v55 = vpop.f32.mrf.mxu1  ;;  %2293 = vmatmul.msk.f32.gmra.mxu3 %vm44_vm1, %v2267_v51  ;;  %v2169_v50 = vld [vmem:[%s3438_s0 + $0x448] sm:$0xff] }
 0x112   :  { %v426_v58 = vmax.f32 %v192_v54, %v385_v55 }
 0x113   :  { %v914_v59 = vmax.f32 %v889_v53, 0.0 }
 0x114   :  { %v603_v60 = vpop.f32.mrf.mxu2  ;;  %2140 = vmatmul.msk.f32.gmra.mxu0 %vm44_vm1, %v2114_v56  ;;  %2191 = vmatmul.msk.f32.gmra.mxu1 %vm44_vm1, %v2165_v57  ;;  %v821_v61 = vpop.f32.mrf.mxu3  ;;  %v2221_v57 = vld [vmem:[%s3438_s0 + $0x518] sm:$0xff] }
 0x115   :  { %v939_v62 = vpack.c.bf16 %v914_v59, %v914_v59  ;;  %v644_v63 = vmax.f32 %v426_v58, %v603_v60  ;;  %v2272_v58 = vld [vmem:[%s3438_s0 + $0x5e0] sm:$0xff] }
 0x117   :  { %965 = vst.msk [vmem:[%s3440_s3 + $0x40] sm:$0xf] %vm948_vm2, %v939_v62  ;;  %v862_v2 = vmax.f32 %v644_v63, %v821_v61  ;;  %v2119_v63 = vld [vmem:[%s3438_s0 + $0x388] sm:$0xff] }
 0x119   :  { %v890_v3 = vadd.f32 %v2652_v14, %v862_v2  ;;  %2243 = vmatmul.msk.f32.gmra.mxu2 %vm44_vm1, %v2217_v0  ;;  %v195_v4 = vpop.f32.mrf.mxu0  ;;  %v388_v5 = vpop.f32.mrf.mxu1  ;;  %2294 = vmatmul.msk.f32.gmra.mxu3 %vm44_vm1, %v2268_v1  ;;  %v2170_v0 = vld [vmem:[%s3438_s0 + $0x450] sm:$0xff] }
 0x11a   :  { %v427_v8 = vmax.f32 %v195_v4, %v388_v5 }
 0x11b   :  { %v915_v9 = vmax.f32 %v890_v3, 0.0 }
 0x11c   :  { %v606_v10 = vpop.f32.mrf.mxu2  ;;  %2141 = vmatmul.msk.f32.gmra.mxu0 %vm44_vm1, %v2115_v6  ;;  %2192 = vmatmul.msk.f32.gmra.mxu1 %vm44_vm1, %v2166_v7  ;;  %v824_v11 = vpop.f32.mrf.mxu3  ;;  %v2222_v7 = vld [vmem:[%s3438_s0 + $0x520] sm:$0xff] }
 0x11d   :  { %v940_v12 = vpack.c.bf16 %v915_v9, %v915_v9  ;;  %v645_v13 = vmax.f32 %v427_v8, %v606_v10  ;;  %v2273_v8 = vld [vmem:[%s3438_s0 + $0x5e8] sm:$0xff] }
 0x11f   :  { %966 = vst.msk [vmem:[%s3440_s3 + $0x44] sm:$0xf] %vm948_vm2, %v940_v12  ;;  %v863_v17 = vmax.f32 %v645_v13, %v824_v11  ;;  %v2120_v13 = vld [vmem:[%s3438_s0 + $0x390] sm:$0xff] }
 0x121   :  { %v891_v18 = vadd.f32 %v2652_v14, %v863_v17  ;;  %2244 = vmatmul.msk.f32.gmra.mxu2 %vm44_vm1, %v2218_v15  ;;  %v198_v19 = vpop.f32.mrf.mxu0  ;;  %v391_v20 = vpop.f32.mrf.mxu1  ;;  %2295 = vmatmul.msk.f32.gmra.mxu3 %vm44_vm1, %v2269_v16  ;;  %v2171_v15 = vld [vmem:[%s3438_s0 + $0x458] sm:$0xff] }
 0x122   :  { %v428_v23 = vmax.f32 %v198_v19, %v391_v20 }
 0x123   :  { %v916_v24 = vmax.f32 %v891_v18, 0.0 }
 0x124   :  { %v609_v25 = vpop.f32.mrf.mxu2  ;;  %2142 = vmatmul.msk.f32.gmra.mxu0 %vm44_vm1, %v2116_v21  ;;  %2193 = vmatmul.msk.f32.gmra.mxu1 %vm44_vm1, %v2167_v22  ;;  %v827_v26 = vpop.f32.mrf.mxu3  ;;  %v2223_v22 = vld [vmem:[%s3438_s0 + $0x528] sm:$0xff] }
 0x125   :  { %v941_v27 = vpack.c.bf16 %v916_v24, %v916_v24  ;;  %v646_v28 = vmax.f32 %v428_v23, %v609_v25  ;;  %v2274_v23 = vld [vmem:[%s3438_s0 + $0x5f0] sm:$0xff] }
 0x127   :  { %967 = vst.msk [vmem:[%s3440_s3 + $0x48] sm:$0xf] %vm948_vm2, %v941_v27  ;;  %v864_v31 = vmax.f32 %v646_v28, %v827_v26  ;;  %v2121_v28 = vld [vmem:[%s3438_s0 + $0x398] sm:$0xff] }
 0x129   :  { %v892_v32 = vadd.f32 %v2652_v14, %v864_v31  ;;  %2245 = vmatmul.msk.f32.gmra.mxu2 %vm44_vm1, %v2219_v29  ;;  %v201_v33 = vpop.f32.mrf.mxu0  ;;  %v394_v34 = vpop.f32.mrf.mxu1  ;;  %2296 = vmatmul.msk.f32.gmra.mxu3 %vm44_vm1, %v2270_v30  ;;  %v2172_v29 = vld [vmem:[%s3438_s0 + $0x460] sm:$0xff] }
 0x12a   :  { %v429_v37 = vmax.f32 %v201_v33, %v394_v34 }
 0x12b   :  { %v917_v38 = vmax.f32 %v892_v32, 0.0 }
 0x12c   :  { %v612_v39 = vpop.f32.mrf.mxu2  ;;  %2143 = vmatmul.msk.f32.gmra.mxu0 %vm44_vm1, %v2117_v35  ;;  %2194 = vmatmul.msk.f32.gmra.mxu1 %vm44_vm1, %v2168_v36  ;;  %v830_v40 = vpop.f32.mrf.mxu3  ;;  %v2224_v36 = vld [vmem:[%s3438_s0 + $0x530] sm:$0xff] }
 0x12d   :  { %v942_v41 = vpack.c.bf16 %v917_v38, %v917_v38  ;;  %v647_v42 = vmax.f32 %v429_v37, %v612_v39  ;;  %v2275_v37 = vld [vmem:[%s3438_s0 + $0x5f8] sm:$0xff] }
 0x12f   :  { %968 = vst.msk [vmem:[%s3440_s3 + $0x4c] sm:$0xf] %vm948_vm2, %v942_v41  ;;  %v865_v45 = vmax.f32 %v647_v42, %v830_v40  ;;  %v2122_v42 = vld [vmem:[%s3438_s0 + $0x3a0] sm:$0xff] }
 0x131   :  { %v893_v46 = vadd.f32 %v2652_v14, %v865_v45  ;;  %2246 = vmatmul.msk.f32.gmra.mxu2 %vm44_vm1, %v2220_v43  ;;  %v204_v47 = vpop.f32.mrf.mxu0  ;;  %v397_v48 = vpop.f32.mrf.mxu1  ;;  %2297 = vmatmul.msk.f32.gmra.mxu3 %vm44_vm1, %v2271_v44  ;;  %v2173_v43 = vld [vmem:[%s3438_s0 + $0x468] sm:$0xff] }
 0x132   :  { %v430_v51 = vmax.f32 %v204_v47, %v397_v48 }
 0x133   :  { %v918_v52 = vmax.f32 %v893_v46, 0.0 }
 0x134   :  { %v615_v53 = vpop.f32.mrf.mxu2  ;;  %2144 = vmatmul.msk.f32.gmra.mxu0 %vm44_vm1, %v2118_v49  ;;  %2195 = vmatmul.msk.f32.gmra.mxu1 %vm44_vm1, %v2169_v50  ;;  %v833_v54 = vpop.f32.mrf.mxu3  ;;  %v2225_v50 = vld [vmem:[%s3438_s0 + $0x538] sm:$0xff] }
 0x135   :  { %v943_v55 = vpack.c.bf16 %v918_v52, %v918_v52  ;;  %v648_v56 = vmax.f32 %v430_v51, %v615_v53  ;;  %v2276_v51 = vld [vmem:[%s3438_s0 + $0x600] sm:$0xff] }
 0x137   :  { %969 = vst.msk [vmem:[%s3440_s3 + $0x50] sm:$0xf] %vm948_vm2, %v943_v55  ;;  %v866_v59 = vmax.f32 %v648_v56, %v833_v54  ;;  %v2123_v56 = vld [vmem:[%s3438_s0 + $0x3a8] sm:$0xff] }
 0x139   :  { %v894_v60 = vadd.f32 %v2652_v14, %v866_v59  ;;  %2247 = vmatmul.msk.f32.gmra.mxu2 %vm44_vm1, %v2221_v57  ;;  %v207_v61 = vpop.f32.mrf.mxu0  ;;  %v400_v62 = vpop.f32.mrf.mxu1  ;;  %2298 = vmatmul.msk.f32.gmra.mxu3 %vm44_vm1, %v2272_v58  ;;  %v2174_v57 = vld [vmem:[%s3438_s0 + $0x470] sm:$0xff] }
 0x13a   :  { %v431_v1 = vmax.f32 %v207_v61, %v400_v62 }
 0x13b   :  { %v919_v2 = vmax.f32 %v894_v60, 0.0 }
 0x13c   :  { %v618_v3 = vpop.f32.mrf.mxu2  ;;  %2145 = vmatmul.msk.f32.gmra.mxu0 %vm44_vm1, %v2119_v63  ;;  %2196 = vmatmul.msk.f32.gmra.mxu1 %vm44_vm1, %v2170_v0  ;;  %v836_v4 = vpop.f32.mrf.mxu3  ;;  %v2226_v0 = vld [vmem:[%s3438_s0 + $0x540] sm:$0xff] }
 0x13d   :  { %v944_v5 = vpack.c.bf16 %v919_v2, %v919_v2  ;;  %v649_v6 = vmax.f32 %v431_v1, %v618_v3  ;;  %v2277_v1 = vld [vmem:[%s3438_s0 + $0x608] sm:$0xff] }
 0x13f   :  { %970 = vst.msk [vmem:[%s3440_s3 + $0x54] sm:$0xf] %vm948_vm2, %v944_v5  ;;  %v867_v9 = vmax.f32 %v649_v6, %v836_v4  ;;  %v2124_v6 = vld [vmem:[%s3438_s0 + $0x3b0] sm:$0xff] }
 0x141   :  { %v895_v10 = vadd.f32 %v2652_v14, %v867_v9  ;;  %2248 = vmatmul.msk.f32.gmra.mxu2 %vm44_vm1, %v2222_v7  ;;  %v210_v11 = vpop.f32.mrf.mxu0  ;;  %v403_v12 = vpop.f32.mrf.mxu1  ;;  %2299 = vmatmul.msk.f32.gmra.mxu3 %vm44_vm1, %v2273_v8  ;;  %v2175_v7 = vld [vmem:[%s3438_s0 + $0x478] sm:$0xff] }
 0x142   :  { %v432_v16 = vmax.f32 %v210_v11, %v403_v12 }
 0x143   :  { %v920_v17 = vmax.f32 %v895_v10, 0.0 }
 0x144   :  { %v621_v18 = vpop.f32.mrf.mxu2  ;;  %2146 = vmatmul.msk.f32.gmra.mxu0 %vm44_vm1, %v2120_v13  ;;  %2197 = vmatmul.msk.f32.gmra.mxu1 %vm44_vm1, %v2171_v15  ;;  %v839_v19 = vpop.f32.mrf.mxu3  ;;  %v2227_v13 = vld [vmem:[%s3438_s0 + $0x548] sm:$0xff]  ;;  %v2278_v15 = vld [vmem:[%s3438_s0 + $0x610] sm:$0xff] }
 0x145   :  { %v945_v20 = vpack.c.bf16 %v920_v17, %v920_v17  ;;  %v650_v21 = vmax.f32 %v432_v16, %v621_v18  ;;  %v3230_v17 = vld [vmem:[%s3439_s2] ss:$0 sm:$0xff] }
 0x147   :  { %971 = vst.msk [vmem:[%s3440_s3 + $0x58] sm:$0xf] %vm948_vm2, %v945_v20  ;;  %v868_v24 = vmax.f32 %v650_v21, %v839_v19  ;;  %v2125_v21 = vld [vmem:[%s3438_s0 + $0x3b8] sm:$0xff] }
 0x149   :  { %v896_v25 = vadd.f32 %v2652_v14, %v868_v24  ;;  %2249 = vmatmul.msk.f32.gmra.mxu2 %vm44_vm1, %v2223_v22  ;;  %v213_v26 = vpop.f32.mrf.mxu0  ;;  %v406_v27 = vpop.f32.mrf.mxu1  ;;  %2300 = vmatmul.msk.f32.gmra.mxu3 %vm44_vm1, %v2274_v23  ;;  %v2176_v22 = vld [vmem:[%s3438_s0 + $0x480] sm:$0xff] }
 0x14a   :  { %v433_v30 = vmax.f32 %v213_v26, %v406_v27 }
 0x14b   :  { %v921_v31 = vmax.f32 %v896_v25, 0.0 }
 0x14c   :  { %v624_v32 = vpop.f32.mrf.mxu2  ;;  %2147 = vmatmul.msk.f32.gmra.mxu0 %vm44_vm1, %v2121_v28  ;;  %2198 = vmatmul.msk.f32.gmra.mxu1 %vm44_vm1, %v2172_v29  ;;  %v842_v33 = vpop.f32.mrf.mxu3  ;;  %v2228_v29 = vld [vmem:[%s3438_s0 + $0x550] sm:$0xff] }
 0x14d   :  { %v946_v34 = vpack.c.bf16 %v921_v31, %v921_v31  ;;  %v651_v35 = vmax.f32 %v433_v30, %v624_v32  ;;  %v2279_v30 = vld [vmem:[%s3438_s0 + $0x618] sm:$0xff] }
 0x14f   :  { %972 = vst.msk [vmem:[%s3440_s3 + $0x5c] sm:$0xf] %vm948_vm2, %v946_v34  ;;  %v869_v38 = vmax.f32 %v651_v35, %v842_v33  ;;  %v2126_v35 = vld [vmem:[%s3438_s0 + $0x3c0] sm:$0xff] }
 0x151   :  { %v897_v39 = vadd.f32 %v2652_v14, %v869_v38  ;;  %2250 = vmatmul.msk.f32.gmra.mxu2 %vm44_vm1, %v2224_v36  ;;  %v1093_v40 = vpop.f32.mrf.mxu0  ;;  %v1286_v41 = vpop.f32.mrf.mxu1  ;;  %2301 = vmatmul.msk.f32.gmra.mxu3 %vm44_vm1, %v2275_v37  ;;  %v2177_v36 = vld [vmem:[%s3438_s0 + $0x488] sm:$0xff] }
 0x152   :  { %v1361_v44 = vmax.f32 %v1093_v40, %v1286_v41 }
 0x153   :  { %v922_v45 = vmax.f32 %v897_v39, 0.0 }
 0x154   :  { %v1504_v46 = vpop.f32.mrf.mxu2  ;;  %2148 = vmatmul.msk.f32.gmra.mxu0 %vm44_vm1, %v2122_v42  ;;  %2199 = vmatmul.msk.f32.gmra.mxu1 %vm44_vm1, %v2173_v43  ;;  %v1722_v47 = vpop.f32.mrf.mxu3  ;;  %v2229_v43 = vld [vmem:[%s3438_s0 + $0x558] sm:$0xff] }
 0x155   :  { %v947_v48 = vpack.c.bf16 %v922_v45, %v922_v45  ;;  %v1579_v49 = vmax.f32 %v1361_v44, %v1504_v46  ;;  %v2280_v44 = vld [vmem:[%s3438_s0 + $0x620] sm:$0xff] }
 0x157   :  { %974 = vst.msk [vmem:[%s3440_s3 + $0x60] sm:$0x3] %vm973_vm3, %v947_v48  ;;  %v1797_v52 = vmax.f32 %v1579_v49, %v1722_v47  ;;  %v2127_v49 = vld [vmem:[%s3438_s0 + $0x3c8] sm:$0xff] }
 0x159   :  { %v1822_v53 = vadd.f32 %v2652_v14, %v1797_v52  ;;  %2251 = vmatmul.msk.f32.gmra.mxu2 %vm44_vm1, %v2225_v50  ;;  %v1096_v54 = vpop.f32.mrf.mxu0  ;;  %v1289_v55 = vpop.f32.mrf.mxu1  ;;  %2302 = vmatmul.msk.f32.gmra.mxu3 %vm44_vm1, %v2276_v51  ;;  %v2178_v50 = vld [vmem:[%s3438_s0 + $0x490] sm:$0xff] }
 0x15a   :  { %v1362_v58 = vmax.f32 %v1096_v54, %v1289_v55 }
 0x15b   :  { %v1847_v59 = vmax.f32 %v1822_v53, 0.0 }
 0x15c   :  { %v1507_v60 = vpop.f32.mrf.mxu2  ;;  %2149 = vmatmul.msk.f32.gmra.mxu0 %vm44_vm1, %v2123_v56  ;;  %2200 = vmatmul.msk.f32.gmra.mxu1 %vm44_vm1, %v2174_v57  ;;  %v1725_v61 = vpop.f32.mrf.mxu3  ;;  %v2230_v57 = vld [vmem:[%s3438_s0 + $0x560] sm:$0xff] }
 0x15d   :  { %v1872_v62 = vpack.c.bf16 %v1847_v59, %v1847_v59  ;;  %v1580_v63 = vmax.f32 %v1362_v58, %v1507_v60  ;;  %v2281_v58 = vld [vmem:[%s3438_s0 + $0x628] sm:$0xff] }
 0x15f   :  { %2310 = vst.msk [vmem:[%s3440_s3 + $0x64] sm:$0xf] %vm948_vm2, %v1872_v62  ;;  %v1798_v2 = vmax.f32 %v1580_v63, %v1725_v61  ;;  %v2128_v63 = vld [vmem:[%s3438_s0 + $0x3d0] sm:$0xff] }
 0x161   :  { %v1823_v3 = vadd.f32 %v2652_v14, %v1798_v2  ;;  %2252 = vmatmul.msk.f32.gmra.mxu2 %vm44_vm1, %v2226_v0  ;;  %v1099_v4 = vpop.f32.mrf.mxu0  ;;  %v1292_v5 = vpop.f32.mrf.mxu1  ;;  %2303 = vmatmul.msk.f32.gmra.mxu3 %vm44_vm1, %v2277_v1  ;;  %v2179_v0 = vld [vmem:[%s3438_s0 + $0x498] sm:$0xff] }
 0x162   :  { %v1363_v8 = vmax.f32 %v1099_v4, %v1292_v5 }
 0x163   :  { %v1848_v9 = vmax.f32 %v1823_v3, 0.0 }
 0x164   :  { %v1510_v10 = vpop.f32.mrf.mxu2  ;;  %2150 = vmatmul.msk.f32.gmra.mxu0 %vm44_vm1, %v2124_v6  ;;  %2201 = vmatmul.msk.f32.gmra.mxu1 %vm44_vm1, %v2175_v7  ;;  %v1728_v14 = vpop.f32.mrf.mxu3  ;;  %v2231_v7 = vld [vmem:[%s3438_s0 + $0x568] sm:$0xff] }
 0x165   :  { %v1873_v11 = vpack.c.bf16 %v1848_v9, %v1848_v9  ;;  %v1581_v12 = vmax.f32 %v1363_v8, %v1510_v10  ;;  %v2282_v8 = vld [vmem:[%s3438_s0 + $0x630] sm:$0xff] }
 0x167   :  { %2311 = vst.msk [vmem:[%s3440_s3 + $0x68] sm:$0xf] %vm948_vm2, %v1873_v11  ;;  %v1799_v16 = vmax.f32 %v1581_v12, %v1728_v14  ;;  %v2129_v12 = vld [vmem:[%s3438_s0 + $0x3d8] sm:$0xff] }
 0x169   :  { %v1824_v18 = vadd.f32 %v3230_v17, %v1799_v16  ;;  %2253 = vmatmul.msk.f32.gmra.mxu2 %vm44_vm1, %v2227_v13  ;;  %v1102_v19 = vpop.f32.mrf.mxu0  ;;  %v1295_v20 = vpop.f32.mrf.mxu1  ;;  %2304 = vmatmul.msk.f32.gmra.mxu3 %vm44_vm1, %v2278_v15  ;;  %v2180_v13 = vld [vmem:[%s3438_s0 + $0x4a0] sm:$0xff] }
 0x16a   :  { %v1364_v23 = vmax.f32 %v1102_v19, %v1295_v20 }
 0x16b   :  { %v1849_v24 = vmax.f32 %v1824_v18, 0.0 }
 0x16c   :  { %v1513_v25 = vpop.f32.mrf.mxu2  ;;  %2151 = vmatmul.msk.f32.gmra.mxu0 %vm44_vm1, %v2125_v21  ;;  %2202 = vmatmul.msk.f32.gmra.mxu1 %vm44_vm1, %v2176_v22  ;;  %v1731_v26 = vpop.f32.mrf.mxu3  ;;  %v2232_v22 = vld [vmem:[%s3438_s0 + $0x570] sm:$0xf] }
 0x16d   :  { %v1874_v27 = vpack.c.bf16 %v1849_v24, %v1849_v24  ;;  %v1582_v28 = vmax.f32 %v1364_v23, %v1513_v25  ;;  %v2283_v23 = vld [vmem:[%s3438_s0 + $0x638] sm:$0xf] }
 0x16f   :  { %2312 = vst.msk [vmem:[%s3440_s3 + $0x6c] sm:$0xf] %vm948_vm2, %v1874_v27  ;;  %v1800_v31 = vmax.f32 %v1582_v28, %v1731_v26  ;;  %v2130_v28 = vld [vmem:[%s3438_s0 + $0x3e0] sm:$0xf] }
 0x171   :  { %v1825_v32 = vadd.f32 %v3230_v17, %v1800_v31  ;;  %2254 = vmatmul.msk.f32.gmra.mxu2 %vm44_vm1, %v2228_v29  ;;  %v1105_v33 = vpop.f32.mrf.mxu0  ;;  %v1298_v34 = vpop.f32.mrf.mxu1  ;;  %2305 = vmatmul.msk.f32.gmra.mxu3 %vm44_vm1, %v2279_v30  ;;  %v2181_v29 = vld [vmem:[%s3438_s0 + $0x4a8] sm:$0xf] }
 0x172   :  { %v1365_v37 = vmax.f32 %v1105_v33, %v1298_v34 }
 0x173   :  { %v1850_v38 = vmax.f32 %v1825_v32, 0.0 }
 0x174   :  { %v1516_v39 = vpop.f32.mrf.mxu2  ;;  %2152 = vmatmul.msk.f32.gmra.mxu0 %vm44_vm1, %v2126_v35  ;;  %2203 = vmatmul.msk.f32.gmra.mxu1 %vm44_vm1, %v2177_v36  ;;  %v1734_v40 = vpop.f32.mrf.mxu3 }
 0x175   :  { %v1875_v41 = vpack.c.bf16 %v1850_v38, %v1850_v38  ;;  %v1583_v42 = vmax.f32 %v1365_v37, %v1516_v39 }
 0x177   :  { %2313 = vst.msk [vmem:[%s3440_s3 + $0x70] sm:$0xf] %vm948_vm2, %v1875_v41  ;;  %v1801_v45 = vmax.f32 %v1583_v42, %v1734_v40 }
 0x179   :  { %v1826_v46 = vadd.f32 %v3230_v17, %v1801_v45  ;;  %2255 = vmatmul.msk.f32.gmra.mxu2 %vm44_vm1, %v2229_v43  ;;  %v1108_v47 = vpop.f32.mrf.mxu0  ;;  %v1301_v48 = vpop.f32.mrf.mxu1  ;;  %2306 = vmatmul.msk.f32.gmra.mxu3 %vm44_vm1, %v2280_v44 }
 0x17a   :  { %v1366_v51 = vmax.f32 %v1108_v47, %v1301_v48 }
 0x17b   :  { %v1851_v52 = vmax.f32 %v1826_v46, 0.0 }
 0x17c   :  { %v1519_v53 = vpop.f32.mrf.mxu2  ;;  %2153 = vmatmul.msk.f32.gmra.mxu0 %vm44_vm1, %v2127_v49  ;;  %2204 = vmatmul.msk.f32.gmra.mxu1 %vm44_vm1, %v2178_v50  ;;  %v1737_v54 = vpop.f32.mrf.mxu3 }
 0x17d   :  { %v1876_v55 = vpack.c.bf16 %v1851_v52, %v1851_v52  ;;  %v1584_v56 = vmax.f32 %v1366_v51, %v1519_v53 }
 0x17f   :  { %2314 = vst.msk [vmem:[%s3440_s3 + $0x74] sm:$0xf] %vm948_vm2, %v1876_v55  ;;  %v1802_v59 = vmax.f32 %v1584_v56, %v1737_v54 }
 0x181   :  { %v1827_v60 = vadd.f32 %v3230_v17, %v1802_v59  ;;  %2256 = vmatmul.msk.f32.gmra.mxu2 %vm44_vm1, %v2230_v57  ;;  %v1111_v61 = vpop.f32.mrf.mxu0  ;;  %v1304_v62 = vpop.f32.mrf.mxu1  ;;  %2307 = vmatmul.msk.f32.gmra.mxu3 %vm44_vm1, %v2281_v58 }
 0x182   :  { %v1367_v1 = vmax.f32 %v1111_v61, %v1304_v62 }
 0x183   :  { %v1852_v2 = vmax.f32 %v1827_v60, 0.0 }
 0x184   :  { %v1522_v3 = vpop.f32.mrf.mxu2  ;;  %2154 = vmatmul.msk.f32.gmra.mxu0 %vm44_vm1, %v2128_v63  ;;  %2205 = vmatmul.msk.f32.gmra.mxu1 %vm44_vm1, %v2179_v0  ;;  %v1740_v4 = vpop.f32.mrf.mxu3 }
 0x185   :  { %v1877_v5 = vpack.c.bf16 %v1852_v2, %v1852_v2  ;;  %v1585_v6 = vmax.f32 %v1367_v1, %v1522_v3 }
 0x187   :  { %2315 = vst.msk [vmem:[%s3440_s3 + $0x78] sm:$0xf] %vm948_vm2, %v1877_v5  ;;  %v1803_v9 = vmax.f32 %v1585_v6, %v1740_v4 }
 0x189   :  { %v1828_v10 = vadd.f32 %v3230_v17, %v1803_v9  ;;  %2257 = vmatmul.msk.f32.gmra.mxu2 %vm44_vm1, %v2231_v7  ;;  %v1114_v14 = vpop.f32.mrf.mxu0  ;;  %v1307_v11 = vpop.f32.mrf.mxu1  ;;  %2308 = vmatmul.msk.f32.gmra.mxu3 %vm44_vm1, %v2282_v8 }
 0x18a   :  { %v1368_v15 = vmax.f32 %v1114_v14, %v1307_v11 }
 0x18b   :  { %v1853_v16 = vmax.f32 %v1828_v10, 0.0 }
 0x18c   :  { %v1525_v18 = vpop.f32.mrf.mxu2  ;;  %2155 = vmatmul.msk.f32.gmra.mxu0 %vm44_vm1, %v2129_v12  ;;  %2206 = vmatmul.msk.f32.gmra.mxu1 %vm44_vm1, %v2180_v13  ;;  %v1743_v19 = vpop.f32.mrf.mxu3 }
 0x18d   :  { %v1878_v20 = vpack.c.bf16 %v1853_v16, %v1853_v16  ;;  %v1586_v21 = vmax.f32 %v1368_v15, %v1525_v18 }
 0x18f   :  { %2316 = vst.msk [vmem:[%s3440_s3 + $0x7c] sm:$0xf] %vm948_vm2, %v1878_v20  ;;  %v1804_v24 = vmax.f32 %v1586_v21, %v1743_v19 }
 0x191   :  { %v1829_v25 = vadd.f32 %v3230_v17, %v1804_v24  ;;  %2258 = vmatmul.msk.f32.gmra.mxu2 %vm44_vm1, %v2232_v22  ;;  %v1117_v26 = vpop.f32.mrf.mxu0  ;;  %v1310_v27 = vpop.f32.mrf.mxu1  ;;  %2309 = vmatmul.msk.f32.gmra.mxu3 %vm44_vm1, %v2283_v23 }
 0x192   :  { %v1369_v30 = vmax.f32 %v1117_v26, %v1310_v27 }
 0x193   :  { %v1854_v31 = vmax.f32 %v1829_v25, 0.0 }
 0x194   :  { %v1528_v32 = vpop.f32.mrf.mxu2  ;;  %2156 = vmatmul.msk.f32.gmra.mxu0 %vm44_vm1, %v2130_v28  ;;  %2207 = vmatmul.msk.f32.gmra.mxu1 %vm44_vm1, %v2181_v29  ;;  %v1746_v33 = vpop.f32.mrf.mxu3 }
 0x195   :  { %v1879_v34 = vpack.c.bf16 %v1854_v31, %v1854_v31  ;;  %v1587_v35 = vmax.f32 %v1369_v30, %v1528_v32 }
 0x197   :  { %2317 = vst.msk [vmem:[%s3440_s3 + $0x80] sm:$0xf] %vm948_vm2, %v1879_v34  ;;  %v1805_v36 = vmax.f32 %v1587_v35, %v1746_v33 }
 0x199   :  { %v1830_v37 = vadd.f32 %v3230_v17, %v1805_v36  ;;  %v1120_v38 = vpop.f32.mrf.mxu0  ;;  %v1313_v39 = vpop.f32.mrf.mxu1 }
 0x19a   :  { %v1370_v40 = vmax.f32 %v1120_v38, %v1313_v39 }
 0x19b   :  { %v1855_v41 = vmax.f32 %v1830_v37, 0.0 }
 0x19c   :  { %v1531_v42 = vpop.f32.mrf.mxu2  ;;  %v1749_v43 = vpop.f32.mrf.mxu3 }
 0x19d   :  { %v1880_v44 = vpack.c.bf16 %v1855_v41, %v1855_v41  ;;  %v1588_v45 = vmax.f32 %v1370_v40, %v1531_v42 }
 0x19f   :  { %2318 = vst.msk [vmem:[%s3440_s3 + $0x84] sm:$0xf] %vm948_vm2, %v1880_v44  ;;  %v1806_v46 = vmax.f32 %v1588_v45, %v1749_v43 }
 0x1a1   :  { %v1831_v47 = vadd.f32 %v3230_v17, %v1806_v46  ;;  %v1123_v48 = vpop.f32.mrf.mxu0  ;;  %v1316_v49 = vpop.f32.mrf.mxu1 }
 0x1a2   :  { %v1371_v50 = vmax.f32 %v1123_v48, %v1316_v49 }
 0x1a3   :  { %v1856_v51 = vmax.f32 %v1831_v47, 0.0 }
 0x1a4   :  { %v1534_v52 = vpop.f32.mrf.mxu2  ;;  %v1752_v53 = vpop.f32.mrf.mxu3 }
 0x1a5   :  { %v1881_v54 = vpack.c.bf16 %v1856_v51, %v1856_v51  ;;  %v1589_v55 = vmax.f32 %v1371_v50, %v1534_v52 }
 0x1a7   :  { %2319 = vst.msk [vmem:[%s3440_s3 + $0x88] sm:$0xf] %vm948_vm2, %v1881_v54  ;;  %v1807_v56 = vmax.f32 %v1589_v55, %v1752_v53 }
 0x1a9   :  { %v1832_v57 = vadd.f32 %v3230_v17, %v1807_v56  ;;  %v1126_v58 = vpop.f32.mrf.mxu0  ;;  %v1319_v59 = vpop.f32.mrf.mxu1 }
 0x1aa   :  { %v1372_v60 = vmax.f32 %v1126_v58, %v1319_v59 }
 0x1ab   :  { %v1857_v61 = vmax.f32 %v1832_v57, 0.0 }
 0x1ac   :  { %v1537_v62 = vpop.f32.mrf.mxu2  ;;  %v1755_v63 = vpop.f32.mrf.mxu3 }
 0x1ad   :  { %v1882_v0 = vpack.c.bf16 %v1857_v61, %v1857_v61  ;;  %v1590_v1 = vmax.f32 %v1372_v60, %v1537_v62 }
 0x1af   :  { %2320 = vst.msk [vmem:[%s3440_s3 + $0x8c] sm:$0xf] %vm948_vm2, %v1882_v0  ;;  %v1808_v2 = vmax.f32 %v1590_v1, %v1755_v63 }
 0x1b1   :  { %v1833_v3 = vadd.f32 %v3230_v17, %v1808_v2  ;;  %v1129_v4 = vpop.f32.mrf.mxu0  ;;  %v1322_v5 = vpop.f32.mrf.mxu1 }
 0x1b2   :  { %v1373_v6 = vmax.f32 %v1129_v4, %v1322_v5 }
 0x1b3   :  { %v1858_v7 = vmax.f32 %v1833_v3, 0.0 }
 0x1b4   :  { %v1540_v8 = vpop.f32.mrf.mxu2  ;;  %v1758_v9 = vpop.f32.mrf.mxu3 }
 0x1b5   :  { %v1883_v10 = vpack.c.bf16 %v1858_v7, %v1858_v7  ;;  %v1591_v14 = vmax.f32 %v1373_v6, %v1540_v8 }
 0x1b7   :  { %2321 = vst.msk [vmem:[%s3440_s3 + $0x90] sm:$0xf] %vm948_vm2, %v1883_v10  ;;  %v1809_v11 = vmax.f32 %v1591_v14, %v1758_v9 }
 0x1b9   :  { %v1834_v12 = vadd.f32 %v3230_v17, %v1809_v11  ;;  %v1132_v13 = vpop.f32.mrf.mxu0  ;;  %v1325_v15 = vpop.f32.mrf.mxu1 }
 0x1ba   :  { %v1374_v16 = vmax.f32 %v1132_v13, %v1325_v15 }
 0x1bb   :  { %v1859_v18 = vmax.f32 %v1834_v12, 0.0 }
 0x1bc   :  { %v1543_v19 = vpop.f32.mrf.mxu2  ;;  %v1761_v20 = vpop.f32.mrf.mxu3 }
 0x1bd   :  { %v1884_v21 = vpack.c.bf16 %v1859_v18, %v1859_v18  ;;  %v1592_v22 = vmax.f32 %v1374_v16, %v1543_v19 }
 0x1bf   :  { %2322 = vst.msk [vmem:[%s3440_s3 + $0x94] sm:$0xf] %vm948_vm2, %v1884_v21  ;;  %v1810_v23 = vmax.f32 %v1592_v22, %v1761_v20 }
 0x1c1   :  { %v1835_v24 = vadd.f32 %v3230_v17, %v1810_v23  ;;  %v1135_v25 = vpop.f32.mrf.mxu0  ;;  %v1328_v26 = vpop.f32.mrf.mxu1 }
 0x1c2   :  { %v1375_v27 = vmax.f32 %v1135_v25, %v1328_v26 }
 0x1c3   :  { %v1860_v28 = vmax.f32 %v1835_v24, 0.0 }
 0x1c4   :  { %v1546_v29 = vpop.f32.mrf.mxu2  ;;  %v1764_v30 = vpop.f32.mrf.mxu3 }
 0x1c5   :  { %v1885_v31 = vpack.c.bf16 %v1860_v28, %v1860_v28  ;;  %v1593_v32 = vmax.f32 %v1375_v27, %v1546_v29 }
 0x1c7   :  { %2323 = vst.msk [vmem:[%s3440_s3 + $0x98] sm:$0xf] %vm948_vm2, %v1885_v31  ;;  %v1811_v33 = vmax.f32 %v1593_v32, %v1764_v30 }
 0x1c9   :  { %v1836_v34 = vadd.f32 %v3230_v17, %v1811_v33  ;;  %v1138_v35 = vpop.f32.mrf.mxu0  ;;  %v1331_v36 = vpop.f32.mrf.mxu1 }
 0x1ca   :  { %v1376_v37 = vmax.f32 %v1138_v35, %v1331_v36 }
 0x1cb   :  { %v1861_v38 = vmax.f32 %v1836_v34, 0.0 }
 0x1cc   :  { %v1549_v39 = vpop.f32.mrf.mxu2  ;;  %v1767_v40 = vpop.f32.mrf.mxu3 }
 0x1cd   :  { %v1886_v41 = vpack.c.bf16 %v1861_v38, %v1861_v38  ;;  %v1594_v42 = vmax.f32 %v1376_v37, %v1549_v39 }
 0x1cf   :  { %2324 = vst.msk [vmem:[%s3440_s3 + $0x9c] sm:$0xf] %vm948_vm2, %v1886_v41  ;;  %v1812_v43 = vmax.f32 %v1594_v42, %v1767_v40 }
 0x1d1   :  { %v1837_v44 = vadd.f32 %v3230_v17, %v1812_v43  ;;  %v1141_v45 = vpop.f32.mrf.mxu0  ;;  %v1334_v46 = vpop.f32.mrf.mxu1 }
 0x1d2   :  { %v1377_v47 = vmax.f32 %v1141_v45, %v1334_v46 }
 0x1d3   :  { %v1862_v48 = vmax.f32 %v1837_v44, 0.0 }
 0x1d4   :  { %v1552_v49 = vpop.f32.mrf.mxu2  ;;  %v1770_v50 = vpop.f32.mrf.mxu3 }
 0x1d5   :  { %v1887_v51 = vpack.c.bf16 %v1862_v48, %v1862_v48  ;;  %v1595_v52 = vmax.f32 %v1377_v47, %v1552_v49 }
 0x1d7   :  { %2325 = vst.msk [vmem:[%s3440_s3 + $0xa0] sm:$0xf] %vm948_vm2, %v1887_v51  ;;  %v1813_v53 = vmax.f32 %v1595_v52, %v1770_v50 }
 0x1d9   :  { %v1838_v54 = vadd.f32 %v3230_v17, %v1813_v53  ;;  %v1144_v55 = vpop.f32.mrf.mxu0  ;;  %v1337_v56 = vpop.f32.mrf.mxu1 }
 0x1da   :  { %v1378_v57 = vmax.f32 %v1144_v55, %v1337_v56 }
 0x1db   :  { %v1863_v58 = vmax.f32 %v1838_v54, 0.0 }
 0x1dc   :  { %v1555_v59 = vpop.f32.mrf.mxu2  ;;  %v1773_v60 = vpop.f32.mrf.mxu3 }
 0x1dd   :  { %v1888_v61 = vpack.c.bf16 %v1863_v58, %v1863_v58  ;;  %v1596_v62 = vmax.f32 %v1378_v57, %v1555_v59 }
 0x1df   :  { %2326 = vst.msk [vmem:[%s3440_s3 + $0xa4] sm:$0xf] %vm948_vm2, %v1888_v61  ;;  %v1814_v63 = vmax.f32 %v1596_v62, %v1773_v60 }
 0x1e1   :  { %v1839_v0 = vadd.f32 %v3230_v17, %v1814_v63  ;;  %v1147_v1 = vpop.f32.mrf.mxu0  ;;  %v1340_v2 = vpop.f32.mrf.mxu1 }
 0x1e2   :  { %v1379_v3 = vmax.f32 %v1147_v1, %v1340_v2 }
 0x1e3   :  { %v1864_v4 = vmax.f32 %v1839_v0, 0.0 }
 0x1e4   :  { %v1558_v5 = vpop.f32.mrf.mxu2  ;;  %v1776_v6 = vpop.f32.mrf.mxu3 }
 0x1e5   :  { %v1889_v7 = vpack.c.bf16 %v1864_v4, %v1864_v4  ;;  %v1597_v8 = vmax.f32 %v1379_v3, %v1558_v5 }
 0x1e7   :  { %2327 = vst.msk [vmem:[%s3440_s3 + $0xa8] sm:$0xf] %vm948_vm2, %v1889_v7  ;;  %v1815_v9 = vmax.f32 %v1597_v8, %v1776_v6 }
 0x1e9   :  { %v1840_v10 = vadd.f32 %v3230_v17, %v1815_v9  ;;  %v1150_v14 = vpop.f32.mrf.mxu0  ;;  %v1343_v11 = vpop.f32.mrf.mxu1 }
 0x1ea   :  { %v1380_v12 = vmax.f32 %v1150_v14, %v1343_v11 }
 0x1eb   :  { %v1865_v13 = vmax.f32 %v1840_v10, 0.0 }
 0x1ec   :  { %v1561_v15 = vpop.f32.mrf.mxu2  ;;  %v1779_v16 = vpop.f32.mrf.mxu3 }
 0x1ed   :  { %v1890_v18 = vpack.c.bf16 %v1865_v13, %v1865_v13  ;;  %v1598_v19 = vmax.f32 %v1380_v12, %v1561_v15 }
 0x1ef   :  { %2328 = vst.msk [vmem:[%s3440_s3 + $0xac] sm:$0xf] %vm948_vm2, %v1890_v18  ;;  %v1816_v20 = vmax.f32 %v1598_v19, %v1779_v16 }
 0x1f1   :  { %v1841_v21 = vadd.f32 %v3230_v17, %v1816_v20  ;;  %v1153_v22 = vpop.f32.mrf.mxu0  ;;  %v1346_v23 = vpop.f32.mrf.mxu1 }
 0x1f2   :  { %v1381_v24 = vmax.f32 %v1153_v22, %v1346_v23 }
 0x1f3   :  { %v1866_v25 = vmax.f32 %v1841_v21, 0.0 }
 0x1f4   :  { %v1564_v26 = vpop.f32.mrf.mxu2  ;;  %v1782_v27 = vpop.f32.mrf.mxu3 }
 0x1f5   :  { %v1891_v28 = vpack.c.bf16 %v1866_v25, %v1866_v25  ;;  %v1599_v29 = vmax.f32 %v1381_v24, %v1564_v26 }
 0x1f7   :  { %2329 = vst.msk [vmem:[%s3440_s3 + $0xb0] sm:$0xf] %vm948_vm2, %v1891_v28  ;;  %v1817_v30 = vmax.f32 %v1599_v29, %v1782_v27 }
 0x1f9   :  { %v1842_v31 = vadd.f32 %v3230_v17, %v1817_v30  ;;  %v1156_v32 = vpop.f32.mrf.mxu0  ;;  %v1349_v33 = vpop.f32.mrf.mxu1 }
 0x1fa   :  { %v1382_v34 = vmax.f32 %v1156_v32, %v1349_v33 }
 0x1fb   :  { %v1867_v35 = vmax.f32 %v1842_v31, 0.0 }
 0x1fc   :  { %v1567_v36 = vpop.f32.mrf.mxu2  ;;  %v1785_v37 = vpop.f32.mrf.mxu3 }
 0x1fd   :  { %v1892_v38 = vpack.c.bf16 %v1867_v35, %v1867_v35  ;;  %v1600_v39 = vmax.f32 %v1382_v34, %v1567_v36 }
 0x1ff   :  { %2330 = vst.msk [vmem:[%s3440_s3 + $0xb4] sm:$0xf] %vm948_vm2, %v1892_v38  ;;  %v1818_v40 = vmax.f32 %v1600_v39, %v1785_v37 }
 0x201   :  { %v1843_v41 = vadd.f32 %v3230_v17, %v1818_v40  ;;  %v1159_v42 = vpop.f32.mrf.mxu0  ;;  %v1352_v43 = vpop.f32.mrf.mxu1 }
 0x202   :  { %v1383_v44 = vmax.f32 %v1159_v42, %v1352_v43 }
 0x203   :  { %v1868_v45 = vmax.f32 %v1843_v41, 0.0 }
 0x204   :  { %v1570_v46 = vpop.f32.mrf.mxu2  ;;  %v1788_v47 = vpop.f32.mrf.mxu3 }
 0x205   :  { %v1893_v48 = vpack.c.bf16 %v1868_v45, %v1868_v45  ;;  %v1601_v49 = vmax.f32 %v1383_v44, %v1570_v46 }
 0x207   :  { %2331 = vst.msk [vmem:[%s3440_s3 + $0xb8] sm:$0xf] %vm948_vm2, %v1893_v48  ;;  %v1819_v50 = vmax.f32 %v1601_v49, %v1788_v47 }
 0x209   :  { %v1844_v51 = vadd.f32 %v3230_v17, %v1819_v50  ;;  %v1162_v52 = vpop.f32.mrf.mxu0  ;;  %v1355_v53 = vpop.f32.mrf.mxu1 }
 0x20a   :  { %v1384_v54 = vmax.f32 %v1162_v52, %v1355_v53 }
 0x20b   :  { %v1869_v55 = vmax.f32 %v1844_v51, 0.0 }
 0x20c   :  { %v1573_v56 = vpop.f32.mrf.mxu2  ;;  %v1791_v57 = vpop.f32.mrf.mxu3 }
 0x20d   :  { %v1894_v58 = vpack.c.bf16 %v1869_v55, %v1869_v55  ;;  %v1602_v59 = vmax.f32 %v1384_v54, %v1573_v56 }
 0x20f   :  { %2332 = vst.msk [vmem:[%s3440_s3 + $0xbc] sm:$0xf] %vm948_vm2, %v1894_v58  ;;  %v1820_v60 = vmax.f32 %v1602_v59, %v1791_v57 }
 0x211   :  { %v1845_v61 = vadd.f32 %v3230_v17, %v1820_v60  ;;  %v1165_v62 = vpop.f32.mrf.mxu0  ;;  %v1358_v63 = vpop.f32.mrf.mxu1 }
 0x212   :  { %v1385_v0 = vmax.f32 %v1165_v62, %v1358_v63 }
 0x213   :  { %v1870_v1 = vmax.f32 %v1845_v61, 0.0 }
 0x214   :  { %v1576_v2 = vpop.f32.mrf.mxu2  ;;  %v1794_v3 = vpop.f32.mrf.mxu3 }
 0x215   :  { %v1895_v4 = vpack.c.bf16 %v1870_v1, %v1870_v1  ;;  %v1603_v5 = vmax.f32 %v1385_v0, %v1576_v2 }
 0x217   :  { %2333 = vst.msk [vmem:[%s3440_s3 + $0xc0] sm:$0xf] %vm948_vm2, %v1895_v4  ;;  %v1821_v6 = vmax.f32 %v1603_v5, %v1794_v3 }
 0x219   :  { %v1846_v7 = vadd.f32 %v3230_v17, %v1821_v6 }
 0x21b   :  { %v1871_v8 = vmax.f32 %v1846_v7, 0.0 }
 0x21d   :  { %v1896_v9 = vpack.c.bf16 %v1871_v8, %v1871_v8 }
 0x21f   :  { %2334 = vst.msk [vmem:[%s3440_s3 + $0xc4] sm:$0x3] %vm973_vm3, %v1896_v9 }

// kernel: cnn_forward.3
= control target key start
LH: loop header
LB: loop body
LE: loop exit
PB: predicated region body
PF: predicated region fallthrough
CT: control target
= control target key end

     0   :  { %s6536_s18 = smov 0   ;;  %s6538_s19 = smov 0   ;;  %s8032_s0 = inlined_call_operand.vmem [shape: bf16[2,6272], index: 0, kind: input, shape index: {}]   ;;  %s8033_s1 = inlined_call_operand.vmem [shape: bf16[6272,1024], index: 1, kind: input, shape index: {}]   ;;  %s8034_s2 = inlined_call_operand.vmem [shape: f32[1,1024], index: 2, kind: input, shape index: {}]   ;;  %s8035_s3 = inlined_call_operand.vmem [shape: f32[1024,10], index: 3, kind: input, shape index: {}]   ;;  %s8036_s4 = inlined_call_operand.vmem [shape: f32[1,10], index: 4, kind: input, shape index: {}]   ;;  %s8037_s5 = inlined_call_operand.vmem [shape: s32[2,1], index: 5, kind: output, shape index: {}]  }
   0x1   :  { %s6540_s20 = smov 0  }
   0x2 LB: > { %s24_s21 = sadd.s32 1, %s6499_s19  ;;  %p4192_p0 = scmp.ge.s32.totalorder %s6503_s20, 1  ;;  %s6503_s20 = sphi %s6540_s20, %s15_s20   ;;  %s6499_s19 = sphi %s6538_s19, %s8039_s19   ;;  %s6495_s18 = sphi %s6536_s18, %s8038_s18  }
   0x3   : > { %p25_p1 = scmp.ge.s32.totalorder %s24_s21, 7  ;;  %p217_p2 = scmp.lt.s32.totalorder %s6503_s20, 8 }
   0x5   : > { %s8041_s21 = smov (%p25_p1, %s24_s21), 0  ;;  %p218_p3 = pnand %p4192_p0, %p217_p2 }
   0x6   : > { %s253_s22 = smul.u32 (!%p218_p3), 7, %s6495_s18  ;;  %p4195_p6 = scmp.ne.s32.totalorder (!%p218_p3), %s6495_s18, 0 }
   0x7   : > { %221 = sbr.rel (%p218_p3) target bundleno = 1302 (0x516), region = 40 }
   0x8   : > { %s262_s23 = smul.u32 (!%p218_p3), 112, %s6495_s18  ;;  %p256_p4 = scmp.lt.s32.totalorder (!%p218_p3), %s253_s22, 48 }
   0xa   : > { %p263_p5 = scmp.lt.s32.totalorder (!%p218_p3), %s262_s23, 783 }
   0xc   : > { %s8043_s22 = smov (!%p256_p4, %s253_s22), 48  ;;  %s8045_s23 = smov (!%p263_p5, %s262_s23), 783 }
   0xd   : > { %s260_s26 = scalar_lea.vmem %s8032_s0, %s8043_s22  ;;  %s5992_s27 = sshll.u32 %s8045_s23, 5 }
   0xe   : > { %s6567_s30 = scalar_lea.vmem %s8033_s1, %s5992_s27  ;;  %276 = sbr.rel (%p4195_p6) target bundleno = 22 (0x16), region = 44 }
  0x13   : > { %v6505_v0 = vmov 0.0  }
  0x14   : > { %277 = vst [vmem:[#allocation2] sm:$0xff] %v6505_v0 }
  0x15   : > { %278 = vst [vmem:[#allocation2 + $0x8] sm:$0xff] %v6505_v0 }
  0x16 PF: > { %v4422_v1 = vld [vmem:[%s6567_s30 + $0x1c0] sm:$0xf]  ;;  %vm3728_vm0 = vcmask 1041408   ;;  %vm3730_vm1 = vcmask 1045508   ;;  %vm3732_vm2 = vcmask 1043456   ;;  %p5988_p7 = scmp.ne.s32.totalorder %s6495_s18, 6 }
  0x17   : > { %v6053_v2 = vld [vmem:[%s6567_s30 + $0x1dc] sm:$0xf0] }
  0x18   : > { %v4678_v3 = vld [vmem:[%s6567_s30 + $0x3c0] sm:$0xf]  ;;  %v4423_v4 = vor.u32 %v6053_v2, %v4422_v1 }
  0x19   : > { %v6117_v5 = vld [vmem:[%s6567_s30 + $0x3dc] sm:$0xf0] }
  0x1a   : > { %v4934_v6 = vld [vmem:[%s6567_s30 + $0x5c0] sm:$0xf]  ;;  %v4679_v8 = vor.u32 %v6117_v5, %v4678_v3  ;;  %2986 = vmatpush.bf16.msra.mxu0 %v4423_v4 }
  0x1b   : > { %v6181_v7 = vld [vmem:[%s6567_s30 + $0x5dc] sm:$0xf0] }
  0x1c   : > { %v4935_v9 = vor.u32 %v6181_v7, %v4934_v6  ;;  %v5190_v10 = vld [vmem:[%s6567_s30 + $0x7c0] sm:$0xf]  ;;  %2999 = vmatpush.bf16.msra.mxu1 %v4679_v8 }
  0x1d   : > { %v6245_v11 = vld [vmem:[%s6567_s30 + $0x7dc] sm:$0xf0] }
  0x1e   : > { %v4390_v12 = vld [vmem:[%s6567_s30 + $0x180] sm:$0xf]  ;;  %v5191_v13 = vor.u32 %v6245_v11, %v5190_v10  ;;  %3012 = vmatpush.bf16.msra.mxu2 %v4935_v9 }
  0x1f   : > { %v6045_v14 = vld [vmem:[%s6567_s30 + $0x19c] sm:$0xf0] }
  0x20   : > { %v4646_v15 = vld [vmem:[%s6567_s30 + $0x380] sm:$0xf]  ;;  %v4391_v17 = vor.u32 %v6045_v14, %v4390_v12  ;;  %3025 = vmatpush.bf16.msra.mxu3 %v5191_v13 }
  0x21   : > { %v6109_v16 = vld [vmem:[%s6567_s30 + $0x39c] sm:$0xf0] }
  0x22   : > { %v4647_v18 = vor.u32 %v6109_v16, %v4646_v15  ;;  %v4902_v19 = vld [vmem:[%s6567_s30 + $0x580] sm:$0xf]  ;;  %2987 = vmatpush.bf16.msra.mxu0 %v4391_v17 }
  0x23   : > { %v6173_v20 = vld [vmem:[%s6567_s30 + $0x59c] sm:$0xf0] }
  0x24   : > { %v5158_v21 = vld [vmem:[%s6567_s30 + $0x780] sm:$0xf]  ;;  %v4903_v22 = vor.u32 %v6173_v20, %v4902_v19  ;;  %3000 = vmatpush.bf16.msra.mxu1 %v4647_v18 }
  0x25   : > { %v6237_v23 = vld [vmem:[%s6567_s30 + $0x79c] sm:$0xf0] }
  0x26   : > { %v4358_v24 = vld [vmem:[%s6567_s30 + $0x140] sm:$0xf]  ;;  %v5159_v26 = vor.u32 %v6237_v23, %v5158_v21  ;;  %3013 = vmatpush.bf16.msra.mxu2 %v4903_v22 }
  0x27   : > { %v6037_v25 = vld [vmem:[%s6567_s30 + $0x15c] sm:$0xf0] }
  0x28   : > { %v4614_v27 = vld [vmem:[%s6567_s30 + $0x340] sm:$0xf]  ;;  %v4359_v30 = vor.u32 %v6037_v25, %v4358_v24  ;;  %3026 = vmatpush.bf16.msra.mxu3 %v5159_v26 }
  0x29   : > { %v6101_v28 = vld [vmem:[%s6567_s30 + $0x35c] sm:$0xf0] }
  0x2a   : > { %v4870_v29 = vld [vmem:[%s6567_s30 + $0x540] sm:$0xf]  ;;  %v4615_v34 = vor.u32 %v6101_v28, %v4614_v27  ;;  %2988 = vmatpush.bf16.msra.mxu0 %v4359_v30 }
  0x2b   : > { %v6165_v31 = vld [vmem:[%s6567_s30 + $0x55c] sm:$0xf0] }
  0x2c   : > { %v5126_v32 = vld [vmem:[%s6567_s30 + $0x740] sm:$0xf]  ;;  %v4871_v35 = vor.u32 %v6165_v31, %v4870_v29  ;;  %3001 = vmatpush.bf16.msra.mxu1 %v4615_v34 }
  0x2d   : > { %v6229_v33 = vld [vmem:[%s6567_s30 + $0x75c] sm:$0xf0] }
  0x2e   : > { %v4326_v36 = vld [vmem:[%s6567_s30 + $0x100] sm:$0xf]  ;;  %v5127_v39 = vor.u32 %v6229_v33, %v5126_v32  ;;  %3014 = vmatpush.bf16.msra.mxu2 %v4871_v35 }
  0x2f   : > { %v6029_v37 = vld [vmem:[%s6567_s30 + $0x11c] sm:$0xf0] }
  0x30   : > { %v4582_v38 = vld [vmem:[%s6567_s30 + $0x300] sm:$0xf]  ;;  %v4327_v45 = vor.u32 %v6029_v37, %v4326_v36  ;;  %3027 = vmatpush.bf16.msra.mxu3 %v5127_v39  ;;  %v4424_v39 = vld [vmem:[%s6567_s30 + $0x1e0] sm:$0xf0] }
  0x31   : > { %v6093_v40 = vld [vmem:[%s6567_s30 + $0x31c] sm:$0xf0] }
  0x32   : > { %v4838_v41 = vld [vmem:[%s6567_s30 + $0x500] sm:$0xf]  ;;  %v4583_v46 = vor.u32 %v6093_v40, %v4582_v38  ;;  %2989 = vmatpush.bf16.msra.mxu0 %v4327_v45  ;;  %v6049_v38 = vld [vmem:[%s6567_s30 + $0x1c4] sm:$0xf] }
  0x33   : > { %v6157_v42 = vld [vmem:[%s6567_s30 + $0x51c] sm:$0xf0] }
  0x34   : > { %v5094_v43 = vld [vmem:[%s6567_s30 + $0x700] sm:$0xf]  ;;  %v4839_v47 = vor.u32 %v6157_v42, %v4838_v41  ;;  %3002 = vmatpush.bf16.msra.mxu1 %v4583_v46 }
  0x35   : > { %v6221_v44 = vld [vmem:[%s6567_s30 + $0x71c] sm:$0xf0] }
  0x36   : > { %v4294_v48 = vld [vmem:[%s6567_s30 + $0xc0] sm:$0xf]  ;;  %v5095_v51 = vor.u32 %v6221_v44, %v5094_v43  ;;  %3015 = vmatpush.bf16.msra.mxu2 %v4839_v47  ;;  %v4427_v47 = vor.u32 %v6049_v38, %v4424_v39 }
  0x37   : > { %v6021_v49 = vld [vmem:[%s6567_s30 + $0xdc] sm:$0xf0] }
  0x38   : > { %v4550_v50 = vld [vmem:[%s6567_s30 + $0x2c0] sm:$0xf]  ;;  %v4295_v57 = vor.u32 %v6021_v49, %v4294_v48  ;;  %3028 = vmatpush.bf16.msra.mxu3 %v5095_v51  ;;  %v6041_v51 = vld [vmem:[%s6567_s30 + $0x184] sm:$0xf] }
  0x39   : > { %v6085_v52 = vld [vmem:[%s6567_s30 + $0x2dc] sm:$0xf0] }
  0x3a   : > { %v4806_v53 = vld [vmem:[%s6567_s30 + $0x4c0] sm:$0xf]  ;;  %v4551_v58 = vor.u32 %v6085_v52, %v4550_v50  ;;  %2990 = vmatpush.bf16.msra.mxu0 %v4295_v57  ;;  %v4392_v52 = vld [vmem:[%s6567_s30 + $0x1a0] sm:$0xf0] }
  0x3b   : > { %v6149_v54 = vld [vmem:[%s6567_s30 + $0x4dc] sm:$0xf0] }
  0x3c   : > { %v5062_v55 = vld [vmem:[%s6567_s30 + $0x6c0] sm:$0xf]  ;;  %v4807_v59 = vor.u32 %v6149_v54, %v4806_v53  ;;  %3003 = vmatpush.bf16.msra.mxu1 %v4551_v58 }
  0x3d   : > { %v6213_v56 = vld [vmem:[%s6567_s30 + $0x6dc] sm:$0xf0] }
  0x3e   : > { %v4262_v60 = vld [vmem:[%s6567_s30 + $0x80] sm:$0xf]  ;;  %v5063_v63 = vor.u32 %v6213_v56, %v5062_v55  ;;  %3016 = vmatpush.bf16.msra.mxu2 %v4807_v59 }
  0x3f   : > { %v6013_v61 = vld [vmem:[%s6567_s30 + $0x9c] sm:$0xf0] }
  0x40   : > { %v4518_v62 = vld [vmem:[%s6567_s30 + $0x280] sm:$0xf]  ;;  %v4263_v5 = vor.u32 %v6013_v61, %v4262_v60  ;;  %3029 = vmatpush.bf16.msra.mxu3 %v5063_v63  ;;  %v4395_v61 = vor.u32 %v6041_v51, %v4392_v52  ;;  %v6001_v52 = vld [vmem:[%s6567_s30 + $0x44] sm:$0xf] }
  0x41   : > { %v6077_v0 = vld [vmem:[%s6567_s30 + $0x29c] sm:$0xf0] }
  0x42   : > { %v4774_v1 = vld [vmem:[%s6567_s30 + $0x480] sm:$0xf]  ;;  %v4519_v6 = vor.u32 %v6077_v0, %v4518_v62  ;;  %2991 = vmatpush.bf16.msra.mxu0 %v4263_v5  ;;  %v6033_v0 = vld [vmem:[%s6567_s30 + $0x144] sm:$0xf] }
  0x43   : > { %v6141_v2 = vld [vmem:[%s6567_s30 + $0x49c] sm:$0xf0] }
  0x44   : > { %v5030_v3 = vld [vmem:[%s6567_s30 + $0x680] sm:$0xf]  ;;  %v4775_v7 = vor.u32 %v6141_v2, %v4774_v1  ;;  %3004 = vmatpush.bf16.msra.mxu1 %v4519_v6  ;;  %v4360_v1 = vld [vmem:[%s6567_s30 + $0x160] sm:$0xf0] }
  0x45   : > { %v6205_v4 = vld [vmem:[%s6567_s30 + $0x69c] sm:$0xf0] }
  0x46   : > { %v4230_v8 = vld [vmem:[%s6567_s30 + $0x40] sm:$0xf]  ;;  %v5031_v11 = vor.u32 %v6205_v4, %v5030_v3  ;;  %3017 = vmatpush.bf16.msra.mxu2 %v4775_v7 }
  0x47   : > { %v6005_v9 = vld [vmem:[%s6567_s30 + $0x5c] sm:$0xf0] }
  0x48   : > { %v4486_v10 = vld [vmem:[%s6567_s30 + $0x240] sm:$0xf]  ;;  %v4231_v17 = vor.u32 %v6005_v9, %v4230_v8  ;;  %3030 = vmatpush.bf16.msra.mxu3 %v5031_v11  ;;  %v4363_v8 = vor.u32 %v6033_v0, %v4360_v1  ;;  %v5993_v0 = vld [vmem:[%s6567_s30 + $0x4] sm:$0xf] }
  0x49   : > { %v6069_v12 = vld [vmem:[%s6567_s30 + $0x25c] sm:$0xf0]  ;;  %v4200_v1 = vld [vmem:[%s6567_s30 + $0x20] sm:$0xf0] }
  0x4a   : > { %v4742_v13 = vld [vmem:[%s6567_s30 + $0x440] sm:$0xf]  ;;  %v4487_v20 = vor.u32 %v6069_v12, %v4486_v10  ;;  %2992 = vmatpush.bf16.msra.mxu0 %v4231_v17  ;;  %v6025_v12 = vld [vmem:[%s6567_s30 + $0x104] sm:$0xf] }
  0x4b   : > { %v6133_v14 = vld [vmem:[%s6567_s30 + $0x45c] sm:$0xf0] }
  0x4c   : > { %v4998_v15 = vld [vmem:[%s6567_s30 + $0x640] sm:$0xf]  ;;  %v4743_v21 = vor.u32 %v6133_v14, %v4742_v13  ;;  %3005 = vmatpush.bf16.msra.mxu1 %v4487_v20  ;;  %v4328_v13 = vld [vmem:[%s6567_s30 + $0x120] sm:$0xf0] }
  0x4d   : > { %v6197_v16 = vld [vmem:[%s6567_s30 + $0x65c] sm:$0xf0] }
  0x4e   : > { %v4198_v18 = vld [vmem:[%s6567_s30] sm:$0xf]  ;;  %v4999_v25 = vor.u32 %v6197_v16, %v4998_v15  ;;  %3018 = vmatpush.bf16.msra.mxu2 %v4743_v21 }
  0x4f   : > { %v5997_v19 = vld [vmem:[%s6567_s30 + $0x1c] sm:$0xf0] }
  0x50   : > { %v4454_v22 = vld [vmem:[%s6567_s30 + $0x200] sm:$0xf]  ;;  %v4199_v32 = vor.u32 %v5997_v19, %v4198_v18  ;;  %3031 = vmatpush.bf16.msra.mxu3 %v4999_v25 }
  0x51   : > { %v6061_v23 = vld [vmem:[%s6567_s30 + $0x21c] sm:$0xf0] }
  0x52   : > { %v4710_v24 = vld [vmem:[%s6567_s30 + $0x400] sm:$0xf]  ;;  %v4455_v36 = vor.u32 %v6061_v23, %v4454_v22  ;;  %2993 = vmatpush.bf16.msra.mxu0 %v4199_v32 }
  0x53   : > { %v6125_v26 = vld [vmem:[%s6567_s30 + $0x41c] sm:$0xf0] }
  0x54   : > { %v4966_v27 = vld [vmem:[%s6567_s30 + $0x600] sm:$0xf]  ;;  %v4711_v37 = vor.u32 %v6125_v26, %v4710_v24  ;;  %3006 = vmatpush.bf16.msra.mxu1 %v4455_v36  ;;  %v4331_v24 = vor.u32 %v6025_v12, %v4328_v13  ;;  %v5448_v12 = vld [vmem:[%s6567_s30 + $0x9e0] sm:$0xf0]  ;;  %v4203_v13 = vor.u32 %v5993_v0, %v4200_v1 }
  0x55   : > { %v6189_v28 = vld [vmem:[%s6567_s30 + $0x61c] sm:$0xf0]  ;;  %v4808_v0 = vld [vmem:[%s6567_s30 + $0x4e0] sm:$0xf0] }
  0x56   : > { %v5446_v29 = vld [vmem:[%s6567_s30 + $0x9c0] sm:$0xf]  ;;  %v4967_v40 = vor.u32 %v6189_v28, %v4966_v27  ;;  %3019 = vmatpush.bf16.msra.mxu2 %v4711_v37  ;;  %v6017_v28 = vld [vmem:[%s6567_s30 + $0xc4] sm:$0xf] }
  0x57   : > { %v6309_v30 = vld [vmem:[%s6567_s30 + $0x9dc] sm:$0xf0]  ;;  %v6209_v1 = vld [vmem:[%s6567_s30 + $0x6c4] sm:$0xf] }
  0x58   : > { %v5702_v31 = vld [vmem:[%s6567_s30 + $0xbc0] sm:$0xf]  ;;  %v5447_v41 = vor.u32 %v6309_v30, %v5446_v29  ;;  %3032 = vmatpush.bf16.msra.mxu3 %v4967_v40  ;;  %v4296_v29 = vld [vmem:[%s6567_s30 + $0xe0] sm:$0xf0] }
  0x59   : > { %v6373_v33 = vld [vmem:[%s6567_s30 + $0xbdc] sm:$0xf0]  ;;  %v4299_v36 = vor.u32 %v6017_v28, %v4296_v29  ;;  %v6009_v40 = vld [vmem:[%s6567_s30 + $0x84] sm:$0xf] }
  0x5a   : > { %v5958_v34 = vld [vmem:[%s6567_s30 + $0xdc0] sm:$0xf]  ;;  %v5703_v42 = vor.u32 %v6373_v33, %v5702_v31  ;;  %3038 = vmatpush.bf16.msrb.mxu0 %v5447_v41  ;;  %v4264_v41 = vld [vmem:[%s6567_s30 + $0xa0] sm:$0xf0] }
  0x5b   : > { %v6437_v35 = vld [vmem:[%s6567_s30 + $0xddc] sm:$0xf0]  ;;  %v6297_v28 = vld [vmem:[%s6567_s30 + $0x984] sm:$0xf] }
  0x5c   : > { %v5959_v43 = vor.u32 %v6437_v35, %v5958_v34  ;;  %v5414_v44 = vld [vmem:[%s6567_s30 + $0x980] sm:$0xf]  ;;  %3051 = vmatpush.bf16.msrb.mxu1 %v5703_v42  ;;  %3077 = vmatpush.bf16.msrb.mxu3 %v4427_v47  ;;  %v5416_v29 = vld [vmem:[%s6567_s30 + $0x9a0] sm:$0xf0] }
  0x5d   : > { %v6301_v45 = vld [vmem:[%s6567_s30 + $0x99c] sm:$0xf0] }
  0x5e   : > { %v5670_v46 = vld [vmem:[%s6567_s30 + $0xb80] sm:$0xf]  ;;  %v5415_v53 = vor.u32 %v6301_v45, %v5414_v44  ;;  %3064 = vmatpush.bf16.msrb.mxu2 %v5959_v43 }
  0x5f   : > { %v6365_v48 = vld [vmem:[%s6567_s30 + $0xb9c] sm:$0xf0] }
  0x60   : > { %v5926_v49 = vld [vmem:[%s6567_s30 + $0xd80] sm:$0xf]  ;;  %v5671_v56 = vor.u32 %v6365_v48, %v5670_v46  ;;  %3039 = vmatpush.bf16.msrb.mxu0 %v5415_v53  ;;  %3078 = vmatpush.bf16.msrb.mxu3 %v4395_v61  ;;  %v4267_v48 = vor.u32 %v6009_v40, %v4264_v41  ;;  %v4232_v53 = vld [vmem:[%s6567_s30 + $0x60] sm:$0xf0] }
  0x61   : > { %v6429_v50 = vld [vmem:[%s6567_s30 + $0xd9c] sm:$0xf0]  ;;  %v4872_v40 = vld [vmem:[%s6567_s30 + $0x560] sm:$0xf0] }
  0x62   : > { %v5382_v54 = vld [vmem:[%s6567_s30 + $0x940] sm:$0xf]  ;;  %v5927_v57 = vor.u32 %v6429_v50, %v5926_v49  ;;  %3052 = vmatpush.bf16.msrb.mxu1 %v5671_v56  ;;  %v6225_v41 = vld [vmem:[%s6567_s30 + $0x744] sm:$0xf] }
  0x63   : > { %v6293_v55 = vld [vmem:[%s6567_s30 + $0x95c] sm:$0xf0] }
  0x64   : > { %v5638_v58 = vld [vmem:[%s6567_s30 + $0xb40] sm:$0xf]  ;;  %v5383_v2 = vor.u32 %v6293_v55, %v5382_v54  ;;  %3065 = vmatpush.bf16.msrb.mxu2 %v5927_v57  ;;  %3079 = vmatpush.bf16.msrb.mxu3 %v4363_v8  ;;  %v5192_v8 = vld [vmem:[%s6567_s30 + $0x7e0] sm:$0xf0] }
  0x65   : > { %v6357_v59 = vld [vmem:[%s6567_s30 + $0xb5c] sm:$0xf0] }
  0x66   : > { %v281_v60 = vld [vmem:[%s260_s26] sm:$0x7f]  ;;  %v5639_v3 = vor.u32 %v6357_v59, %v5638_v58  ;;  %3040 = vmatpush.bf16.msrb.mxu0 %v5383_v2 }
  0x67   : > { %v5894_v62 = vld [vmem:[%s6567_s30 + $0xd40] sm:$0xf]  ;;  %731 = vst [vmem:[#allocation1] ss:$9 sm:$0xff] %v281_v60  ;;  %v6113_v2 = vld [vmem:[%s6567_s30 + $0x3c4] sm:$0xf] }
  0x68   : > { %v6421_v63 = vld [vmem:[%s6567_s30 + $0xd5c] sm:$0xf0]  ;;  %3053 = vmatpush.bf16.msrb.mxu1 %v5639_v3  ;;  %3080 = vmatpush.bf16.msrb.mxu3 %v4331_v24  ;;  %v4680_v3 = vld [vmem:[%s6567_s30 + $0x3e0] sm:$0xf0] }
  0x69   : > { %v5895_v4 = vor.u32 %v6421_v63, %v5894_v62  ;;  %v5350_v5 = vld [vmem:[%s6567_s30 + $0x900] sm:$0xf]  ;;  %v4235_v62 = vor.u32 %v6001_v52, %v4232_v53  ;;  %v4904_v24 = vld [vmem:[%s6567_s30 + $0x5a0] sm:$0xf0] }
  0x6a   : > { %v6285_v6 = vld [vmem:[%s6567_s30 + $0x91c] sm:$0xf0]  ;;  %v4840_v52 = vld [vmem:[%s6567_s30 + $0x520] sm:$0xf0] }
  0x6b   : > { %v5606_v7 = vld [vmem:[%s6567_s30 + $0xb00] sm:$0xf]  ;;  %v5351_v15 = vor.u32 %v6285_v6, %v5350_v5  ;;  %3066 = vmatpush.bf16.msrb.mxu2 %v5895_v4  ;;  %v6177_v4 = vld [vmem:[%s6567_s30 + $0x5c4] sm:$0xf] }
  0x6c   : > { %v6349_v9 = vld [vmem:[%s6567_s30 + $0xb1c] sm:$0xf0]  ;;  %3081 = vmatpush.bf16.msrb.mxu3 %v4299_v36  ;;  %v4936_v6 = vld [vmem:[%s6567_s30 + $0x5e0] sm:$0xf0] }
  0x6d   : > { %v5862_v10 = vld [vmem:[%s6567_s30 + $0xd00] sm:$0xf]  ;;  %v5607_v19 = vor.u32 %v6349_v9, %v5606_v7  ;;  %3041 = vmatpush.bf16.msrb.mxu0 %v5351_v15  ;;  %v6241_v7 = vld [vmem:[%s6567_s30 + $0x7c4] sm:$0xf]  ;;  %v4939_v15 = vor.u32 %v6177_v4, %v4936_v6 }
  0x6e   : > { %v6413_v11 = vld [vmem:[%s6567_s30 + $0xd1c] sm:$0xf0]  ;;  %v6675_v21 = vld [vmem:[#allocation1 + $0x12] sm:$0xff]  ;;  %v6679_v23 = vld [vmem:[#allocation1 + $0x9] sm:$0xff] }
  0x6f   : > { %v5318_v14 = vld [vmem:[%s6567_s30 + $0x8c0] sm:$0xf]  ;;  %v5863_v20 = vor.u32 %v6413_v11, %v5862_v10  ;;  %3020 = vmatmul.bf16.vlgmr.msra.gmra.mxu2 %v6675_v21  ;;  %3007 = vmatmul.bf16.vlgmr.msra.gmra.mxu1 %v6679_v23  ;;  %v6305_v11 = vld [vmem:[%s6567_s30 + $0x9c4] sm:$0xf] }
  0x70   : > { %v6277_v16 = vld [vmem:[%s6567_s30 + $0x8dc] sm:$0xf0]  ;;  %3054 = vmatpush.bf16.msrb.mxu1 %v5607_v19  ;;  %3082 = vmatpush.bf16.msrb.mxu3 %v4267_v48  ;;  %v6169_v19 = vld [vmem:[%s6567_s30 + $0x584] sm:$0xf] }
  0x71   : > { %v5574_v17 = vld [vmem:[%s6567_s30 + $0xac0] sm:$0xf]  ;;  %v5319_v30 = vor.u32 %v6277_v16, %v5318_v14  ;;  %3067 = vmatpush.bf16.msrb.mxu2 %v5863_v20  ;;  %v4683_v14 = vor.u32 %v6113_v2, %v4680_v3  ;;  %v5195_v16 = vor.u32 %v6241_v7, %v5192_v8  ;;  %v5451_v20 = vor.u32 %v6305_v11, %v5448_v12  ;;  %v6097_v36 = vld [vmem:[%s6567_s30 + $0x344] sm:$0xf] }
  0x72   : > { %v6341_v18 = vld [vmem:[%s6567_s30 + $0xadc] sm:$0xf0]  ;;  %v6089_v48 = vld [vmem:[%s6567_s30 + $0x304] sm:$0xf] }
  0x73   : > { %v6677_v22 = vld [vmem:[#allocation1] sm:$0xff]  ;;  %v5575_v31 = vor.u32 %v6341_v18, %v5574_v17  ;;  %3042 = vmatpush.bf16.msrb.mxu0 %v5319_v30  ;;  %v6731_v30 = vld [vmem:[#allocation1 + $0x36] sm:$0xff] }
  0x74   : > { %v5830_v25 = vld [vmem:[%s6567_s30 + $0xcc0] sm:$0xf]  ;;  %2994 = vmatmul.bf16.vlgmr.msra.gmra.mxu0 %v6677_v22  ;;  %3083 = vmatpush.bf16.msrb.mxu3 %v4235_v62  ;;  %v6105_v17 = vld [vmem:[%s6567_s30 + $0x384] sm:$0xf] }
  0x75   : > { %v6405_v26 = vld [vmem:[%s6567_s30 + $0xcdc] sm:$0xf0]  ;;  %3055 = vmatpush.bf16.msrb.mxu1 %v5575_v31  ;;  %v4648_v18 = vld [vmem:[%s6567_s30 + $0x3a0] sm:$0xf0] }
  0x76   : > { %v6684_v27 = vld [vmem:[#allocation1 + $0x1b] sm:$0xff]  ;;  %v5831_v32 = vor.u32 %v6405_v26, %v5830_v25  ;;  %v6233_v25 = vld [vmem:[%s6567_s30 + $0x784] sm:$0xf]  ;;  %v4651_v31 = vor.u32 %v6105_v17, %v4648_v18 }
  0x77   : > { %3033 = vmatmul.bf16.vlgmr.msra.gmra.mxu3 %v6684_v27  ;;  %v5286_v33 = vld [vmem:[%s6567_s30 + $0x880] sm:$0xf]  ;;  %v5160_v26 = vld [vmem:[%s6567_s30 + $0x7a0] sm:$0xf0] }
  0x78   : > { %v6269_v34 = vld [vmem:[%s6567_s30 + $0x89c] sm:$0xf0]  ;;  %3068 = vmatpush.bf16.msrb.mxu2 %v5831_v32  ;;  %3084 = vmatpush.bf16.msrb.mxu3 %v4203_v13  ;;  %v6733_v32 = vld [vmem:[#allocation1 + $0x24] sm:$0xff] }
  0x79   : > { %v5542_v35 = vld [vmem:[%s6567_s30 + $0xa80] sm:$0xf]  ;;  %v5287_v42 = vor.u32 %v6269_v34, %v5286_v33  ;;  %v6735_v33 = vld [vmem:[#allocation1 + $0x2d] sm:$0xff]  ;;  %v4907_v34 = vor.u32 %v6169_v19, %v4904_v24  ;;  %v6217_v53 = vld [vmem:[%s6567_s30 + $0x704] sm:$0xf] }
  0x7a   : > { %v6333_v37 = vld [vmem:[%s6567_s30 + $0xa9c] sm:$0xf0]  ;;  %v6145_v62 = vld [vmem:[%s6567_s30 + $0x4c4] sm:$0xf] }
  0x7b   : > { %v5798_v38 = vld [vmem:[%s6567_s30 + $0xc80] sm:$0xf]  ;;  %v5543_v43 = vor.u32 %v6333_v37, %v5542_v35  ;;  %3043 = vmatpush.bf16.msrb.mxu0 %v5287_v42  ;;  %v5163_v35 = vor.u32 %v6233_v25, %v5160_v26  ;;  %v4616_v37 = vld [vmem:[%s6567_s30 + $0x360] sm:$0xf0]  ;;  %v4811_v6 = vor.u32 %v6145_v62, %v4808_v0 }
  0x7c   : > { %v6397_v39 = vld [vmem:[%s6567_s30 + $0xc9c] sm:$0xf0]  ;;  %3129 = vmatpush.bf16.msra.mxu3 %v5451_v20  ;;  %v5128_v42 = vld [vmem:[%s6567_s30 + $0x760] sm:$0xf0] }
  0x7d   : > { %v5799_v44 = vor.u32 %v6397_v39, %v5798_v38  ;;  %v5254_v45 = vld [vmem:[%s6567_s30 + $0x840] sm:$0xf]  ;;  %3056 = vmatpush.bf16.msrb.mxu1 %v5543_v43  ;;  %v6161_v38 = vld [vmem:[%s6567_s30 + $0x544] sm:$0xf]  ;;  %v5419_v39 = vor.u32 %v6297_v28, %v5416_v29 }
  0x7e   : > { %v6261_v46 = vld [vmem:[%s6567_s30 + $0x85c] sm:$0xf0]  ;;  %v6289_v43 = vld [vmem:[%s6567_s30 + $0x944] sm:$0xf] }
  0x7f   : > { %v5510_v47 = vld [vmem:[%s6567_s30 + $0xa40] sm:$0xf]  ;;  %v5255_v54 = vor.u32 %v6261_v46, %v5254_v45  ;;  %3069 = vmatpush.bf16.msrb.mxu2 %v5799_v44  ;;  %v5384_v44 = vld [vmem:[%s6567_s30 + $0x960] sm:$0xf0]  ;;  %v4619_v45 = vor.u32 %v6097_v36, %v4616_v37  ;;  %v4875_v46 = vor.u32 %v6161_v38, %v4872_v40 }
  0x80   : > { %v6325_v49 = vld [vmem:[%s6567_s30 + $0xa5c] sm:$0xf0]  ;;  %3130 = vmatpush.bf16.msra.mxu3 %v5419_v39  ;;  %v5064_v2 = vld [vmem:[%s6567_s30 + $0x6e0] sm:$0xf0] }
  0x81   : > { %v5766_v50 = vld [vmem:[%s6567_s30 + $0xc40] sm:$0xf]  ;;  %v5511_v57 = vor.u32 %v6325_v49, %v5510_v47  ;;  %3044 = vmatpush.bf16.msrb.mxu0 %v5255_v54  ;;  %v5131_v47 = vor.u32 %v6225_v41, %v5128_v42  ;;  %v4584_v49 = vld [vmem:[%s6567_s30 + $0x320] sm:$0xf0]  ;;  %v5067_v7 = vor.u32 %v6209_v1, %v5064_v2 }
  0x82   : > { %v6389_v51 = vld [vmem:[%s6567_s30 + $0xc5c] sm:$0xf0]  ;;  %v5096_v54 = vld [vmem:[%s6567_s30 + $0x720] sm:$0xf0] }
  0x83   : > { %v5222_v55 = vld [vmem:[%s6567_s30 + $0x800] sm:$0xf]  ;;  %v5767_v58 = vor.u32 %v6389_v51, %v5766_v50  ;;  %3057 = vmatpush.bf16.msrb.mxu1 %v5511_v57  ;;  %v6153_v50 = vld [vmem:[%s6567_s30 + $0x504] sm:$0xf]  ;;  %v5387_v51 = vor.u32 %v6289_v43, %v5384_v44  ;;  %v4587_v57 = vor.u32 %v6089_v48, %v4584_v49 }
  0x84   : > { %v6253_v56 = vld [vmem:[%s6567_s30 + $0x81c] sm:$0xf0]  ;;  %v6273_v3 = vld [vmem:[%s6567_s30 + $0x8c4] sm:$0xf] }
  0x85   : > { %v5478_v59 = vld [vmem:[%s6567_s30 + $0xa00] sm:$0xf]  ;;  %v5223_v5 = vor.u32 %v6253_v56, %v5222_v55  ;;  %3070 = vmatpush.bf16.msrb.mxu2 %v5767_v58  ;;  %v6281_v55 = vld [vmem:[%s6567_s30 + $0x904] sm:$0xf]  ;;  %v4843_v58 = vor.u32 %v6153_v50, %v4840_v52  ;;  %3131 = vmatpush.bf16.msra.mxu3 %v5387_v51 }
  0x86   : > { %v6317_v60 = vld [vmem:[%s6567_s30 + $0xa1c] sm:$0xf0]  ;;  %v5352_v56 = vld [vmem:[%s6567_s30 + $0x920] sm:$0xf0] }
  0x87   : > { %v5734_v61 = vld [vmem:[%s6567_s30 + $0xc00] sm:$0xf]  ;;  %v5479_v9 = vor.u32 %v6317_v60, %v5478_v59  ;;  %3045 = vmatpush.bf16.msrb.mxu0 %v5223_v5  ;;  %3085 = vmatmul.bf16.vlgmr.msrb.gmra.mxu3 %v6677_v22  ;;  %v5099_v59 = vor.u32 %v6217_v53, %v5096_v54  ;;  %v6081_v60 = vld [vmem:[%s6567_s30 + $0x2c4] sm:$0xf]  ;;  %v4430_v53 = vld [vmem:[%s6567_s30 + $0x1c8] sm:$0xf] }
  0x88   : > { %v6381_v63 = vld [vmem:[%s6567_s30 + $0xc1c] sm:$0xf0]  ;;  %v5320_v4 = vld [vmem:[%s6567_s30 + $0x8e0] sm:$0xf0]  ;;  %v6054_v54 = vld [vmem:[%s6567_s30 + $0x1e4] sm:$0xf0] }
  0x89   : > { %v5735_v10 = vor.u32 %v6381_v63, %v5734_v61  ;;  %3058 = vmatpush.bf16.msrb.mxu1 %v5479_v9  ;;  %v4552_v61 = vld [vmem:[%s6567_s30 + $0x2e0] sm:$0xf0]  ;;  %v5355_v63 = vor.u32 %v6281_v55, %v5352_v56  ;;  %v5323_v11 = vor.u32 %v6273_v3, %v5320_v4  ;;  %v4431_v62 = vor.u32 %v6054_v54, %v4430_v53  ;;  %v4398_v4 = vld [vmem:[%s6567_s30 + $0x188] sm:$0xf] }
  0x8a   : > { %3046 = vmatmul.bf16.vlgmr.msrb.gmra.mxu0 %v6733_v32  ;;  %v4555_v5 = vor.u32 %v6081_v60, %v4552_v61  ;;  %v6073_v8 = vld [vmem:[%s6567_s30 + $0x284] sm:$0xf] }
  0x8b   : > { %3071 = vmatpush.bf16.msrb.mxu2 %v5735_v10  ;;  %3090 = vmatpush.bf16.msra.mxu0 %v4683_v14  ;;  %v4520_v9 = vld [vmem:[%s6567_s30 + $0x2a0] sm:$0xf0] }
  0x8c   : > { %3059 = vmatmul.bf16.vlgmr.msrb.gmra.mxu1 %v6735_v33  ;;  %v6137_v10 = vld [vmem:[%s6567_s30 + $0x484] sm:$0xf]  ;;  %3132 = vmatpush.bf16.msra.mxu3 %v5355_v63  ;;  %v4523_v17 = vor.u32 %v6073_v8, %v4520_v9 }
  0x8d   : > { %3103 = vmatpush.bf16.msra.mxu1 %v4939_v15  ;;  %v4776_v12 = vld [vmem:[%s6567_s30 + $0x4a0] sm:$0xf0] }
  0x8e   : > { %3072 = vmatmul.bf16.vlgmr.msrb.gmra.mxu2 %v6731_v30  ;;  %v6201_v13 = vld [vmem:[%s6567_s30 + $0x684] sm:$0xf]  ;;  %v4779_v18 = vor.u32 %v6137_v10, %v4776_v12 }
  0x8f   : > { %3116 = vmatpush.bf16.msra.mxu2 %v5195_v16  ;;  %3091 = vmatpush.bf16.msra.mxu0 %v4651_v31  ;;  %v5032_v14 = vld [vmem:[%s6567_s30 + $0x6a0] sm:$0xf0] }
  0x90   : > { %v6265_v15 = vld [vmem:[%s6567_s30 + $0x884] sm:$0xf]  ;;  %v5035_v19 = vor.u32 %v6201_v13, %v5032_v14  ;;  %3133 = vmatpush.bf16.msra.mxu3 %v5323_v11 }
  0x91   : > { %3104 = vmatpush.bf16.msra.mxu1 %v4907_v34  ;;  %v5288_v16 = vld [vmem:[%s6567_s30 + $0x8a0] sm:$0xf0] }
  0x92   : > { %v6065_v20 = vld [vmem:[%s6567_s30 + $0x244] sm:$0xf]  ;;  %v5291_v26 = vor.u32 %v6265_v15, %v5288_v16  ;;  %v4366_v16 = vld [vmem:[%s6567_s30 + $0x148] sm:$0xf] }
  0x93   : > { %3117 = vmatpush.bf16.msra.mxu2 %v5163_v35  ;;  %3092 = vmatpush.bf16.msra.mxu0 %v4619_v45  ;;  %v4488_v24 = vld [vmem:[%s6567_s30 + $0x260] sm:$0xf0] }
  0x94   : > { %v6129_v25 = vld [vmem:[%s6567_s30 + $0x444] sm:$0xf]  ;;  %v4491_v36 = vor.u32 %v6065_v20, %v4488_v24  ;;  %3134 = vmatpush.bf16.msra.mxu3 %v5291_v26 }
  0x95   : > { %3105 = vmatpush.bf16.msra.mxu1 %v4875_v46  ;;  %v4744_v28 = vld [vmem:[%s6567_s30 + $0x460] sm:$0xf0] }
  0x96   : > { %v6193_v29 = vld [vmem:[%s6567_s30 + $0x644] sm:$0xf]  ;;  %v4747_v39 = vor.u32 %v6129_v25, %v4744_v28 }
  0x97   : > { %3118 = vmatpush.bf16.msra.mxu2 %v5131_v47  ;;  %3093 = vmatpush.bf16.msra.mxu0 %v4587_v57  ;;  %v5000_v31 = vld [vmem:[%s6567_s30 + $0x660] sm:$0xf0]  ;;  %v4686_v57 = vld [vmem:[%s6567_s30 + $0x3c8] sm:$0xf] }
  0x98   : > { %v6257_v34 = vld [vmem:[%s6567_s30 + $0x844] sm:$0xf]  ;;  %v5003_v40 = vor.u32 %v6193_v29, %v5000_v31 }
  0x99   : > { %3106 = vmatpush.bf16.msra.mxu1 %v4843_v58  ;;  %v5256_v35 = vld [vmem:[%s6567_s30 + $0x860] sm:$0xf0]  ;;  %v6118_v58 = vld [vmem:[%s6567_s30 + $0x3e4] sm:$0xf0] }
  0x9a   : > { %v6057_v37 = vld [vmem:[%s6567_s30 + $0x204] sm:$0xf]  ;;  %v5259_v44 = vor.u32 %v6257_v34, %v5256_v35  ;;  %v4687_v2 = vor.u32 %v6118_v58, %v4686_v57  ;;  %v4334_v35 = vld [vmem:[%s6567_s30 + $0x108] sm:$0xf] }
  0x9b   : > { %3119 = vmatpush.bf16.msra.mxu2 %v5099_v59  ;;  %3094 = vmatpush.bf16.msra.mxu0 %v4555_v5  ;;  %v4456_v38 = vld [vmem:[%s6567_s30 + $0x220] sm:$0xf0]  ;;  %v6046_v5 = vld [vmem:[%s6567_s30 + $0x1a4] sm:$0xf0] }
  0x9c   : > { %v6121_v41 = vld [vmem:[%s6567_s30 + $0x404] sm:$0xf]  ;;  %v4459_v51 = vor.u32 %v6057_v37, %v4456_v38  ;;  %3135 = vmatpush.bf16.msra.mxu3 %v5259_v44  ;;  %v4399_v10 = vor.u32 %v6046_v5, %v4398_v4  ;;  %v4590_v37 = vld [vmem:[%s6567_s30 + $0x308] sm:$0xf] }
  0x9d   : > { %3107 = vmatpush.bf16.msra.mxu1 %v4811_v6  ;;  %v4712_v42 = vld [vmem:[%s6567_s30 + $0x420] sm:$0xf0]  ;;  %v4654_v6 = vld [vmem:[%s6567_s30 + $0x388] sm:$0xf] }
  0x9e   : > { %v6185_v43 = vld [vmem:[%s6567_s30 + $0x604] sm:$0xf]  ;;  %v4715_v55 = vor.u32 %v6121_v41, %v4712_v42  ;;  %v6094_v38 = vld [vmem:[%s6567_s30 + $0x324] sm:$0xf0] }
  0x9f   : > { %3120 = vmatpush.bf16.msra.mxu2 %v5067_v7  ;;  %3095 = vmatpush.bf16.msra.mxu0 %v4523_v17  ;;  %v4968_v45 = vld [vmem:[%s6567_s30 + $0x620] sm:$0xf0]  ;;  %v6110_v7 = vld [vmem:[%s6567_s30 + $0x3a4] sm:$0xf0] }
  0xa0   : > { %v6249_v46 = vld [vmem:[%s6567_s30 + $0x804] sm:$0xf]  ;;  %v4971_v56 = vor.u32 %v6185_v43, %v4968_v45  ;;  %v4655_v14 = vor.u32 %v6110_v7, %v4654_v6  ;;  %v6038_v17 = vld [vmem:[%s6567_s30 + $0x164] sm:$0xf0]  ;;  %v4591_v45 = vor.u32 %v6094_v38, %v4590_v37 }
  0xa1   : > { %3108 = vmatpush.bf16.msra.mxu1 %v4779_v18  ;;  %v5224_v47 = vld [vmem:[%s6567_s30 + $0x820] sm:$0xf0]  ;;  %v4622_v18 = vld [vmem:[%s6567_s30 + $0x348] sm:$0xf]  ;;  %v4367_v25 = vor.u32 %v6038_v17, %v4366_v16 }
  0xa2   : > { %v6369_v48 = vld [vmem:[%s6567_s30 + $0xbc4] sm:$0xf]  ;;  %v5227_v59 = vor.u32 %v6249_v46, %v5224_v47  ;;  %v4302_v47 = vld [vmem:[%s6567_s30 + $0xc8] sm:$0xf] }
  0xa3   : > { %3121 = vmatpush.bf16.msra.mxu2 %v5035_v19  ;;  %v5704_v49 = vld [vmem:[%s6567_s30 + $0xbe0] sm:$0xf0]  ;;  %3096 = vmatpush.bf16.msra.mxu0 %v4491_v36  ;;  %v6102_v19 = vld [vmem:[%s6567_s30 + $0x364] sm:$0xf0] }
  0xa4   : > { %v6433_v50 = vld [vmem:[%s6567_s30 + $0xdc4] sm:$0xf]  ;;  %v5707_v60 = vor.u32 %v6369_v48, %v5704_v49  ;;  %3136 = vmatpush.bf16.msra.mxu3 %v5227_v59  ;;  %v4623_v31 = vor.u32 %v6102_v19, %v4622_v18  ;;  %v6030_v36 = vld [vmem:[%s6567_s30 + $0x124] sm:$0xf0] }
  0xa5   : > { %v5960_v52 = vld [vmem:[%s6567_s30 + $0xde0] sm:$0xf0]  ;;  %3109 = vmatpush.bf16.msra.mxu1 %v4747_v39  ;;  %v4335_v41 = vor.u32 %v6030_v36, %v4334_v35  ;;  %v6022_v48 = vld [vmem:[%s6567_s30 + $0xe4] sm:$0xf0] }
  0xa6   : > { %v5963_v61 = vor.u32 %v6433_v50, %v5960_v52  ;;  %v6361_v63 = vld [vmem:[%s6567_s30 + $0xb84] sm:$0xf]  ;;  %v4558_v49 = vld [vmem:[%s6567_s30 + $0x2c8] sm:$0xf]  ;;  %v4303_v53 = vor.u32 %v6022_v48, %v4302_v47 }
  0xa7   : > { %3122 = vmatpush.bf16.msra.mxu2 %v5003_v40  ;;  %v5672_v0 = vld [vmem:[%s6567_s30 + $0xba0] sm:$0xf0]  ;;  %3097 = vmatpush.bf16.msra.mxu0 %v4459_v51  ;;  %v6086_v50 = vld [vmem:[%s6567_s30 + $0x2e4] sm:$0xf0] }
  0xa8   : > { %v6425_v1 = vld [vmem:[%s6567_s30 + $0xd84] sm:$0xf]  ;;  %v5675_v8 = vor.u32 %v6361_v63, %v5672_v0  ;;  %3181 = vmatpush.bf16.msrb.mxu3 %v4687_v2  ;;  %v4559_v57 = vor.u32 %v6086_v50, %v4558_v49  ;;  %v4270_v59 = vld [vmem:[%s6567_s30 + $0x88] sm:$0xf] }
  0xa9   : > { %v5928_v3 = vld [vmem:[%s6567_s30 + $0xda0] sm:$0xf0]  ;;  %3110 = vmatpush.bf16.msra.mxu1 %v4715_v55  ;;  %3137 = vmatmul.bf16.vlgmr.msra.gmra.mxu3 %v6733_v32  ;;  %v4238_v7 = vld [vmem:[%s6567_s30 + $0x48] sm:$0xf] }
  0xaa   : > { %v5931_v9 = vor.u32 %v6425_v1, %v5928_v3  ;;  %v6353_v11 = vld [vmem:[%s6567_s30 + $0xb44] sm:$0xf]  ;;  %3098 = vmatmul.bf16.vlgmr.msra.gmra.mxu0 %v6679_v23  ;;  %v4206_v18 = vld [vmem:[%s6567_s30 + $0x8] sm:$0xf] }
  0xab   : > { %3123 = vmatpush.bf16.msra.mxu2 %v4971_v56  ;;  %3142 = vmatpush.bf16.msrb.mxu0 %v5707_v60  ;;  %v5640_v12 = vld [vmem:[%s6567_s30 + $0xb60] sm:$0xf0]  ;;  %v6014_v60 = vld [vmem:[%s6567_s30 + $0xa4] sm:$0xf0] }
  0xac   : > { %v6417_v13 = vld [vmem:[%s6567_s30 + $0xd44] sm:$0xf]  ;;  %v5643_v20 = vor.u32 %v6353_v11, %v5640_v12  ;;  %3111 = vmatmul.bf16.vlgmr.msra.gmra.mxu1 %v6675_v21  ;;  %3182 = vmatpush.bf16.msrb.mxu3 %v4655_v14  ;;  %v4271_v1 = vor.u32 %v6014_v60, %v4270_v59  ;;  %v5454_v35 = vld [vmem:[%s6567_s30 + $0x9c8] sm:$0xf] }
  0xad   : > { %3155 = vmatpush.bf16.msrb.mxu1 %v5963_v61  ;;  %v5896_v15 = vld [vmem:[%s6567_s30 + $0xd60] sm:$0xf0]  ;;  %v4526_v61 = vld [vmem:[%s6567_s30 + $0x288] sm:$0xf] }
  0xae   : > { %3124 = vmatmul.bf16.vlgmr.msra.gmra.mxu2 %v6684_v27  ;;  %v5899_v24 = vor.u32 %v6417_v13, %v5896_v15  ;;  %v6345_v26 = vld [vmem:[%s6567_s30 + $0xb04] sm:$0xf]  ;;  %v6310_v36 = vld [vmem:[%s6567_s30 + $0x9e4] sm:$0xf0] }
  0xaf   : > { %3168 = vmatpush.bf16.msrb.mxu2 %v4431_v62  ;;  %3143 = vmatpush.bf16.msrb.mxu0 %v5675_v8  ;;  %v5608_v28 = vld [vmem:[%s6567_s30 + $0xb20] sm:$0xf0]  ;;  %v6078_v62 = vld [vmem:[%s6567_s30 + $0x2a4] sm:$0xf0] }
  0xb0   : > { %v6409_v29 = vld [vmem:[%s6567_s30 + $0xd04] sm:$0xf]  ;;  %v5611_v39 = vor.u32 %v6345_v26, %v5608_v28  ;;  %3183 = vmatpush.bf16.msrb.mxu3 %v4623_v31  ;;  %v4527_v5 = vor.u32 %v6078_v62, %v4526_v61  ;;  %v6006_v8 = vld [vmem:[%s6567_s30 + $0x64] sm:$0xf0] }
  0xb1   : > { %3156 = vmatpush.bf16.msrb.mxu1 %v5931_v9  ;;  %v5864_v34 = vld [vmem:[%s6567_s30 + $0xd20] sm:$0xf0]  ;;  %v4494_v9 = vld [vmem:[%s6567_s30 + $0x248] sm:$0xf]  ;;  %v4239_v15 = vor.u32 %v6006_v8, %v4238_v7 }
  0xb2   : > { %v5867_v40 = vor.u32 %v6409_v29, %v5864_v34  ;;  %v6337_v42 = vld [vmem:[%s6567_s30 + $0xac4] sm:$0xf]  ;;  %v4942_v26 = vld [vmem:[%s6567_s30 + $0x5c8] sm:$0xf] }
  0xb3   : > { %3169 = vmatpush.bf16.msrb.mxu2 %v4399_v10  ;;  %3144 = vmatpush.bf16.msrb.mxu0 %v5643_v20  ;;  %v5576_v43 = vld [vmem:[%s6567_s30 + $0xae0] sm:$0xf0]  ;;  %v6070_v10 = vld [vmem:[%s6567_s30 + $0x264] sm:$0xf0] }
  0xb4   : > { %v6401_v44 = vld [vmem:[%s6567_s30 + $0xcc4] sm:$0xf]  ;;  %v5579_v51 = vor.u32 %v6337_v42, %v5576_v43  ;;  %3184 = vmatpush.bf16.msrb.mxu3 %v4591_v45  ;;  %v4495_v19 = vor.u32 %v6070_v10, %v4494_v9  ;;  %v5998_v20 = vld [vmem:[%s6567_s30 + $0x24] sm:$0xf0] }
  0xb5   : > { %3157 = vmatpush.bf16.msrb.mxu1 %v5899_v24  ;;  %v5832_v46 = vld [vmem:[%s6567_s30 + $0xce0] sm:$0xf0]  ;;  %v4462_v24 = vld [vmem:[%s6567_s30 + $0x208] sm:$0xf]  ;;  %v4207_v38 = vor.u32 %v5998_v20, %v4206_v18 }
  0xb6   : > { %v5835_v52 = vor.u32 %v6401_v44, %v5832_v46  ;;  %v6329_v54 = vld [vmem:[%s6567_s30 + $0xa84] sm:$0xf]  ;;  %v6182_v28 = vld [vmem:[%s6567_s30 + $0x5e4] sm:$0xf0]  ;;  %v5455_v44 = vor.u32 %v6310_v36, %v5454_v35 }
  0xb7   : > { %3170 = vmatpush.bf16.msrb.mxu2 %v4367_v25  ;;  %3145 = vmatpush.bf16.msrb.mxu0 %v5611_v39  ;;  %v5544_v55 = vld [vmem:[%s6567_s30 + $0xaa0] sm:$0xf0]  ;;  %v6062_v25 = vld [vmem:[%s6567_s30 + $0x224] sm:$0xf0]  ;;  %v4943_v42 = vor.u32 %v6182_v28, %v4942_v26 }
  0xb8   : > { %v6393_v56 = vld [vmem:[%s6567_s30 + $0xc84] sm:$0xf]  ;;  %v5547_v63 = vor.u32 %v6329_v54, %v5544_v55  ;;  %3185 = vmatpush.bf16.msrb.mxu3 %v4559_v57  ;;  %v5198_v29 = vld [vmem:[%s6567_s30 + $0x7c8] sm:$0xf] }
  0xb9   : > { %3158 = vmatpush.bf16.msrb.mxu1 %v5867_v40  ;;  %v5800_v58 = vld [vmem:[%s6567_s30 + $0xca0] sm:$0xf0]  ;;  %v6246_v34 = vld [vmem:[%s6567_s30 + $0x7e4] sm:$0xf0] }
  0xba   : > { %v5803_v0 = vor.u32 %v6393_v56, %v5800_v58  ;;  %v6321_v2 = vld [vmem:[%s6567_s30 + $0xa44] sm:$0xf]  ;;  %v5710_v39 = vld [vmem:[%s6567_s30 + $0xbc8] sm:$0xf]  ;;  %v5199_v43 = vor.u32 %v6246_v34, %v5198_v29 }
  0xbb   : > { %3171 = vmatpush.bf16.msrb.mxu2 %v4335_v41  ;;  %3146 = vmatpush.bf16.msrb.mxu0 %v5579_v51  ;;  %v5512_v3 = vld [vmem:[%s6567_s30 + $0xa60] sm:$0xf0]  ;;  %v6374_v40 = vld [vmem:[%s6567_s30 + $0xbe4] sm:$0xf0]  ;;  %v4463_v41 = vor.u32 %v6062_v25, %v4462_v24 }
  0xbc   : > { %v6385_v4 = vld [vmem:[%s6567_s30 + $0xc44] sm:$0xf]  ;;  %v5515_v11 = vor.u32 %v6321_v2, %v5512_v3  ;;  %3186 = vmatpush.bf16.msrb.mxu3 %v4527_v5  ;;  %v4910_v45 = vld [vmem:[%s6567_s30 + $0x588] sm:$0xf]  ;;  %v5711_v48 = vor.u32 %v6374_v40, %v5710_v39 }
  0xbd   : > { %3159 = vmatpush.bf16.msrb.mxu1 %v5835_v52  ;;  %v5768_v6 = vld [vmem:[%s6567_s30 + $0xc60] sm:$0xf0]  ;;  %v6174_v46 = vld [vmem:[%s6567_s30 + $0x5a4] sm:$0xf0] }
  0xbe   : > { %v6313_v12 = vld [vmem:[%s6567_s30 + $0xa04] sm:$0xf]  ;;  %v5771_v14 = vor.u32 %v6385_v4, %v5768_v6  ;;  %v5166_v47 = vld [vmem:[%s6567_s30 + $0x788] sm:$0xf]  ;;  %v4911_v54 = vor.u32 %v6174_v46, %v4910_v45 }
  0xbf   : > { %3172 = vmatpush.bf16.msrb.mxu2 %v4303_v53  ;;  %3147 = vmatpush.bf16.msrb.mxu0 %v5547_v63  ;;  %v5480_v13 = vld [vmem:[%s6567_s30 + $0xa20] sm:$0xf0]  ;;  %v6238_v49 = vld [vmem:[%s6567_s30 + $0x7a4] sm:$0xf0] }
  0xc0   : > { %v6377_v16 = vld [vmem:[%s6567_s30 + $0xc04] sm:$0xf]  ;;  %v5483_v31 = vor.u32 %v6313_v12, %v5480_v13  ;;  %3187 = vmatpush.bf16.msrb.mxu3 %v4495_v19  ;;  %v5422_v50 = vld [vmem:[%s6567_s30 + $0x988] sm:$0xf]  ;;  %v5167_v55 = vor.u32 %v6238_v49, %v5166_v47 }
  0xc1   : > { %3160 = vmatpush.bf16.msrb.mxu1 %v5803_v0  ;;  %v5736_v17 = vld [vmem:[%s6567_s30 + $0xc20] sm:$0xf0]  ;;  %v6302_v51 = vld [vmem:[%s6567_s30 + $0x9a4] sm:$0xf0] }
  0xc2   : > { %v5739_v37 = vor.u32 %v6377_v16, %v5736_v17  ;;  %v5678_v52 = vld [vmem:[%s6567_s30 + $0xb88] sm:$0xf]  ;;  %v5423_v56 = vor.u32 %v6302_v51, %v5422_v50 }
  0xc3   : > { %3173 = vmatpush.bf16.msrb.mxu2 %v4271_v1  ;;  %3148 = vmatpush.bf16.msrb.mxu0 %v5515_v11  ;;  %v6366_v53 = vld [vmem:[%s6567_s30 + $0xba4] sm:$0xf0] }
  0xc4   : > { %3188 = vmatpush.bf16.msrb.mxu3 %v4463_v41  ;;  %v4878_v57 = vld [vmem:[%s6567_s30 + $0x548] sm:$0xf]  ;;  %v5679_v60 = vor.u32 %v6366_v53, %v5678_v52 }
  0xc5   : > { %3161 = vmatpush.bf16.msrb.mxu1 %v5771_v14  ;;  %v6166_v58 = vld [vmem:[%s6567_s30 + $0x564] sm:$0xf0] }
  0xc6   : > { %v5134_v59 = vld [vmem:[%s6567_s30 + $0x748] sm:$0xf]  ;;  %v4879_v2 = vor.u32 %v6166_v58, %v4878_v57 }
  0xc7   : > { %3174 = vmatpush.bf16.msrb.mxu2 %v4239_v15  ;;  %3149 = vmatpush.bf16.msrb.mxu0 %v5483_v31  ;;  %v6230_v61 = vld [vmem:[%s6567_s30 + $0x764] sm:$0xf0] }
  0xc8   : > { %3233 = vmatpush.bf16.msra.mxu3 %v5711_v48  ;;  %v5390_v62 = vld [vmem:[%s6567_s30 + $0x948] sm:$0xf]  ;;  %v5135_v3 = vor.u32 %v6230_v61, %v5134_v59 }
  0xc9   : > { %3162 = vmatpush.bf16.msrb.mxu1 %v5739_v37  ;;  %v6294_v63 = vld [vmem:[%s6567_s30 + $0x964] sm:$0xf0]  ;;  %3189 = vmatmul.bf16.vlgmr.msrb.gmra.mxu3 %v6679_v23 }
  0xca   : > { %3150 = vmatmul.bf16.vlgmr.msrb.gmra.mxu0 %v6735_v33  ;;  %v5646_v0 = vld [vmem:[%s6567_s30 + $0xb48] sm:$0xf]  ;;  %v5391_v4 = vor.u32 %v6294_v63, %v5390_v62 }
  0xcb   : > { %3175 = vmatpush.bf16.msrb.mxu2 %v4207_v38  ;;  %3194 = vmatpush.bf16.msra.mxu0 %v4943_v42  ;;  %v6358_v1 = vld [vmem:[%s6567_s30 + $0xb64] sm:$0xf0] }
  0xcc   : > { %3163 = vmatmul.bf16.vlgmr.msrb.gmra.mxu1 %v6731_v30  ;;  %v4846_v5 = vld [vmem:[%s6567_s30 + $0x508] sm:$0xf]  ;;  %3234 = vmatpush.bf16.msra.mxu3 %v5679_v60  ;;  %v5647_v7 = vor.u32 %v6358_v1, %v5646_v0 }
  0xcd   : > { %3207 = vmatpush.bf16.msra.mxu1 %v5199_v43  ;;  %v6158_v30 = vld [vmem:[%s6567_s30 + $0x524] sm:$0xf0] }
  0xce   : > { %3176 = vmatmul.bf16.vlgmr.msrb.gmra.mxu2 %v6677_v22  ;;  %v5102_v6 = vld [vmem:[%s6567_s30 + $0x708] sm:$0xf]  ;;  %v4847_v11 = vor.u32 %v6158_v30, %v4846_v5  ;;  %v4432_v30 = vld [vmem:[%s6567_s30 + $0x1e8] sm:$0xf0] }
  0xcf   : > { %3220 = vmatpush.bf16.msra.mxu2 %v5455_v44  ;;  %3195 = vmatpush.bf16.msra.mxu0 %v4911_v54  ;;  %v6222_v8 = vld [vmem:[%s6567_s30 + $0x724] sm:$0xf0] }
  0xd0   : > { %v5358_v22 = vld [vmem:[%s6567_s30 + $0x908] sm:$0xf]  ;;  %v5103_v12 = vor.u32 %v6222_v8, %v5102_v6  ;;  %3235 = vmatpush.bf16.msra.mxu3 %v5647_v7  ;;  %v6114_v6 = vld [vmem:[%s6567_s30 + $0x3cc] sm:$0xf] }
  0xd1   : > { %3208 = vmatpush.bf16.msra.mxu1 %v5167_v55  ;;  %v6286_v9 = vld [vmem:[%s6567_s30 + $0x924] sm:$0xf0]  ;;  %v4688_v7 = vld [vmem:[%s6567_s30 + $0x3e8] sm:$0xf0] }
  0xd2   : > { %v5614_v10 = vld [vmem:[%s6567_s30 + $0xb08] sm:$0xf]  ;;  %v5359_v13 = vor.u32 %v6286_v9, %v5358_v22  ;;  %v6178_v9 = vld [vmem:[%s6567_s30 + $0x5cc] sm:$0xf] }
  0xd3   : > { %3221 = vmatpush.bf16.msra.mxu2 %v5423_v56  ;;  %v6350_v23 = vld [vmem:[%s6567_s30 + $0xb24] sm:$0xf0]  ;;  %3196 = vmatpush.bf16.msra.mxu0 %v4879_v2 }
  0xd4   : > { %v4814_v14 = vld [vmem:[%s6567_s30 + $0x4c8] sm:$0xf]  ;;  %v5615_v17 = vor.u32 %v6350_v23, %v5614_v10  ;;  %v4944_v10 = vld [vmem:[%s6567_s30 + $0x5e8] sm:$0xf0] }
  0xd5   : > { %3209 = vmatpush.bf16.msra.mxu1 %v5135_v3  ;;  %v6150_v15 = vld [vmem:[%s6567_s30 + $0x4e4] sm:$0xf0] }
  0xd6   : > { %v5070_v16 = vld [vmem:[%s6567_s30 + $0x6c8] sm:$0xf]  ;;  %v4815_v26 = vor.u32 %v6150_v15, %v4814_v14  ;;  %3236 = vmatpush.bf16.msra.mxu3 %v5615_v17  ;;  %v4947_v17 = vor.u32 %v6178_v9, %v4944_v10 }
  0xd7   : > { %3222 = vmatpush.bf16.msra.mxu2 %v5391_v4  ;;  %v6214_v18 = vld [vmem:[%s6567_s30 + $0x6e4] sm:$0xf0]  ;;  %3197 = vmatpush.bf16.msra.mxu0 %v4847_v11  ;;  %v6050_v4 = vld [vmem:[%s6567_s30 + $0x1cc] sm:$0xf] }
  0xd8   : > { %v5326_v19 = vld [vmem:[%s6567_s30 + $0x8c8] sm:$0xf]  ;;  %v5071_v28 = vor.u32 %v6214_v18, %v5070_v16  ;;  %v6042_v16 = vld [vmem:[%s6567_s30 + $0x18c] sm:$0xf] }
  0xd9   : > { %v6278_v20 = vld [vmem:[%s6567_s30 + $0x8e4] sm:$0xf0]  ;;  %3210 = vmatpush.bf16.msra.mxu1 %v5103_v12  ;;  %v4435_v12 = vor.u32 %v6050_v4, %v4432_v30  ;;  %v4400_v18 = vld [vmem:[%s6567_s30 + $0x1a8] sm:$0xf0] }
  0xda   : > { %v5582_v24 = vld [vmem:[%s6567_s30 + $0xac8] sm:$0xf]  ;;  %v5327_v29 = vor.u32 %v6278_v20, %v5326_v19  ;;  %v6106_v19 = vld [vmem:[%s6567_s30 + $0x38c] sm:$0xf] }
  0xdb   : > { %v6342_v25 = vld [vmem:[%s6567_s30 + $0xae4] sm:$0xf0]  ;;  %3223 = vmatpush.bf16.msra.mxu2 %v5359_v13  ;;  %3198 = vmatpush.bf16.msra.mxu0 %v4815_v26  ;;  %v4691_v13 = vor.u32 %v6114_v6, %v4688_v7  ;;  %v4656_v20 = vld [vmem:[%s6567_s30 + $0x3a8] sm:$0xf0] }
  0xdc   : > { %v4782_v31 = vld [vmem:[%s6567_s30 + $0x488] sm:$0xf]  ;;  %v5583_v36 = vor.u32 %v6342_v25, %v5582_v24  ;;  %v6170_v24 = vld [vmem:[%s6567_s30 + $0x58c] sm:$0xf] }
  0xdd   : > { %v6142_v34 = vld [vmem:[%s6567_s30 + $0x4a4] sm:$0xf0]  ;;  %3211 = vmatpush.bf16.msra.mxu1 %v5071_v28  ;;  %v4912_v25 = vld [vmem:[%s6567_s30 + $0x5a8] sm:$0xf0]  ;;  %v4403_v28 = vor.u32 %v6042_v16, %v4400_v18 }
  0xde   : > { %v5038_v35 = vld [vmem:[%s6567_s30 + $0x688] sm:$0xf]  ;;  %v4783_v42 = vor.u32 %v6142_v34, %v4782_v31  ;;  %3237 = vmatpush.bf16.msra.mxu3 %v5583_v36  ;;  %v4915_v36 = vor.u32 %v6170_v24, %v4912_v25  ;;  %v6074_v30 = vld [vmem:[%s6567_s30 + $0x28c] sm:$0xf] }
  0xdf   : > { %v6206_v37 = vld [vmem:[%s6567_s30 + $0x6a4] sm:$0xf0]  ;;  %3224 = vmatpush.bf16.msra.mxu2 %v5327_v29  ;;  %v4659_v29 = vor.u32 %v6106_v19, %v4656_v20  ;;  %v4528_v6 = vld [vmem:[%s6567_s30 + $0x2a8] sm:$0xf0] }
  0xe0   : > { %v5294_v38 = vld [vmem:[%s6567_s30 + $0x888] sm:$0xf]  ;;  %v5039_v43 = vor.u32 %v6206_v37, %v5038_v35  ;;  %3199 = vmatpush.bf16.msra.mxu0 %v4783_v42  ;;  %v6034_v35 = vld [vmem:[%s6567_s30 + $0x14c] sm:$0xf] }
  0xe1   : > { %v6270_v39 = vld [vmem:[%s6567_s30 + $0x8a4] sm:$0xf0]  ;;  %v4368_v37 = vld [vmem:[%s6567_s30 + $0x168] sm:$0xf0] }
  0xe2   : > { %v5550_v40 = vld [vmem:[%s6567_s30 + $0xa88] sm:$0xf]  ;;  %v5295_v44 = vor.u32 %v6270_v39, %v5294_v38  ;;  %3212 = vmatpush.bf16.msra.mxu1 %v5039_v43  ;;  %v6098_v38 = vld [vmem:[%s6567_s30 + $0x34c] sm:$0xf] }
  0xe3   : > { %v6334_v41 = vld [vmem:[%s6567_s30 + $0xaa4] sm:$0xf0]  ;;  %v4624_v39 = vld [vmem:[%s6567_s30 + $0x368] sm:$0xf0] }
  0xe4   : > { %v4750_v45 = vld [vmem:[%s6567_s30 + $0x448] sm:$0xf]  ;;  %v5551_v48 = vor.u32 %v6334_v41, %v5550_v40  ;;  %3225 = vmatpush.bf16.msra.mxu2 %v5295_v44  ;;  %v6162_v40 = vld [vmem:[%s6567_s30 + $0x54c] sm:$0xf]  ;;  %v4627_v43 = vor.u32 %v6098_v38, %v4624_v39 }
  0xe5   : > { %v6134_v46 = vld [vmem:[%s6567_s30 + $0x464] sm:$0xf0]  ;;  %v4880_v41 = vld [vmem:[%s6567_s30 + $0x568] sm:$0xf0] }
  0xe6   : > { %v5006_v47 = vld [vmem:[%s6567_s30 + $0x648] sm:$0xf]  ;;  %v4751_v54 = vor.u32 %v6134_v46, %v4750_v45  ;;  %3238 = vmatpush.bf16.msra.mxu3 %v5551_v48  ;;  %v6026_v45 = vld [vmem:[%s6567_s30 + $0x10c] sm:$0xf] }
  0xe7   : > { %v6198_v49 = vld [vmem:[%s6567_s30 + $0x664] sm:$0xf0]  ;;  %v4336_v46 = vld [vmem:[%s6567_s30 + $0x128] sm:$0xf0] }
  0xe8   : > { %v5262_v50 = vld [vmem:[%s6567_s30 + $0x848] sm:$0xf]  ;;  %v5007_v57 = vor.u32 %v6198_v49, %v5006_v47  ;;  %3200 = vmatpush.bf16.msra.mxu0 %v4751_v54  ;;  %v6090_v47 = vld [vmem:[%s6567_s30 + $0x30c] sm:$0xf] }
  0xe9   : > { %v6262_v51 = vld [vmem:[%s6567_s30 + $0x864] sm:$0xf0]  ;;  %v4592_v48 = vld [vmem:[%s6567_s30 + $0x328] sm:$0xf0] }
  0xea   : > { %v5518_v52 = vld [vmem:[%s6567_s30 + $0xa48] sm:$0xf]  ;;  %v5263_v58 = vor.u32 %v6262_v51, %v5262_v50  ;;  %3213 = vmatpush.bf16.msra.mxu1 %v5007_v57  ;;  %v6154_v49 = vld [vmem:[%s6567_s30 + $0x50c] sm:$0xf]  ;;  %v4339_v51 = vor.u32 %v6026_v45, %v4336_v46 }
  0xeb   : > { %v6326_v53 = vld [vmem:[%s6567_s30 + $0xa64] sm:$0xf0]  ;;  %v4304_v57 = vld [vmem:[%s6567_s30 + $0xe8] sm:$0xf0] }
  0xec   : > { %v4718_v55 = vld [vmem:[%s6567_s30 + $0x408] sm:$0xf]  ;;  %v5519_v62 = vor.u32 %v6326_v53, %v5518_v52  ;;  %3226 = vmatpush.bf16.msra.mxu2 %v5263_v58  ;;  %v4595_v52 = vor.u32 %v6090_v47, %v4592_v48  ;;  %v6082_v58 = vld [vmem:[%s6567_s30 + $0x2cc] sm:$0xf]  ;;  %v3008_v10 = vpop.f32.mrf.mxu1 }
  0xed   : > { %v6126_v56 = vld [vmem:[%s6567_s30 + $0x424] sm:$0xf0]  ;;  %v6138_v7 = vld [vmem:[%s6567_s30 + $0x48c] sm:$0xf] }
  0xee   : > { %v4974_v59 = vld [vmem:[%s6567_s30 + $0x608] sm:$0xf]  ;;  %v4719_v5 = vor.u32 %v6126_v56, %v4718_v55  ;;  %3239 = vmatpush.bf16.msra.mxu3 %v5519_v62  ;;  %v6018_v55 = vld [vmem:[%s6567_s30 + $0xcc] sm:$0xf] }
  0xef   : > { %v6190_v60 = vld [vmem:[%s6567_s30 + $0x624] sm:$0xf0]  ;;  %v6066_v18 = vld [vmem:[%s6567_s30 + $0x24c] sm:$0xf] }
  0xf0   : > { %v5230_v61 = vld [vmem:[%s6567_s30 + $0x808] sm:$0xf]  ;;  %v4975_v8 = vor.u32 %v6190_v60, %v4974_v59  ;;  %3201 = vmatpush.bf16.msra.mxu0 %v4719_v5  ;;  %v4560_v59 = vld [vmem:[%s6567_s30 + $0x2e8] sm:$0xf0] }
  0xf1   : > { %v6254_v63 = vld [vmem:[%s6567_s30 + $0x824] sm:$0xf0]  ;;  %v6146_v60 = vld [vmem:[%s6567_s30 + $0x4cc] sm:$0xf]  ;;  %v2995_v9 = vpop.f32.mrf.mxu0 }
  0xf2   : > { %v5486_v0 = vld [vmem:[%s6567_s30 + $0xa08] sm:$0xf]  ;;  %v5231_v22 = vor.u32 %v6254_v63, %v5230_v61  ;;  %3214 = vmatpush.bf16.msra.mxu1 %v4975_v8  ;;  %v4816_v61 = vld [vmem:[%s6567_s30 + $0x4e8] sm:$0xf0]  ;;  %v4307_v63 = vor.u32 %v6018_v55, %v4304_v57 }
  0xf3   : > { %v6318_v1 = vld [vmem:[%s6567_s30 + $0xa24] sm:$0xf0]  ;;  %3202 = vmatmul.bf16.vlgmr.msra.gmra.mxu0 %v6675_v21  ;;  %v4819_v4 = vor.u32 %v6146_v60, %v4816_v61  ;;  %v4272_v5 = vld [vmem:[%s6567_s30 + $0xa8] sm:$0xf0] }
  0xf4   : > { %v5966_v2 = vld [vmem:[%s6567_s30 + $0xdc8] sm:$0xf]  ;;  %v5487_v23 = vor.u32 %v6318_v1, %v5486_v0  ;;  %3227 = vmatpush.bf16.msra.mxu2 %v5231_v22  ;;  %v4563_v0 = vor.u32 %v6082_v58, %v4560_v59  ;;  %v4784_v8 = vld [vmem:[%s6567_s30 + $0x4a8] sm:$0xf0] }
  0xf5   : > { %v6438_v3 = vld [vmem:[%s6567_s30 + $0xde4] sm:$0xf0]  ;;  %3215 = vmatmul.bf16.vlgmr.msra.gmra.mxu1 %v6684_v27  ;;  %v4848_v27 = vld [vmem:[%s6567_s30 + $0x528] sm:$0xf0]  ;;  %v4787_v16 = vor.u32 %v6138_v7, %v4784_v8 }
  0xf6   : > { %v5967_v11 = vor.u32 %v6438_v3, %v5966_v2  ;;  %v5934_v14 = vld [vmem:[%s6567_s30 + $0xd88] sm:$0xf]  ;;  %3240 = vmatpush.bf16.msra.mxu3 %v5487_v23  ;;  %3259 = vmatpush.bf16.msrb.mxu1 %v4435_v12  ;;  %v4851_v56 = vor.u32 %v6154_v49, %v4848_v27  ;;  %v6010_v3 = vld [vmem:[%s6567_s30 + $0x8c] sm:$0xf]  ;;  %v3010_v27 = vpop.f32.mrf.mxu1 }
  0xf7   : > { %v6430_v15 = vld [vmem:[%s6567_s30 + $0xda4] sm:$0xf0]  ;;  %3228 = vmatmul.bf16.vlgmr.msra.gmra.mxu2 %v6733_v32  ;;  %v4371_v32 = vor.u32 %v6034_v35, %v4368_v37  ;;  %v4275_v23 = vor.u32 %v6010_v3, %v4272_v5  ;;  %v4496_v19 = vld [vmem:[%s6567_s30 + $0x268] sm:$0xf0]  ;;  %v3021_v37 = vpop.f32.mrf.mxu2 }
  0xf8   : > { %3246 = vmatpush.bf16.msrb.mxu0 %v5967_v11  ;;  %v5935_v26 = vor.u32 %v6430_v15, %v5934_v14  ;;  %3272 = vmatpush.bf16.msrb.mxu2 %v4691_v13  ;;  %v5902_v31 = vld [vmem:[%s6567_s30 + $0xd48] sm:$0xf]  ;;  %v4531_v11 = vor.u32 %v6074_v30, %v4528_v6  ;;  %v6002_v14 = vld [vmem:[%s6567_s30 + $0x4c] sm:$0xf]  ;;  %v3009_v15 = vadd.f32 %v3008_v10, %v2995_v9  ;;  %v7014_v9 = vld [vmem:[#allocation1 + $0x36] sm:$0xff] }
  0xf9   : > { %v6422_v34 = vld [vmem:[%s6567_s30 + $0xd64] sm:$0xf0]  ;;  %3241 = vmatmul.bf16.vlgmr.msra.gmra.mxu3 %v6735_v33  ;;  %v4883_v33 = vor.u32 %v6162_v40, %v4880_v41  ;;  %v6130_v20 = vld [vmem:[%s6567_s30 + $0x44c] sm:$0xf]  ;;  %v2997_v48 = vpop.f32.mrf.mxu0 }
  0xfa   : > { %3285 = vmatpush.bf16.msrb.mxu3 %v4947_v17  ;;  %v5903_v42 = vor.u32 %v6422_v34, %v5902_v31  ;;  %3260 = vmatpush.bf16.msrb.mxu1 %v4403_v28  ;;  %v5870_v44 = vld [vmem:[%s6567_s30 + $0xd08] sm:$0xf]  ;;  %v4240_v17 = vld [vmem:[%s6567_s30 + $0x68] sm:$0xf0]  ;;  %v4499_v31 = vor.u32 %v6066_v18, %v4496_v19  ;;  %v7028_v18 = vld [vmem:[#allocation1] sm:$0xff] }
  0xfb   : > { %v6414_v21 = vld [vmem:[%s6567_s30 + $0xd24] sm:$0xf0]  ;;  %v4752_v24 = vld [vmem:[%s6567_s30 + $0x468] sm:$0xf0] }
  0xfc   : > { %3247 = vmatpush.bf16.msrb.mxu0 %v5935_v26  ;;  %3273 = vmatpush.bf16.msrb.mxu2 %v4659_v29  ;;  %v5871_v50 = vor.u32 %v6414_v21, %v5870_v44  ;;  %v5838_v53 = vld [vmem:[%s6567_s30 + $0xcc8] sm:$0xf]  ;;  %v4243_v29 = vor.u32 %v6002_v14, %v4240_v17  ;;  %v5994_v34 = vld [vmem:[%s6567_s30 + $0xc] sm:$0xf]  ;;  %v4755_v38 = vor.u32 %v6130_v20, %v4752_v24  ;;  %v3034_v21 = vpop.f32.mrf.mxu3 }
  0xfd   : > { %v6406_v54 = vld [vmem:[%s6567_s30 + $0xce4] sm:$0xf0]  ;;  %v4208_v35 = vld [vmem:[%s6567_s30 + $0x28] sm:$0xf0] }
  0xfe   : > { %3286 = vmatpush.bf16.msrb.mxu3 %v4915_v36  ;;  %3261 = vmatpush.bf16.msrb.mxu1 %v4371_v32  ;;  %v5839_v62 = vor.u32 %v6406_v54, %v5838_v53  ;;  %v5806_v1 = vld [vmem:[%s6567_s30 + $0xc88] sm:$0xf]  ;;  %v6058_v36 = vld [vmem:[%s6567_s30 + $0x20c] sm:$0xf] }
  0xff   : > { %v6398_v2 = vld [vmem:[%s6567_s30 + $0xca4] sm:$0xf0]  ;;  %v4464_v39 = vld [vmem:[%s6567_s30 + $0x228] sm:$0xf0]  ;;  %v3023_v3 = vpop.f32.mrf.mxu2 }
 0x100   : > { %3248 = vmatpush.bf16.msrb.mxu0 %v5903_v42  ;;  %3274 = vmatpush.bf16.msrb.mxu2 %v4627_v43  ;;  %v5807_v22 = vor.u32 %v6398_v2, %v5806_v1  ;;  %v5774_v12 = vld [vmem:[%s6567_s30 + $0xc48] sm:$0xf]  ;;  %v6122_v40 = vld [vmem:[%s6567_s30 + $0x40c] sm:$0xf]  ;;  %v3022_v42 = vadd.f32 %v3021_v37, %v3009_v15 }
 0x101   : > { %v6390_v13 = vld [vmem:[%s6567_s30 + $0xc64] sm:$0xf0]  ;;  %v4720_v41 = vld [vmem:[%s6567_s30 + $0x428] sm:$0xf0] }
 0x102   : > { %3287 = vmatpush.bf16.msrb.mxu3 %v4883_v33  ;;  %3262 = vmatpush.bf16.msrb.mxu1 %v4339_v51  ;;  %v5775_v25 = vor.u32 %v6390_v13, %v5774_v12  ;;  %v5742_v26 = vld [vmem:[%s6567_s30 + $0xc08] sm:$0xf]  ;;  %v6242_v32 = vld [vmem:[%s6567_s30 + $0x7cc] sm:$0xf]  ;;  %v6999_v49 = vadd.f32 %v3034_v21, %v3022_v42  ;;  %v4467_v51 = vor.u32 %v6058_v36, %v4464_v39 }
 0x103   : > { %v6382_v28 = vld [vmem:[%s6567_s30 + $0xc24] sm:$0xf0]  ;;  %v5200_v43 = vld [vmem:[%s6567_s30 + $0x7e8] sm:$0xf0]  ;;  %v4723_v54 = vor.u32 %v6122_v40, %v4720_v41 }
 0x104   : > { %3249 = vmatpush.bf16.msrb.mxu0 %v5871_v50  ;;  %3275 = vmatpush.bf16.msrb.mxu2 %v4595_v52  ;;  %v6306_v44 = vld [vmem:[%s6567_s30 + $0x9cc] sm:$0xf]  ;;  %v5743_v45 = vor.u32 %v6382_v28, %v5742_v26  ;;  %v4211_v50 = vor.u32 %v5994_v34, %v4208_v35  ;;  %v5203_v55 = vor.u32 %v6242_v32, %v5200_v43 }
 0x105   : > { %v5456_v33 = vld [vmem:[%s6567_s30 + $0x9e8] sm:$0xf0] }
 0x106   : > { %3288 = vmatpush.bf16.msrb.mxu3 %v4851_v56  ;;  %3263 = vmatpush.bf16.msrb.mxu1 %v4307_v63  ;;  %v6370_v46 = vld [vmem:[%s6567_s30 + $0xbcc] sm:$0xf]  ;;  %v5459_v56 = vor.u32 %v6306_v44, %v5456_v33 }
 0x107   : > { %v5712_v47 = vld [vmem:[%s6567_s30 + $0xbe8] sm:$0xf0] }
 0x108   : > { %3250 = vmatpush.bf16.msrb.mxu0 %v5839_v62  ;;  %3276 = vmatpush.bf16.msrb.mxu2 %v4563_v0  ;;  %v6434_v52 = vld [vmem:[%s6567_s30 + $0xdcc] sm:$0xf]  ;;  %v5715_v57 = vor.u32 %v6370_v46, %v5712_v47 }
 0x109   : > { %v5968_v53 = vld [vmem:[%s6567_s30 + $0xde8] sm:$0xf0]  ;;  %v3060_v39 = vpop.f32.mrf.mxu1 }
 0x10a   : > { %3289 = vmatpush.bf16.msrb.mxu3 %v4819_v4  ;;  %3264 = vmatpush.bf16.msrb.mxu1 %v4275_v23  ;;  %v6234_v58 = vld [vmem:[%s6567_s30 + $0x78c] sm:$0xf]  ;;  %v5971_v61 = vor.u32 %v6434_v52, %v5968_v53 }
 0x10b   : > { %v5168_v59 = vld [vmem:[%s6567_s30 + $0x7a8] sm:$0xf0] }
 0x10c   : > { %3251 = vmatpush.bf16.msrb.mxu0 %v5807_v22  ;;  %3277 = vmatpush.bf16.msrb.mxu2 %v4531_v11  ;;  %v6298_v60 = vld [vmem:[%s6567_s30 + $0x98c] sm:$0xf]  ;;  %v5171_v4 = vor.u32 %v6234_v58, %v5168_v59  ;;  %v3036_v22 = vpop.f32.mrf.mxu3 }
 0x10d   : > { %v5424_v62 = vld [vmem:[%s6567_s30 + $0x9a8] sm:$0xf0] }
 0x10e   : > { %3290 = vmatpush.bf16.msrb.mxu3 %v4787_v16  ;;  %3265 = vmatpush.bf16.msrb.mxu1 %v4243_v29  ;;  %v6362_v63 = vld [vmem:[%s6567_s30 + $0xb8c] sm:$0xf]  ;;  %v5427_v5 = vor.u32 %v6298_v60, %v5424_v62  ;;  %v7025_v16 = vld [vmem:[#allocation1 + $0x12] sm:$0xff] }
 0x10f   : > { %v5680_v0 = vld [vmem:[%s6567_s30 + $0xba8] sm:$0xf0] }
 0x110   : > { %3252 = vmatpush.bf16.msrb.mxu0 %v5775_v25  ;;  %3278 = vmatpush.bf16.msrb.mxu2 %v4499_v31  ;;  %v6426_v1 = vld [vmem:[%s6567_s30 + $0xd8c] sm:$0xf]  ;;  %v5683_v30 = vor.u32 %v6362_v63, %v5680_v0 }
 0x111   : > { %v5936_v2 = vld [vmem:[%s6567_s30 + $0xda8] sm:$0xf0] }
 0x112   : > { %3291 = vmatpush.bf16.msrb.mxu3 %v4755_v38  ;;  %3266 = vmatpush.bf16.msrb.mxu1 %v4211_v50  ;;  %v6226_v6 = vld [vmem:[%s6567_s30 + $0x74c] sm:$0xf]  ;;  %v5939_v10 = vor.u32 %v6426_v1, %v5936_v2  ;;  %v3047_v38 = vpop.f32.mrf.mxu0  ;;  %v3062_v2 = vpop.f32.mrf.mxu1 }
 0x113   : > { %v5136_v7 = vld [vmem:[%s6567_s30 + $0x768] sm:$0xf0]  ;;  %v3048_v44 = vadd.f32 %v3047_v38, %v6999_v49  ;;  %v6103_v2 = vld [vmem:[%s6567_s30 + $0x36c] sm:$0xf0] }
 0x114   : > { %3253 = vmatpush.bf16.msrb.mxu0 %v5743_v45  ;;  %3279 = vmatpush.bf16.msrb.mxu2 %v4467_v51  ;;  %v6290_v8 = vld [vmem:[%s6567_s30 + $0x94c] sm:$0xf]  ;;  %v5139_v17 = vor.u32 %v6226_v6, %v5136_v7  ;;  %v7058_v63 = vpop.f32.mrf.mxu3 }
 0x115   : > { %v5392_v23 = vld [vmem:[%s6567_s30 + $0x968] sm:$0xf0]  ;;  %3267 = vmatmul.bf16.vlgmr.msrb.gmra.mxu1 %v7028_v18  ;;  %v3061_v27 = vadd.f32 %v3060_v39, %v3048_v44  ;;  %v5206_v44 = vld [vmem:[%s6567_s30 + $0x7d0] sm:$0xf] }
 0x116   : > { %3292 = vmatpush.bf16.msrb.mxu3 %v4723_v54  ;;  %3311 = vmatpush.bf16.msra.mxu1 %v5459_v56  ;;  %v6354_v11 = vld [vmem:[%s6567_s30 + $0xb4c] sm:$0xf]  ;;  %v5395_v19 = vor.u32 %v6290_v8, %v5392_v23 }
 0x117   : > { %3254 = vmatmul.bf16.vlgmr.msrb.gmra.mxu0 %v7014_v9  ;;  %v5648_v12 = vld [vmem:[%s6567_s30 + $0xb68] sm:$0xf0] }
 0x118   : > { %3298 = vmatpush.bf16.msra.mxu0 %v5203_v55  ;;  %3324 = vmatpush.bf16.msra.mxu2 %v5715_v57  ;;  %v6418_v13 = vld [vmem:[%s6567_s30 + $0xd4c] sm:$0xf]  ;;  %v5651_v20 = vor.u32 %v6354_v11, %v5648_v12  ;;  %v3073_v55 = vpop.f32.mrf.mxu2 }
 0x119   : > { %v5904_v14 = vld [vmem:[%s6567_s30 + $0xd68] sm:$0xf0]  ;;  %3293 = vmatmul.bf16.vlgmr.msrb.gmra.mxu3 %v7025_v16  ;;  %v7054_v60 = vadd.f32 %v3073_v55, %v3061_v27  ;;  %v6047_v27 = vld [vmem:[%s6567_s30 + $0x1ac] sm:$0xf0] }
 0x11a   : > { %3337 = vmatpush.bf16.msra.mxu3 %v5971_v61  ;;  %v7022_v15 = vld [vmem:[#allocation1 + $0x9] sm:$0xff]  ;;  %3312 = vmatpush.bf16.msra.mxu1 %v5427_v5  ;;  %v5907_v28 = vor.u32 %v6418_v13, %v5904_v14  ;;  %v3049_v1 = vpop.f32.mrf.mxu0 }
 0x11b   : > { %3280 = vmatmul.bf16.vlgmr.msrb.gmra.mxu2 %v7022_v15  ;;  %v6218_v24 = vld [vmem:[%s6567_s30 + $0x70c] sm:$0xf]  ;;  %v6239_v55 = vld [vmem:[%s6567_s30 + $0x7ac] sm:$0xf0] }
 0x11c   : > { %3299 = vmatpush.bf16.msra.mxu0 %v5171_v4  ;;  %3325 = vmatpush.bf16.msra.mxu2 %v5683_v30  ;;  %v5104_v25 = vld [vmem:[%s6567_s30 + $0x728] sm:$0xf0]  ;;  %v3088_v38 = vpop.f32.mrf.mxu3 }
 0x11d   : > { %v6282_v26 = vld [vmem:[%s6567_s30 + $0x90c] sm:$0xf]  ;;  %v5107_v37 = vor.u32 %v6218_v24, %v5104_v25 }
 0x11e   : > { %3338 = vmatpush.bf16.msra.mxu3 %v5939_v10  ;;  %v5360_v29 = vld [vmem:[%s6567_s30 + $0x928] sm:$0xf0]  ;;  %3313 = vmatpush.bf16.msra.mxu1 %v5395_v19 }
 0x11f   : > { %v6346_v31 = vld [vmem:[%s6567_s30 + $0xb0c] sm:$0xf]  ;;  %v5363_v40 = vor.u32 %v6282_v26, %v5360_v29 }
 0x120   : > { %v5616_v34 = vld [vmem:[%s6567_s30 + $0xb28] sm:$0xf0]  ;;  %3300 = vmatpush.bf16.msra.mxu0 %v5139_v17  ;;  %3326 = vmatpush.bf16.msra.mxu2 %v5651_v20  ;;  %v3075_v26 = vpop.f32.mrf.mxu2 }
 0x121   : > { %v6410_v35 = vld [vmem:[%s6567_s30 + $0xd0c] sm:$0xf]  ;;  %v5619_v41 = vor.u32 %v6346_v31, %v5616_v34 }
 0x122   : > { %v5872_v36 = vld [vmem:[%s6567_s30 + $0xd28] sm:$0xf0]  ;;  %3339 = vmatpush.bf16.msra.mxu3 %v5907_v28  ;;  %3314 = vmatpush.bf16.msra.mxu1 %v5363_v40  ;;  %v6119_v40 = vld [vmem:[%s6567_s30 + $0x3ec] sm:$0xf0] }
 0x123   : > { %v6210_v42 = vld [vmem:[%s6567_s30 + $0x6cc] sm:$0xf]  ;;  %v5875_v21 = vor.u32 %v6410_v35, %v5872_v36  ;;  %v4438_v35 = vld [vmem:[%s6567_s30 + $0x1d0] sm:$0xf] }
 0x124   : > { %v5072_v32 = vld [vmem:[%s6567_s30 + $0x6e8] sm:$0xf0]  ;;  %3301 = vmatpush.bf16.msra.mxu0 %v5107_v37  ;;  %3327 = vmatpush.bf16.msra.mxu2 %v5619_v41  ;;  %v6055_v36 = vld [vmem:[%s6567_s30 + $0x1ec] sm:$0xf0] }
 0x125   : > { %v6274_v43 = vld [vmem:[%s6567_s30 + $0x8cc] sm:$0xf]  ;;  %v5075_v50 = vor.u32 %v6210_v42, %v5072_v32  ;;  %v4694_v37 = vld [vmem:[%s6567_s30 + $0x3d0] sm:$0xf] }
 0x126   : > { %v5328_v45 = vld [vmem:[%s6567_s30 + $0x8e8] sm:$0xf0]  ;;  %3340 = vmatpush.bf16.msra.mxu3 %v5875_v21  ;;  %v4950_v41 = vld [vmem:[%s6567_s30 + $0x5d0] sm:$0xf] }
 0x127   : > { %v6338_v33 = vld [vmem:[%s6567_s30 + $0xacc] sm:$0xf]  ;;  %v5331_v49 = vor.u32 %v6274_v43, %v5328_v45  ;;  %v6183_v42 = vld [vmem:[%s6567_s30 + $0x5ec] sm:$0xf0]  ;;  %v3099_v26 = vpop.f32.mrf.mxu0 }
 0x128   : > { %v5584_v46 = vld [vmem:[%s6567_s30 + $0xae8] sm:$0xf0]  ;;  %3302 = vmatpush.bf16.msra.mxu0 %v5075_v50  ;;  %v6247_v21 = vld [vmem:[%s6567_s30 + $0x7ec] sm:$0xf0] }
 0x129   : > { %v6402_v47 = vld [vmem:[%s6567_s30 + $0xccc] sm:$0xf]  ;;  %v5587_v51 = vor.u32 %v6338_v33, %v5584_v46  ;;  %3315 = vmatpush.bf16.msra.mxu1 %v5331_v49  ;;  %v4439_v33 = vor.u32 %v6055_v36, %v4438_v35  ;;  %v4695_v46 = vor.u32 %v6119_v40, %v4694_v37  ;;  %v4662_v50 = vld [vmem:[%s6567_s30 + $0x390] sm:$0xf]  ;;  %v5207_v49 = vor.u32 %v6247_v21, %v5206_v44  ;;  %v3112_v37 = vpop.f32.mrf.mxu1 }
 0x12a   : > { %v5840_v48 = vld [vmem:[%s6567_s30 + $0xce8] sm:$0xf0]  ;;  %v4566_v35 = vld [vmem:[%s6567_s30 + $0x2d0] sm:$0xf]  ;;  %v3100_v36 = vadd.f32 %v3099_v26, %v7058_v63 }
 0x12b   : > { %v6202_v52 = vld [vmem:[%s6567_s30 + $0x68c] sm:$0xf]  ;;  %v5843_v56 = vor.u32 %v6402_v47, %v5840_v48  ;;  %3328 = vmatpush.bf16.msra.mxu2 %v5587_v51  ;;  %v4951_v47 = vor.u32 %v6183_v42, %v4950_v41  ;;  %v4406_v48 = vld [vmem:[%s6567_s30 + $0x190] sm:$0xf] }
 0x12c   : > { %v5040_v53 = vld [vmem:[%s6567_s30 + $0x6a8] sm:$0xf0]  ;;  %v6111_v51 = vld [vmem:[%s6567_s30 + $0x3ac] sm:$0xf0] }
 0x12d   : > { %v6266_v54 = vld [vmem:[%s6567_s30 + $0x88c] sm:$0xf]  ;;  %v5043_v0 = vor.u32 %v6202_v52, %v5040_v53  ;;  %3341 = vmatpush.bf16.msra.mxu3 %v5843_v56  ;;  %v4918_v52 = vld [vmem:[%s6567_s30 + $0x590] sm:$0xf]  ;;  %v4407_v56 = vor.u32 %v6047_v27, %v4406_v48 }
 0x12e   : > { %v5296_v57 = vld [vmem:[%s6567_s30 + $0x8a8] sm:$0xf0]  ;;  %v6175_v53 = vld [vmem:[%s6567_s30 + $0x5ac] sm:$0xf0] }
 0x12f   : > { %v6330_v58 = vld [vmem:[%s6567_s30 + $0xa8c] sm:$0xf]  ;;  %v5299_v3 = vor.u32 %v6266_v54, %v5296_v57  ;;  %3303 = vmatpush.bf16.msra.mxu0 %v5043_v0  ;;  %v5174_v54 = vld [vmem:[%s6567_s30 + $0x790] sm:$0xf]  ;;  %v4663_v57 = vor.u32 %v6111_v51, %v4662_v50 }
 0x130   : > { %v5552_v59 = vld [vmem:[%s6567_s30 + $0xaa8] sm:$0xf0]  ;;  %v5175_v1 = vor.u32 %v6239_v55, %v5174_v54  ;;  %v4822_v40 = vld [vmem:[%s6567_s30 + $0x4d0] sm:$0xf] }
 0x131   : > { %v6394_v61 = vld [vmem:[%s6567_s30 + $0xc8c] sm:$0xf]  ;;  %v5555_v4 = vor.u32 %v6330_v58, %v5552_v59  ;;  %3316 = vmatpush.bf16.msra.mxu1 %v5299_v3  ;;  %v4919_v58 = vor.u32 %v6175_v53, %v4918_v52  ;;  %v4374_v59 = vld [vmem:[%s6567_s30 + $0x150] sm:$0xf]  ;;  %v3138_v52 = vpop.f32.mrf.mxu3 }
 0x132   : > { %v5808_v62 = vld [vmem:[%s6567_s30 + $0xca8] sm:$0xf0]  ;;  %v4886_v3 = vld [vmem:[%s6567_s30 + $0x550] sm:$0xf] }
 0x133   : > { %v6194_v5 = vld [vmem:[%s6567_s30 + $0x64c] sm:$0xf]  ;;  %v5811_v7 = vor.u32 %v6394_v61, %v5808_v62  ;;  %3329 = vmatpush.bf16.msra.mxu2 %v5555_v4  ;;  %v6039_v61 = vld [vmem:[%s6567_s30 + $0x16c] sm:$0xf0] }
 0x134   : > { %v5008_v30 = vld [vmem:[%s6567_s30 + $0x668] sm:$0xf0]  ;;  %v4630_v62 = vld [vmem:[%s6567_s30 + $0x350] sm:$0xf] }
 0x135   : > { %v6258_v6 = vld [vmem:[%s6567_s30 + $0x84c] sm:$0xf]  ;;  %v5011_v12 = vor.u32 %v6194_v5, %v5008_v30  ;;  %3342 = vmatpush.bf16.msra.mxu3 %v5811_v7  ;;  %v6167_v4 = vld [vmem:[%s6567_s30 + $0x56c] sm:$0xf0]  ;;  %v7101_v5 = vld [vmem:[#allocation1 + $0x1b] sm:$0xff] }
 0x136   : > { %v5264_v8 = vld [vmem:[%s6567_s30 + $0x868] sm:$0xf0]  ;;  %v5142_v30 = vld [vmem:[%s6567_s30 + $0x750] sm:$0xf]  ;;  %v7107_v7 = vld [vmem:[#allocation1 + $0x24] sm:$0xff] }
 0x137   : > { %v6322_v22 = vld [vmem:[%s6567_s30 + $0xa4c] sm:$0xf]  ;;  %v5267_v17 = vor.u32 %v6258_v6, %v5264_v8  ;;  %3304 = vmatpush.bf16.msra.mxu0 %v5011_v12  ;;  %v6231_v6 = vld [vmem:[%s6567_s30 + $0x76c] sm:$0xf0]  ;;  %v4375_v8 = vor.u32 %v6039_v61, %v4374_v59 }
 0x138   : > { %v5520_v10 = vld [vmem:[%s6567_s30 + $0xa68] sm:$0xf0]  ;;  %v4598_v12 = vld [vmem:[%s6567_s30 + $0x310] sm:$0xf] }
 0x139   : > { %v6386_v23 = vld [vmem:[%s6567_s30 + $0xc4c] sm:$0xf]  ;;  %v5523_v19 = vor.u32 %v6322_v22, %v5520_v10  ;;  %3317 = vmatpush.bf16.msra.mxu1 %v5267_v17  ;;  %v4631_v22 = vor.u32 %v6103_v2, %v4630_v62  ;;  %v4887_v10 = vor.u32 %v6167_v4, %v4886_v3  ;;  %v4854_v17 = vld [vmem:[%s6567_s30 + $0x510] sm:$0xf]  ;;  %v3114_v2 = vpop.f32.mrf.mxu1 }
 0x13a   : > { %v5776_v11 = vld [vmem:[%s6567_s30 + $0xc68] sm:$0xf0]  ;;  %v6151_v41 = vld [vmem:[%s6567_s30 + $0x4ec] sm:$0xf0]  ;;  %v6035_v2 = vld [vmem:[%s6567_s30 + $0x154] sm:$0xf] }
 0x13b   : > { %v6186_v13 = vld [vmem:[%s6567_s30 + $0x60c] sm:$0xf]  ;;  %v5779_v28 = vor.u32 %v6386_v23, %v5776_v11  ;;  %3330 = vmatpush.bf16.msra.mxu2 %v5523_v19  ;;  %v4342_v23 = vld [vmem:[%s6567_s30 + $0x110] sm:$0xf]  ;;  %v4823_v21 = vor.u32 %v6151_v41, %v4822_v40 }
 0x13c   : > { %v4976_v14 = vld [vmem:[%s6567_s30 + $0x628] sm:$0xf0]  ;;  %v6031_v11 = vld [vmem:[%s6567_s30 + $0x12c] sm:$0xf0] }
 0x13d   : > { %v6250_v20 = vld [vmem:[%s6567_s30 + $0x80c] sm:$0xf]  ;;  %v4979_v39 = vor.u32 %v6186_v13, %v4976_v14  ;;  %3343 = vmatpush.bf16.msra.mxu3 %v5779_v28  ;;  %v5143_v13 = vor.u32 %v6231_v6, %v5142_v30  ;;  %v6095_v14 = vld [vmem:[%s6567_s30 + $0x32c] sm:$0xf0] }
 0x13e   : > { %v5232_v24 = vld [vmem:[%s6567_s30 + $0x828] sm:$0xf0]  ;;  %v6159_v19 = vld [vmem:[%s6567_s30 + $0x52c] sm:$0xf0]  ;;  %v4599_v28 = vor.u32 %v6095_v14, %v4598_v12 }
 0x13f   : > { %v6314_v25 = vld [vmem:[%s6567_s30 + $0xa0c] sm:$0xf]  ;;  %v5235_v32 = vor.u32 %v6250_v20, %v5232_v24  ;;  %3305 = vmatpush.bf16.msra.mxu0 %v4979_v39  ;;  %v5110_v20 = vld [vmem:[%s6567_s30 + $0x710] sm:$0xf] }
 0x140   : > { %v5488_v29 = vld [vmem:[%s6567_s30 + $0xa28] sm:$0xf0]  ;;  %v6223_v24 = vld [vmem:[%s6567_s30 + $0x72c] sm:$0xf0] }
 0x141   : > { %v6378_v31 = vld [vmem:[%s6567_s30 + $0xc0c] sm:$0xf]  ;;  %v5491_v43 = vor.u32 %v6314_v25, %v5488_v29  ;;  %3318 = vmatpush.bf16.msra.mxu1 %v5235_v32  ;;  %v4343_v25 = vor.u32 %v6031_v11, %v4342_v23  ;;  %v4855_v29 = vor.u32 %v6159_v19, %v4854_v17  ;;  %v5111_v38 = vor.u32 %v6223_v24, %v5110_v20  ;;  %v6087_v39 = vld [vmem:[%s6567_s30 + $0x2ec] sm:$0xf0] }
 0x142   : > { %v5744_v34 = vld [vmem:[%s6567_s30 + $0xc28] sm:$0xf0]  ;;  %3306 = vmatmul.bf16.vlgmr.msra.gmra.mxu0 %v7101_v5  ;;  %v5078_v42 = vld [vmem:[%s6567_s30 + $0x6d0] sm:$0xf]  ;;  %v4567_v63 = vor.u32 %v6087_v39, %v4566_v35 }
 0x143   : > { %v5747_v45 = vor.u32 %v6378_v31, %v5744_v34  ;;  %3331 = vmatpush.bf16.msra.mxu2 %v5491_v43  ;;  %3350 = vmatpush.bf16.msrb.mxu0 %v4439_v33  ;;  %v7095_v0 = vld [vmem:[#allocation1 + $0x2d] sm:$0xff]  ;;  %v3113_v43 = vadd.f32 %v3112_v37, %v3100_v36 }
 0x144   : > { %3319 = vmatmul.bf16.vlgmr.msra.gmra.mxu1 %v7107_v7  ;;  %v4310_v31 = vld [vmem:[%s6567_s30 + $0xd0] sm:$0xf] }
 0x145   : > { %3344 = vmatpush.bf16.msra.mxu3 %v5747_v45  ;;  %3363 = vmatpush.bf16.msrb.mxu1 %v4695_v46  ;;  %v6023_v34 = vld [vmem:[%s6567_s30 + $0xec] sm:$0xf0] }
 0x146   : > { %3332 = vmatmul.bf16.vlgmr.msra.gmra.mxu2 %v7095_v0  ;;  %v6215_v32 = vld [vmem:[%s6567_s30 + $0x6ec] sm:$0xf0]  ;;  %v4311_v44 = vor.u32 %v6023_v34, %v4310_v31 }
 0x147   : > { %3376 = vmatpush.bf16.msrb.mxu2 %v4951_v47  ;;  %3351 = vmatpush.bf16.msrb.mxu0 %v4407_v56  ;;  %v4278_v45 = vld [vmem:[%s6567_s30 + $0x90] sm:$0xf]  ;;  %v3125_v47 = vpop.f32.mrf.mxu2  ;;  %v5079_v48 = vor.u32 %v6215_v32, %v5078_v42  ;;  %v6051_v42 = vld [vmem:[%s6567_s30 + $0x1d4] sm:$0xf] }
 0x148   : > { %3345 = vmatmul.bf16.vlgmr.msra.gmra.mxu3 %v7014_v9  ;;  %v6015_v33 = vld [vmem:[%s6567_s30 + $0xac] sm:$0xf0]  ;;  %v3126_v51 = vadd.f32 %v3125_v47, %v3113_v43  ;;  %v4440_v32 = vld [vmem:[%s6567_s30 + $0x1f0] sm:$0xf0] }
 0x149   : > { %3389 = vmatpush.bf16.msrb.mxu3 %v5207_v49  ;;  %3364 = vmatpush.bf16.msrb.mxu1 %v4663_v57  ;;  %v4534_v46 = vld [vmem:[%s6567_s30 + $0x290] sm:$0xf]  ;;  %v4279_v55 = vor.u32 %v6015_v33, %v4278_v45  ;;  %v3101_v57 = vpop.f32.mrf.mxu0  ;;  %v4443_v47 = vor.u32 %v6051_v42, %v4440_v32 }
 0x14a   : > { %v6079_v27 = vld [vmem:[%s6567_s30 + $0x2ac] sm:$0xf0]  ;;  %v7135_v56 = vadd.f32 %v3138_v52, %v3126_v51  ;;  %v4408_v51 = vld [vmem:[%s6567_s30 + $0x1b0] sm:$0xf0] }
 0x14b   : > { %3377 = vmatpush.bf16.msrb.mxu2 %v4919_v58  ;;  %3352 = vmatpush.bf16.msrb.mxu0 %v4375_v8  ;;  %v4790_v50 = vld [vmem:[%s6567_s30 + $0x490] sm:$0xf]  ;;  %v4535_v58 = vor.u32 %v6079_v27, %v4534_v46 }
 0x14c   : > { %v6143_v49 = vld [vmem:[%s6567_s30 + $0x4ac] sm:$0xf0] }
 0x14d   : > { %3390 = vmatpush.bf16.msrb.mxu3 %v5175_v1  ;;  %3365 = vmatpush.bf16.msrb.mxu1 %v4631_v22  ;;  %v5046_v53 = vld [vmem:[%s6567_s30 + $0x690] sm:$0xf]  ;;  %v4791_v59 = vor.u32 %v6143_v49, %v4790_v50  ;;  %v6043_v49 = vld [vmem:[%s6567_s30 + $0x194] sm:$0xf] }
 0x14e   : > { %v6207_v54 = vld [vmem:[%s6567_s30 + $0x6ac] sm:$0xf0] }
 0x14f   : > { %3378 = vmatpush.bf16.msrb.mxu2 %v4887_v10  ;;  %3353 = vmatpush.bf16.msrb.mxu0 %v4343_v25  ;;  %v4246_v61 = vld [vmem:[%s6567_s30 + $0x50] sm:$0xf]  ;;  %v5047_v3 = vor.u32 %v6207_v54, %v5046_v53  ;;  %v3127_v20 = vpop.f32.mrf.mxu2 }
 0x150   : > { %v6007_v62 = vld [vmem:[%s6567_s30 + $0x6c] sm:$0xf0]  ;;  %v3164_v20 = vpop.f32.mrf.mxu1 }
 0x151   : > { %3391 = vmatpush.bf16.msrb.mxu3 %v5143_v13  ;;  %3366 = vmatpush.bf16.msrb.mxu1 %v4599_v28  ;;  %v4502_v1 = vld [vmem:[%s6567_s30 + $0x250] sm:$0xf]  ;;  %v4247_v10 = vor.u32 %v6007_v62, %v4246_v61 }
 0x152   : > { %v6071_v4 = vld [vmem:[%s6567_s30 + $0x26c] sm:$0xf0] }
 0x153   : > { %3379 = vmatpush.bf16.msrb.mxu2 %v4855_v29  ;;  %3354 = vmatpush.bf16.msrb.mxu0 %v4311_v44  ;;  %v4758_v30 = vld [vmem:[%s6567_s30 + $0x450] sm:$0xf]  ;;  %v4503_v12 = vor.u32 %v6071_v4, %v4502_v1  ;;  %v3140_v29 = vpop.f32.mrf.mxu3 }
 0x154   : > { %v6135_v6 = vld [vmem:[%s6567_s30 + $0x46c] sm:$0xf0] }
 0x155   : > { %3392 = vmatpush.bf16.msrb.mxu3 %v5111_v38  ;;  %3367 = vmatpush.bf16.msrb.mxu1 %v4567_v63  ;;  %v5014_v8 = vld [vmem:[%s6567_s30 + $0x650] sm:$0xf]  ;;  %v4759_v13 = vor.u32 %v6135_v6, %v4758_v30 }
 0x156   : > { %v6199_v22 = vld [vmem:[%s6567_s30 + $0x66c] sm:$0xf0] }
 0x157   : > { %3380 = vmatpush.bf16.msrb.mxu2 %v4823_v21  ;;  %3355 = vmatpush.bf16.msrb.mxu0 %v4279_v55  ;;  %v4214_v23 = vld [vmem:[%s6567_s30 + $0x10] sm:$0xf]  ;;  %v5015_v24 = vor.u32 %v6199_v22, %v5014_v8 }
 0x158   : > { %v5999_v11 = vld [vmem:[%s6567_s30 + $0x2c] sm:$0xf0] }
 0x159   : > { %3393 = vmatpush.bf16.msrb.mxu3 %v5079_v48  ;;  %3368 = vmatpush.bf16.msrb.mxu1 %v4535_v58  ;;  %v4470_v14 = vld [vmem:[%s6567_s30 + $0x210] sm:$0xf]  ;;  %v4215_v36 = vor.u32 %v5999_v11, %v4214_v23 }
 0x15a   : > { %v6063_v17 = vld [vmem:[%s6567_s30 + $0x22c] sm:$0xf0] }
 0x15b   : > { %3381 = vmatpush.bf16.msrb.mxu2 %v4791_v59  ;;  %v4726_v19 = vld [vmem:[%s6567_s30 + $0x410] sm:$0xf]  ;;  %3356 = vmatpush.bf16.msrb.mxu0 %v4247_v10  ;;  %v4471_v40 = vor.u32 %v6063_v17, %v4470_v14  ;;  %v4411_v59 = vor.u32 %v6043_v49, %v4408_v51  ;;  %v4344_v14 = vld [vmem:[%s6567_s30 + $0x130] sm:$0xf0] }
 0x15c   : > { %v6127_v25 = vld [vmem:[%s6567_s30 + $0x42c] sm:$0xf0] }
 0x15d   : > { %3394 = vmatpush.bf16.msrb.mxu3 %v5047_v3  ;;  %v4982_v26 = vld [vmem:[%s6567_s30 + $0x610] sm:$0xf]  ;;  %3369 = vmatpush.bf16.msrb.mxu1 %v4503_v12  ;;  %v4727_v41 = vor.u32 %v6127_v25, %v4726_v19  ;;  %v4376_v3 = vld [vmem:[%s6567_s30 + $0x170] sm:$0xf0]  ;;  %v3151_v12 = vpop.f32.mrf.mxu0 }
 0x15e   : > { %v6191_v28 = vld [vmem:[%s6567_s30 + $0x62c] sm:$0xf0]  ;;  %v4379_v10 = vor.u32 %v6035_v2, %v4376_v3  ;;  %v3152_v17 = vadd.f32 %v3151_v12, %v7135_v56  ;;  %v6003_v2 = vld [vmem:[%s6567_s30 + $0x54] sm:$0xf] }
 0x15f   : > { %v5462_v31 = vld [vmem:[%s6567_s30 + $0x9d0] sm:$0xf]  ;;  %3382 = vmatpush.bf16.msrb.mxu2 %v4759_v13  ;;  %v4983_v43 = vor.u32 %v6191_v28, %v4982_v26  ;;  %3357 = vmatpush.bf16.msrb.mxu0 %v4215_v36  ;;  %v6027_v13 = vld [vmem:[%s6567_s30 + $0x114] sm:$0xf] }
 0x160   : > { %v6311_v34 = vld [vmem:[%s6567_s30 + $0x9ec] sm:$0xf0]  ;;  %v4248_v3 = vld [vmem:[%s6567_s30 + $0x70] sm:$0xf0] }
 0x161   : > { %v5718_v35 = vld [vmem:[%s6567_s30 + $0xbd0] sm:$0xf]  ;;  %3395 = vmatpush.bf16.msrb.mxu3 %v5015_v24  ;;  %v5463_v44 = vor.u32 %v6311_v34, %v5462_v31  ;;  %3370 = vmatpush.bf16.msrb.mxu1 %v4471_v40  ;;  %v4347_v31 = vor.u32 %v6027_v13, %v4344_v14  ;;  %v3165_v34 = vadd.f32 %v3164_v20, %v3152_v17  ;;  %v5995_v12 = vld [vmem:[%s6567_s30 + $0x14] sm:$0xf] }
 0x162   : > { %v6375_v37 = vld [vmem:[%s6567_s30 + $0xbec] sm:$0xf0]  ;;  %3358 = vmatmul.bf16.vlgmr.msrb.gmra.mxu0 %v7028_v18  ;;  %v4216_v13 = vld [vmem:[%s6567_s30 + $0x30] sm:$0xf0] }
 0x163   : > { %v5974_v38 = vld [vmem:[%s6567_s30 + $0xdd0] sm:$0xf]  ;;  %v5719_v63 = vor.u32 %v6375_v37, %v5718_v35  ;;  %3383 = vmatpush.bf16.msrb.mxu2 %v4727_v41  ;;  %3402 = vmatpush.bf16.msra.mxu0 %v5463_v44  ;;  %v6019_v37 = vld [vmem:[%s6567_s30 + $0xd4] sm:$0xf] }
 0x164   : > { %v6439_v39 = vld [vmem:[%s6567_s30 + $0xdec] sm:$0xf0]  ;;  %3371 = vmatmul.bf16.vlgmr.msrb.gmra.mxu1 %v7022_v15  ;;  %v6115_v17 = vld [vmem:[%s6567_s30 + $0x3d4] sm:$0xf] }
 0x165   : > { %v5975_v21 = vor.u32 %v6439_v39, %v5974_v38  ;;  %v5430_v45 = vld [vmem:[%s6567_s30 + $0x990] sm:$0xf]  ;;  %3396 = vmatpush.bf16.msrb.mxu3 %v4983_v43  ;;  %3415 = vmatpush.bf16.msra.mxu1 %v5719_v63  ;;  %v4312_v38 = vld [vmem:[%s6567_s30 + $0xf0] sm:$0xf0]  ;;  %v3722_v39 = vrot.slane %v3165_v34, 6  ;;  %v3153_v49 = vpop.f32.mrf.mxu0 }
 0x166   : > { %v6303_v33 = vld [vmem:[%s6567_s30 + $0x9ac] sm:$0xf0]  ;;  %3384 = vmatmul.bf16.vlgmr.msrb.gmra.mxu2 %v7025_v16  ;;  %v6179_v20 = vld [vmem:[%s6567_s30 + $0x5d4] sm:$0xf] }
 0x167   : > { %v5686_v46 = vld [vmem:[%s6567_s30 + $0xb90] sm:$0xf]  ;;  %v5431_v52 = vor.u32 %v6303_v33, %v5430_v45  ;;  %3428 = vmatpush.bf16.msra.mxu2 %v5975_v21  ;;  %v7203_v63 = vsel %vm3728_vm0, %v7054_v60, %v3722_v39  ;;  %v4315_v21 = vor.u32 %v6019_v37, %v4312_v38  ;;  %v6163_v49 = vld [vmem:[%s6567_s30 + $0x554] sm:$0xf] }
 0x168   : > { %v6367_v48 = vld [vmem:[%s6567_s30 + $0xbac] sm:$0xf0]  ;;  %3397 = vmatmul.bf16.vlgmr.msrb.gmra.mxu3 %v7101_v5 }
 0x169   : > { %v5942_v27 = vld [vmem:[%s6567_s30 + $0xd90] sm:$0xf]  ;;  %v5687_v53 = vor.u32 %v6367_v48, %v5686_v46  ;;  %3441 = vmatpush.bf16.msra.mxu3 %v4443_v47  ;;  %3403 = vmatpush.bf16.msra.mxu0 %v5431_v52  ;;  %v3177_v47 = vpop.f32.mrf.mxu2  ;;  %v6011_v48 = vld [vmem:[%s6567_s30 + $0x94] sm:$0xf]  ;;  %v3166_v52 = vpop.f32.mrf.mxu1 }
 0x16a   : > { %v6431_v50 = vld [vmem:[%s6567_s30 + $0xdac] sm:$0xf0]  ;;  %v4888_v52 = vld [vmem:[%s6567_s30 + $0x570] sm:$0xf0] }
 0x16b   : > { %v5943_v54 = vor.u32 %v6431_v50, %v5942_v27  ;;  %v5398_v55 = vld [vmem:[%s6567_s30 + $0x950] sm:$0xf]  ;;  %3416 = vmatpush.bf16.msra.mxu1 %v5687_v53  ;;  %v4280_v27 = vld [vmem:[%s6567_s30 + $0xb0] sm:$0xf0]  ;;  %v3190_v50 = vpop.f32.mrf.mxu3 }
 0x16c   : > { %v6295_v57 = vld [vmem:[%s6567_s30 + $0x96c] sm:$0xf0]  ;;  %v7210_v60 = vadd.f32 %v3190_v50, %v3177_v47  ;;  %v4632_v50 = vld [vmem:[%s6567_s30 + $0x370] sm:$0xf0] }
 0x16d   : > { %v5654_v58 = vld [vmem:[%s6567_s30 + $0xb50] sm:$0xf]  ;;  %v5399_v4 = vor.u32 %v6295_v57, %v5398_v55  ;;  %3429 = vmatpush.bf16.msra.mxu2 %v5943_v54  ;;  %3442 = vmatpush.bf16.msra.mxu3 %v4411_v59  ;;  %v4283_v59 = vor.u32 %v6011_v48, %v4280_v27  ;;  %v6099_v27 = vld [vmem:[%s6567_s30 + $0x354] sm:$0xf] }
 0x16e   : > { %v6359_v61 = vld [vmem:[%s6567_s30 + $0xb6c] sm:$0xf0] }
 0x16f   : > { %v5910_v62 = vld [vmem:[%s6567_s30 + $0xd50] sm:$0xf]  ;;  %v5655_v30 = vor.u32 %v6359_v61, %v5654_v58  ;;  %3404 = vmatpush.bf16.msra.mxu0 %v5399_v4 }
 0x170   : > { %v6423_v1 = vld [vmem:[%s6567_s30 + $0xd6c] sm:$0xf0] }
 0x171   : > { %v5911_v6 = vor.u32 %v6423_v1, %v5910_v62  ;;  %v5366_v16 = vld [vmem:[%s6567_s30 + $0x910] sm:$0xf]  ;;  %3417 = vmatpush.bf16.msra.mxu1 %v5655_v30  ;;  %3443 = vmatpush.bf16.msra.mxu3 %v4379_v10  ;;  %v3179_v14 = vpop.f32.mrf.mxu2 }
 0x172   : > { %v6287_v8 = vld [vmem:[%s6567_s30 + $0x92c] sm:$0xf0]  ;;  %v6211_v14 = vld [vmem:[%s6567_s30 + $0x6d4] sm:$0xf] }
 0x173   : > { %v5622_v22 = vld [vmem:[%s6567_s30 + $0xb10] sm:$0xf]  ;;  %v5367_v19 = vor.u32 %v6287_v8, %v5366_v16  ;;  %3430 = vmatpush.bf16.msra.mxu2 %v5911_v6 }
 0x174   : > { %v6351_v23 = vld [vmem:[%s6567_s30 + $0xb2c] sm:$0xf0] }
 0x175   : > { %v5878_v15 = vld [vmem:[%s6567_s30 + $0xd10] sm:$0xf]  ;;  %v5623_v24 = vor.u32 %v6351_v23, %v5622_v22  ;;  %3405 = vmatpush.bf16.msra.mxu0 %v5367_v19  ;;  %3444 = vmatpush.bf16.msra.mxu3 %v4347_v31  ;;  %v4696_v19 = vld [vmem:[%s6567_s30 + $0x3f0] sm:$0xf0] }
 0x176   : > { %v6415_v11 = vld [vmem:[%s6567_s30 + $0xd2c] sm:$0xf0]  ;;  %v4699_v37 = vor.u32 %v6115_v17, %v4696_v19  ;;  %v5080_v17 = vld [vmem:[%s6567_s30 + $0x6f0] sm:$0xf0] }
 0x177   : > { %v5879_v25 = vor.u32 %v6415_v11, %v5878_v15  ;;  %v5334_v26 = vld [vmem:[%s6567_s30 + $0x8d0] sm:$0xf]  ;;  %3418 = vmatpush.bf16.msra.mxu1 %v5623_v24  ;;  %v4251_v15 = vor.u32 %v6003_v2, %v4248_v3  ;;  %v3192_v24 = vpop.f32.mrf.mxu3  ;;  %v4856_v3 = vld [vmem:[%s6567_s30 + $0x530] sm:$0xf0] }
 0x178   : > { %v6279_v28 = vld [vmem:[%s6567_s30 + $0x8ec] sm:$0xf0]  ;;  %v6275_v19 = vld [vmem:[%s6567_s30 + $0x8d4] sm:$0xf] }
 0x179   : > { %v5590_v29 = vld [vmem:[%s6567_s30 + $0xad0] sm:$0xf]  ;;  %v5335_v40 = vor.u32 %v6279_v28, %v5334_v26  ;;  %3431 = vmatpush.bf16.msra.mxu2 %v5879_v25  ;;  %3445 = vmatpush.bf16.msra.mxu3 %v4315_v21  ;;  %v4952_v26 = vld [vmem:[%s6567_s30 + $0x5f0] sm:$0xf0] }
 0x17a   : > { %v6343_v35 = vld [vmem:[%s6567_s30 + $0xaec] sm:$0xf0]  ;;  %v6243_v28 = vld [vmem:[%s6567_s30 + $0x7d4] sm:$0xf]  ;;  %v4955_v38 = vor.u32 %v6179_v20, %v4952_v26  ;;  %v5083_v26 = vor.u32 %v6211_v14, %v5080_v17 }
 0x17b   : > { %v5846_v36 = vld [vmem:[%s6567_s30 + $0xcd0] sm:$0xf]  ;;  %v5591_v41 = vor.u32 %v6343_v35, %v5590_v29  ;;  %3406 = vmatpush.bf16.msra.mxu0 %v5335_v40  ;;  %v5208_v29 = vld [vmem:[%s6567_s30 + $0x7f0] sm:$0xf0] }
 0x17c   : > { %v6407_v56 = vld [vmem:[%s6567_s30 + $0xcec] sm:$0xf0]  ;;  %v6307_v35 = vld [vmem:[%s6567_s30 + $0x9d4] sm:$0xf]  ;;  %v5211_v39 = vor.u32 %v6243_v28, %v5208_v29 }
 0x17d   : > { %v5847_v42 = vor.u32 %v6407_v56, %v5846_v36  ;;  %v5302_v32 = vld [vmem:[%s6567_s30 + $0x890] sm:$0xf]  ;;  %3419 = vmatpush.bf16.msra.mxu1 %v5591_v41  ;;  %3446 = vmatpush.bf16.msra.mxu3 %v4283_v59  ;;  %v5464_v36 = vld [vmem:[%s6567_s30 + $0x9f0] sm:$0xf0]  ;;  %v4219_v56 = vor.u32 %v5995_v12, %v4216_v13 }
 0x17e   : > { %v6271_v43 = vld [vmem:[%s6567_s30 + $0x8ac] sm:$0xf0]  ;;  %v6107_v40 = vld [vmem:[%s6567_s30 + $0x394] sm:$0xf] }
 0x17f   : > { %v5558_v44 = vld [vmem:[%s6567_s30 + $0xa90] sm:$0xf]  ;;  %v5303_v51 = vor.u32 %v6271_v43, %v5302_v32  ;;  %3432 = vmatpush.bf16.msra.mxu2 %v5847_v42  ;;  %v4664_v41 = vld [vmem:[%s6567_s30 + $0x3b0] sm:$0xf0]  ;;  %v5467_v32 = vor.u32 %v6307_v35, %v5464_v36 }
 0x180   : > { %v6335_v45 = vld [vmem:[%s6567_s30 + $0xaac] sm:$0xf0]  ;;  %v6171_v42 = vld [vmem:[%s6567_s30 + $0x594] sm:$0xf] }
 0x181   : > { %v5814_v33 = vld [vmem:[%s6567_s30 + $0xc90] sm:$0xf]  ;;  %v5559_v53 = vor.u32 %v6335_v45, %v5558_v44  ;;  %3407 = vmatpush.bf16.msra.mxu0 %v5303_v51  ;;  %3447 = vmatpush.bf16.msra.mxu3 %v4251_v15  ;;  %v4920_v43 = vld [vmem:[%s6567_s30 + $0x5b0] sm:$0xf0] }
 0x182   : > { %v6399_v46 = vld [vmem:[%s6567_s30 + $0xcac] sm:$0xf0]  ;;  %v6235_v44 = vld [vmem:[%s6567_s30 + $0x794] sm:$0xf]  ;;  %v4923_v47 = vor.u32 %v6171_v42, %v4920_v43 }
 0x183   : > { %v5815_v54 = vor.u32 %v6399_v46, %v5814_v33  ;;  %v5270_v55 = vld [vmem:[%s6567_s30 + $0x850] sm:$0xf]  ;;  %3420 = vmatpush.bf16.msra.mxu1 %v5559_v53  ;;  %v5176_v21 = vld [vmem:[%s6567_s30 + $0x7b0] sm:$0xf0]  ;;  %v4667_v46 = vor.u32 %v6107_v40, %v4664_v41 }
 0x184   : > { %v6263_v57 = vld [vmem:[%s6567_s30 + $0x86c] sm:$0xf0]  ;;  %v6299_v45 = vld [vmem:[%s6567_s30 + $0x994] sm:$0xf]  ;;  %v5179_v48 = vor.u32 %v6235_v44, %v5176_v21 }
 0x185   : > { %v5526_v58 = vld [vmem:[%s6567_s30 + $0xa50] sm:$0xf]  ;;  %v5271_v4 = vor.u32 %v6263_v57, %v5270_v55  ;;  %3433 = vmatpush.bf16.msra.mxu2 %v5815_v54  ;;  %v5432_v33 = vld [vmem:[%s6567_s30 + $0x9b0] sm:$0xf0]  ;;  %3448 = vmatpush.bf16.msra.mxu3 %v4219_v56 }
 0x186   : > { %v6327_v61 = vld [vmem:[%s6567_s30 + $0xa6c] sm:$0xf0]  ;;  %v5435_v51 = vor.u32 %v6299_v45, %v5432_v33  ;;  %v6227_v53 = vld [vmem:[%s6567_s30 + $0x754] sm:$0xf] }
 0x187   : > { %v5782_v62 = vld [vmem:[%s6567_s30 + $0xc50] sm:$0xf]  ;;  %v5527_v16 = vor.u32 %v6327_v61, %v5526_v58  ;;  %3408 = vmatpush.bf16.msra.mxu0 %v5271_v4  ;;  %v5144_v54 = vld [vmem:[%s6567_s30 + $0x770] sm:$0xf0]  ;;  %v4635_v58 = vor.u32 %v6099_v27, %v4632_v50 }
 0x188   : > { %v6391_v1 = vld [vmem:[%s6567_s30 + $0xc6c] sm:$0xf0]  ;;  %v6291_v55 = vld [vmem:[%s6567_s30 + $0x954] sm:$0xf]  ;;  %3449 = vmatmul.bf16.vlgmr.msra.gmra.mxu3 %v7028_v18  ;;  %v5147_v59 = vor.u32 %v6227_v53, %v5144_v54 }
 0x189   : > { %v5238_v30 = vld [vmem:[%s6567_s30 + $0x810] sm:$0xf]  ;;  %v5783_v8 = vor.u32 %v6391_v1, %v5782_v62  ;;  %3421 = vmatpush.bf16.msra.mxu1 %v5527_v16  ;;  %3493 = vmatpush.bf16.msrb.mxu3 %v5467_v32  ;;  %v5400_v57 = vld [vmem:[%s6567_s30 + $0x970] sm:$0xf0]  ;;  %v7264_v16 = vpop.f32.mrf.mxu0 }
 0x18a   : > { %v6255_v6 = vld [vmem:[%s6567_s30 + $0x82c] sm:$0xf0]  ;;  %v6091_v61 = vld [vmem:[%s6567_s30 + $0x314] sm:$0xf]  ;;  %v5403_v2 = vor.u32 %v6291_v55, %v5400_v57 }
 0x18b   : > { %v5494_v22 = vld [vmem:[%s6567_s30 + $0xa10] sm:$0xf]  ;;  %v5239_v25 = vor.u32 %v6255_v6, %v5238_v30  ;;  %3434 = vmatpush.bf16.msra.mxu2 %v5783_v8  ;;  %v4600_v62 = vld [vmem:[%s6567_s30 + $0x330] sm:$0xf0] }
 0x18c   : > { %v6319_v10 = vld [vmem:[%s6567_s30 + $0xa2c] sm:$0xf0]  ;;  %v6155_v1 = vld [vmem:[%s6567_s30 + $0x514] sm:$0xf]  ;;  %v4603_v18 = vor.u32 %v6091_v61, %v4600_v62 }
 0x18d   : > { %v5750_v23 = vld [vmem:[%s6567_s30 + $0xc10] sm:$0xf]  ;;  %v5495_v31 = vor.u32 %v6319_v10, %v5494_v22  ;;  %3409 = vmatpush.bf16.msra.mxu0 %v5239_v25  ;;  %3494 = vmatpush.bf16.msrb.mxu3 %v5435_v51  ;;  %v5112_v4 = vld [vmem:[%s6567_s30 + $0x730] sm:$0xf0]  ;;  %v4859_v8 = vor.u32 %v6155_v1, %v4856_v3 }
 0x18e   : > { %v6383_v11 = vld [vmem:[%s6567_s30 + $0xc2c] sm:$0xf0]  ;;  %v6283_v30 = vld [vmem:[%s6567_s30 + $0x914] sm:$0xf] }
 0x18f   : > { %v5751_v34 = vor.u32 %v6383_v11, %v5750_v23  ;;  %3422 = vmatpush.bf16.msra.mxu1 %v5495_v31  ;;  %v5368_v6 = vld [vmem:[%s6567_s30 + $0x930] sm:$0xf0]  ;;  %v7269_v11 = vpop.f32.mrf.mxu1 }
 0x190   : > { %3410 = vmatmul.bf16.vlgmr.msra.gmra.mxu0 %v7107_v7  ;;  %v6083_v10 = vld [vmem:[%s6567_s30 + $0x2d4] sm:$0xf]  ;;  %v5371_v12 = vor.u32 %v6283_v30, %v5368_v6 }
 0x191   : > { %3435 = vmatpush.bf16.msra.mxu2 %v5751_v34  ;;  %3454 = vmatpush.bf16.msrb.mxu0 %v4699_v37  ;;  %v4568_v23 = vld [vmem:[%s6567_s30 + $0x2f0] sm:$0xf0]  ;;  %v7279_v34 = vpop.f32.mrf.mxu2  ;;  %v3205_v42 = vpop.f32.mrf.mxu0 }
 0x192   : > { %3423 = vmatmul.bf16.vlgmr.msra.gmra.mxu1 %v7095_v0  ;;  %v6219_v0 = vld [vmem:[%s6567_s30 + $0x714] sm:$0xf]  ;;  %3495 = vmatpush.bf16.msrb.mxu3 %v5403_v2  ;;  %v4571_v24 = vor.u32 %v6083_v10, %v4568_v23 }
 0x193   : > { %3467 = vmatpush.bf16.msrb.mxu1 %v4955_v38  ;;  %v5115_v22 = vor.u32 %v6219_v0, %v5112_v4  ;;  %v6147_v15 = vld [vmem:[%s6567_s30 + $0x4d4] sm:$0xf]  ;;  %v7284_v38 = vpop.f32.mrf.mxu3 }
 0x194   : > { %3436 = vmatmul.bf16.vlgmr.msra.gmra.mxu2 %v7014_v9  ;;  %v4891_v9 = vor.u32 %v6163_v49, %v4888_v52  ;;  %v4824_v13 = vld [vmem:[%s6567_s30 + $0x4f0] sm:$0xf0] }
 0x195   : > { %3480 = vmatpush.bf16.msrb.mxu2 %v5211_v39  ;;  %3455 = vmatpush.bf16.msrb.mxu0 %v4667_v46  ;;  %v5336_v20 = vld [vmem:[%s6567_s30 + $0x8f0] sm:$0xf0]  ;;  %v4827_v25 = vor.u32 %v6147_v15, %v4824_v13  ;;  %v4702_v15 = vld [vmem:[%s6567_s30 + $0x3d8] sm:$0xf] }
 0x196   : > { %v6075_v28 = vld [vmem:[%s6567_s30 + $0x294] sm:$0xf]  ;;  %3496 = vmatpush.bf16.msrb.mxu3 %v5371_v12  ;;  %v5339_v35 = vor.u32 %v6275_v19, %v5336_v20  ;;  %v6120_v12 = vld [vmem:[%s6567_s30 + $0x3f4] sm:$0xf0] }
 0x197   : > { %3468 = vmatpush.bf16.msrb.mxu1 %v4923_v47  ;;  %v4536_v29 = vld [vmem:[%s6567_s30 + $0x2b0] sm:$0xf0]  ;;  %v3218_v33 = vpop.f32.mrf.mxu1 }
 0x198   : > { %v6139_v31 = vld [vmem:[%s6567_s30 + $0x494] sm:$0xf]  ;;  %v4539_v41 = vor.u32 %v6075_v28, %v4536_v29  ;;  %v4414_v29 = vld [vmem:[%s6567_s30 + $0x198] sm:$0xf] }
 0x199   : > { %3481 = vmatpush.bf16.msrb.mxu2 %v5179_v48  ;;  %3456 = vmatpush.bf16.msrb.mxu0 %v4635_v58  ;;  %v4792_v36 = vld [vmem:[%s6567_s30 + $0x4b0] sm:$0xf0]  ;;  %v4638_v33 = vld [vmem:[%s6567_s30 + $0x358] sm:$0xf] }
 0x19a   : > { %v6203_v56 = vld [vmem:[%s6567_s30 + $0x694] sm:$0xf]  ;;  %v4795_v32 = vor.u32 %v6139_v31, %v4792_v36  ;;  %3497 = vmatpush.bf16.msrb.mxu3 %v5339_v35  ;;  %v6048_v31 = vld [vmem:[%s6567_s30 + $0x1b4] sm:$0xf0] }
 0x19b   : > { %3469 = vmatpush.bf16.msrb.mxu1 %v4891_v9  ;;  %v5048_v37 = vld [vmem:[%s6567_s30 + $0x6b0] sm:$0xf0]  ;;  %v3244_v3 = vpop.f32.mrf.mxu3  ;;  %v4670_v35 = vld [vmem:[%s6567_s30 + $0x398] sm:$0xf] }
 0x19c   : > { %v6267_v39 = vld [vmem:[%s6567_s30 + $0x894] sm:$0xf]  ;;  %v5051_v43 = vor.u32 %v6203_v56, %v5048_v37  ;;  %v6112_v36 = vld [vmem:[%s6567_s30 + $0x3b4] sm:$0xf0] }
 0x19d   : > { %3482 = vmatpush.bf16.msrb.mxu2 %v5147_v59  ;;  %3457 = vmatpush.bf16.msrb.mxu0 %v4603_v18  ;;  %v5304_v40 = vld [vmem:[%s6567_s30 + $0x8b0] sm:$0xf0]  ;;  %v3231_v59 = vpop.f32.mrf.mxu2 }
 0x19e   : > { %v6067_v44 = vld [vmem:[%s6567_s30 + $0x254] sm:$0xf]  ;;  %v5307_v46 = vor.u32 %v6267_v39, %v5304_v40  ;;  %v4415_v39 = vor.u32 %v6048_v31, %v4414_v29 }
 0x19f   : > { %3470 = vmatpush.bf16.msrb.mxu1 %v4859_v8  ;;  %v4504_v21 = vld [vmem:[%s6567_s30 + $0x270] sm:$0xf0]  ;;  %v4446_v8 = vld [vmem:[%s6567_s30 + $0x1d8] sm:$0xf]  ;;  %v7349_v3 = vpop.f32.mrf.mxu1 }
 0x1a0   : > { %v6131_v45 = vld [vmem:[%s6567_s30 + $0x454] sm:$0xf]  ;;  %v4507_v51 = vor.u32 %v6067_v44, %v4504_v21  ;;  %3498 = vmatpush.bf16.msrb.mxu3 %v5307_v46  ;;  %v4382_v44 = vld [vmem:[%s6567_s30 + $0x158] sm:$0xf] }
 0x1a1   : > { %3483 = vmatpush.bf16.msrb.mxu2 %v5115_v22  ;;  %3458 = vmatpush.bf16.msrb.mxu0 %v4571_v24  ;;  %v4760_v47 = vld [vmem:[%s6567_s30 + $0x470] sm:$0xf0]  ;;  %v6056_v22 = vld [vmem:[%s6567_s30 + $0x1f4] sm:$0xf0] }
 0x1a2   : > { %v6195_v48 = vld [vmem:[%s6567_s30 + $0x654] sm:$0xf]  ;;  %v4763_v54 = vor.u32 %v6131_v45, %v4760_v47  ;;  %v4447_v19 = vor.u32 %v6056_v22, %v4446_v8  ;;  %v6040_v21 = vld [vmem:[%s6567_s30 + $0x174] sm:$0xf0]  ;;  %v7327_v45 = vld [vmem:[#allocation1 + $0x9] sm:$0xff] }
 0x1a3   : > { %3471 = vmatpush.bf16.msrb.mxu1 %v4827_v25  ;;  %v5016_v27 = vld [vmem:[%s6567_s30 + $0x670] sm:$0xf0]  ;;  %v6104_v46 = vld [vmem:[%s6567_s30 + $0x374] sm:$0xf0] }
 0x1a4   : > { %v6259_v50 = vld [vmem:[%s6567_s30 + $0x854] sm:$0xf]  ;;  %v5019_v55 = vor.u32 %v6195_v48, %v5016_v27  ;;  %v4383_v27 = vor.u32 %v6040_v21, %v4382_v44  ;;  %v6088_v8 = vld [vmem:[%s6567_s30 + $0x2f4] sm:$0xf0] }
 0x1a5   : > { %3484 = vmatpush.bf16.msrb.mxu2 %v5083_v26  ;;  %v5272_v49 = vld [vmem:[%s6567_s30 + $0x870] sm:$0xf0]  ;;  %3459 = vmatpush.bf16.msrb.mxu0 %v4539_v41  ;;  %v4703_v26 = vor.u32 %v6120_v12, %v4702_v15  ;;  %v4510_v44 = vld [vmem:[%s6567_s30 + $0x258] sm:$0xf] }
 0x1a6   : > { %v6059_v52 = vld [vmem:[%s6567_s30 + $0x214] sm:$0xf]  ;;  %v5275_v61 = vor.u32 %v6259_v50, %v5272_v49  ;;  %v6072_v21 = vld [vmem:[%s6567_s30 + $0x274] sm:$0xf0] }
 0x1a7   : > { %v4472_v53 = vld [vmem:[%s6567_s30 + $0x230] sm:$0xf0]  ;;  %3472 = vmatpush.bf16.msrb.mxu1 %v4795_v32  ;;  %v4671_v32 = vor.u32 %v6112_v36, %v4670_v35 }
 0x1a8   : > { %v6123_v57 = vld [vmem:[%s6567_s30 + $0x414] sm:$0xf]  ;;  %v4475_v6 = vor.u32 %v6059_v52, %v4472_v53  ;;  %3499 = vmatpush.bf16.msrb.mxu3 %v5275_v61  ;;  %v4350_v53 = vld [vmem:[%s6567_s30 + $0x118] sm:$0xf] }
 0x1a9   : > { %3485 = vmatpush.bf16.msrb.mxu2 %v5051_v43  ;;  %v4728_v58 = vld [vmem:[%s6567_s30 + $0x430] sm:$0xf0]  ;;  %3460 = vmatpush.bf16.msrb.mxu0 %v4507_v51  ;;  %v4639_v51 = vor.u32 %v6104_v46, %v4638_v33 }
 0x1aa   : > { %v6187_v9 = vld [vmem:[%s6567_s30 + $0x614] sm:$0xf]  ;;  %v4731_v10 = vor.u32 %v6123_v57, %v4728_v58  ;;  %v4606_v57 = vld [vmem:[%s6567_s30 + $0x318] sm:$0xf] }
 0x1ab   : > { %v4984_v62 = vld [vmem:[%s6567_s30 + $0x630] sm:$0xf0]  ;;  %3473 = vmatpush.bf16.msrb.mxu1 %v4763_v54  ;;  %v6032_v54 = vld [vmem:[%s6567_s30 + $0x134] sm:$0xf0] }
 0x1ac   : > { %v6251_v1 = vld [vmem:[%s6567_s30 + $0x814] sm:$0xf]  ;;  %v4987_v23 = vor.u32 %v6187_v9, %v4984_v62  ;;  %v6096_v58 = vld [vmem:[%s6567_s30 + $0x334] sm:$0xf0]  ;;  %v4351_v61 = vor.u32 %v6032_v54, %v4350_v53 }
 0x1ad   : > { %v5240_v2 = vld [vmem:[%s6567_s30 + $0x830] sm:$0xf0]  ;;  %3486 = vmatpush.bf16.msrb.mxu2 %v5019_v55  ;;  %3461 = vmatpush.bf16.msrb.mxu0 %v4475_v6  ;;  %v7342_v55 = vpop.f32.mrf.mxu0  ;;  %v6024_v6 = vld [vmem:[%s6567_s30 + $0xf4] sm:$0xf0] }
 0x1ae   : > { %v6371_v0 = vld [vmem:[%s6567_s30 + $0xbd4] sm:$0xf]  ;;  %v5243_v13 = vor.u32 %v6251_v1, %v5240_v2  ;;  %v4478_v53 = vld [vmem:[%s6567_s30 + $0x218] sm:$0xf] }
 0x1af   : > { %v5720_v4 = vld [vmem:[%s6567_s30 + $0xbf0] sm:$0xf0]  ;;  %3474 = vmatpush.bf16.msrb.mxu1 %v4731_v10  ;;  %v6064_v54 = vld [vmem:[%s6567_s30 + $0x234] sm:$0xf0] }
 0x1b0   : > { %v6435_v30 = vld [vmem:[%s6567_s30 + $0xdd4] sm:$0xf]  ;;  %v5723_v14 = vor.u32 %v6371_v0, %v5720_v4  ;;  %3500 = vmatpush.bf16.msrb.mxu3 %v5243_v13  ;;  %3462 = vmatmul.bf16.vlgmr.msrb.gmra.mxu0 %v7327_v45  ;;  %v4607_v0 = vor.u32 %v6096_v58, %v4606_v57 }
 0x1b1   : > { %v5976_v18 = vld [vmem:[%s6567_s30 + $0xdf0] sm:$0xf0]  ;;  %3487 = vmatpush.bf16.msrb.mxu2 %v4987_v23 }
 0x1b2   : > { %v5979_v17 = vor.u32 %v6435_v30, %v5976_v18  ;;  %v6363_v20 = vld [vmem:[%s6567_s30 + $0xb94] sm:$0xf]  ;;  %3506 = vmatpush.bf16.msra.mxu0 %v5723_v14  ;;  %v4318_v30 = vld [vmem:[%s6567_s30 + $0xd8] sm:$0xf] }
 0x1b3   : > { %v5688_v24 = vld [vmem:[%s6567_s30 + $0xbb0] sm:$0xf0]  ;;  %3501 = vmatmul.bf16.vlgmr.msrb.gmra.mxu3 %v7107_v7  ;;  %v4574_v18 = vld [vmem:[%s6567_s30 + $0x2d8] sm:$0xf]  ;;  %v4319_v23 = vor.u32 %v6024_v6, %v4318_v30 }
 0x1b4   : > { %v6427_v25 = vld [vmem:[%s6567_s30 + $0xd94] sm:$0xf]  ;;  %v5691_v56 = vor.u32 %v6363_v20, %v5688_v24  ;;  %3519 = vmatpush.bf16.msra.mxu1 %v5979_v17  ;;  %3545 = vmatpush.bf16.msra.mxu3 %v4703_v26  ;;  %v4575_v14 = vor.u32 %v6088_v8, %v4574_v18  ;;  %v6016_v20 = vld [vmem:[%s6567_s30 + $0xb4] sm:$0xf0]  ;;  %v7362_v24 = vpop.f32.mrf.mxu2  ;;  %v4479_v8 = vor.u32 %v6064_v54, %v4478_v53 }
 0x1b5   : > { %v5944_v28 = vld [vmem:[%s6567_s30 + $0xdb0] sm:$0xf0]  ;;  %3532 = vmatpush.bf16.msra.mxu2 %v4447_v19  ;;  %v4286_v19 = vld [vmem:[%s6567_s30 + $0x98] sm:$0xf]  ;;  %v3257_v29 = vpop.f32.mrf.mxu0 }
 0x1b6   : > { %v5947_v37 = vor.u32 %v6427_v25, %v5944_v28  ;;  %v6355_v40 = vld [vmem:[%s6567_s30 + $0xb54] sm:$0xf]  ;;  %3488 = vmatmul.bf16.vlgmr.msrb.gmra.mxu2 %v7101_v5  ;;  %3507 = vmatpush.bf16.msra.mxu0 %v5691_v56  ;;  %v7364_v25 = vpop.f32.mrf.mxu3  ;;  %v4542_v26 = vld [vmem:[%s6567_s30 + $0x298] sm:$0xf]  ;;  %v4287_v36 = vor.u32 %v6016_v20, %v4286_v19 }
 0x1b7   : > { %v5656_v41 = vld [vmem:[%s6567_s30 + $0xb70] sm:$0xf0]  ;;  %v6080_v28 = vld [vmem:[%s6567_s30 + $0x2b4] sm:$0xf0] }
 0x1b8   : > { %v6419_v42 = vld [vmem:[%s6567_s30 + $0xd54] sm:$0xf]  ;;  %v5659_v47 = vor.u32 %v6355_v40, %v5656_v41  ;;  %3520 = vmatpush.bf16.msra.mxu1 %v5947_v37  ;;  %3546 = vmatpush.bf16.msra.mxu3 %v4671_v32  ;;  %v3270_v40 = vpop.f32.mrf.mxu1  ;;  %v4543_v41 = vor.u32 %v6080_v28, %v4542_v26  ;;  %v4254_v32 = vld [vmem:[%s6567_s30 + $0x58] sm:$0xf] }
 0x1b9   : > { %v5912_v43 = vld [vmem:[%s6567_s30 + $0xd70] sm:$0xf0]  ;;  %3533 = vmatpush.bf16.msra.mxu2 %v4415_v39  ;;  %v5726_v6 = vld [vmem:[%s6567_s30 + $0xbd8] sm:$0xf] }
 0x1ba   : > { %v7333_v5 = vld [vmem:[#allocation1 + $0x12] sm:$0xff]  ;;  %v5915_v48 = vor.u32 %v6419_v42, %v5912_v43  ;;  %3508 = vmatpush.bf16.msra.mxu0 %v5659_v47 }
 0x1bb   : > { %3475 = vmatmul.bf16.vlgmr.msrb.gmra.mxu1 %v7333_v5  ;;  %v6347_v50 = vld [vmem:[%s6567_s30 + $0xb14] sm:$0xf]  ;;  %v6008_v43 = vld [vmem:[%s6567_s30 + $0x74] sm:$0xf0] }
 0x1bc   : > { %v5624_v49 = vld [vmem:[%s6567_s30 + $0xb30] sm:$0xf0]  ;;  %3521 = vmatpush.bf16.msra.mxu1 %v5915_v48  ;;  %3547 = vmatpush.bf16.msra.mxu3 %v4639_v51  ;;  %v4511_v51 = vor.u32 %v6072_v21, %v4510_v44  ;;  %v3283_v57 = vpop.f32.mrf.mxu2  ;;  %v6376_v18 = vld [vmem:[%s6567_s30 + $0xbf4] sm:$0xf0]  ;;  %v7419_v21 = vld [vmem:[#allocation1] sm:$0xff] }
 0x1bd   : > { %v6411_v7 = vld [vmem:[%s6567_s30 + $0xd14] sm:$0xf]  ;;  %v5627_v9 = vor.u32 %v6347_v50, %v5624_v49  ;;  %3534 = vmatpush.bf16.msra.mxu2 %v4383_v27  ;;  %v4255_v27 = vor.u32 %v6008_v43, %v4254_v32  ;;  %v6240_v19 = vld [vmem:[%s6567_s30 + $0x7b4] sm:$0xf0] }
 0x1be   : > { %v5880_v52 = vld [vmem:[%s6567_s30 + $0xd30] sm:$0xf0]  ;;  %v3296_v58 = vpop.f32.mrf.mxu3  ;;  %v5438_v20 = vld [vmem:[%s6567_s30 + $0x998] sm:$0xf] }
 0x1bf   : > { %v5883_v59 = vor.u32 %v6411_v7, %v5880_v52  ;;  %v6339_v62 = vld [vmem:[%s6567_s30 + $0xad4] sm:$0xf]  ;;  %3509 = vmatpush.bf16.msra.mxu0 %v5627_v9  ;;  %v4222_v7 = vld [vmem:[%s6567_s30 + $0x18] sm:$0xf]  ;;  %v3307_v58 = vpop.f32.mrf.mxu0 }
 0x1c0   : > { %v5592_v1 = vld [vmem:[%s6567_s30 + $0xaf0] sm:$0xf0]  ;;  %3548 = vmatpush.bf16.msra.mxu3 %v4607_v0  ;;  %v6000_v52 = vld [vmem:[%s6567_s30 + $0x34] sm:$0xf0] }
 0x1c1   : > { %v6403_v2 = vld [vmem:[%s6567_s30 + $0xcd4] sm:$0xf]  ;;  %v5595_v22 = vor.u32 %v6339_v62, %v5592_v1  ;;  %3522 = vmatpush.bf16.msra.mxu1 %v5883_v59  ;;  %3535 = vmatpush.bf16.msra.mxu2 %v4351_v61  ;;  %v4958_v9 = vld [vmem:[%s6567_s30 + $0x5d8] sm:$0xf]  ;;  %v4223_v30 = vor.u32 %v6000_v52, %v4222_v7 }
 0x1c2   : > { %v5848_v4 = vld [vmem:[%s6567_s30 + $0xcf0] sm:$0xf0]  ;;  %v6184_v59 = vld [vmem:[%s6567_s30 + $0x5f4] sm:$0xf0] }
 0x1c3   : > { %v5851_v10 = vor.u32 %v6403_v2, %v5848_v4  ;;  %v6331_v15 = vld [vmem:[%s6567_s30 + $0xa94] sm:$0xf]  ;;  %3510 = vmatpush.bf16.msra.mxu0 %v5595_v22  ;;  %v5214_v61 = vld [vmem:[%s6567_s30 + $0x7d8] sm:$0xf]  ;;  %v4959_v22 = vor.u32 %v6184_v59, %v4958_v9 }
 0x1c4   : > { %v5560_v12 = vld [vmem:[%s6567_s30 + $0xab0] sm:$0xf0]  ;;  %3549 = vmatpush.bf16.msra.mxu3 %v4575_v14  ;;  %v6248_v1 = vld [vmem:[%s6567_s30 + $0x7f4] sm:$0xf0]  ;;  %v3204_v14 = vadd.f32 %v7264_v16, %v7210_v60  ;;  %v3282_v60 = vadd.f32 %v7362_v24, %v7349_v3 }
 0x1c5   : > { %v6395_v13 = vld [vmem:[%s6567_s30 + $0xc94] sm:$0xf]  ;;  %v5563_v31 = vor.u32 %v6331_v15, %v5560_v12  ;;  %3523 = vmatpush.bf16.msra.mxu1 %v5851_v10  ;;  %3536 = vmatpush.bf16.msra.mxu2 %v4319_v23  ;;  %v5470_v2 = vld [vmem:[%s6567_s30 + $0x9d8] sm:$0xf]  ;;  %v5215_v10 = vor.u32 %v6248_v1, %v5214_v61  ;;  %v3320_v61 = vpop.f32.mrf.mxu1 }
 0x1c6   : > { %v5816_v17 = vld [vmem:[%s6567_s30 + $0xcb0] sm:$0xf0]  ;;  %v6312_v0 = vld [vmem:[%s6567_s30 + $0x9f4] sm:$0xf0] }
 0x1c7   : > { %v5819_v35 = vor.u32 %v6395_v13, %v5816_v17  ;;  %v6323_v56 = vld [vmem:[%s6567_s30 + $0xa54] sm:$0xf]  ;;  %3511 = vmatpush.bf16.msra.mxu0 %v5563_v31  ;;  %v5471_v23 = vor.u32 %v6312_v0, %v5470_v2  ;;  %v4926_v15 = vld [vmem:[%s6567_s30 + $0x598] sm:$0xf]  ;;  %v5727_v17 = vor.u32 %v6376_v18, %v5726_v6 }
 0x1c8   : > { %v5528_v37 = vld [vmem:[%s6567_s30 + $0xa70] sm:$0xf0]  ;;  %3550 = vmatpush.bf16.msra.mxu3 %v4543_v41  ;;  %v6176_v12 = vld [vmem:[%s6567_s30 + $0x5b4] sm:$0xf0] }
 0x1c9   : > { %v6387_v39 = vld [vmem:[%s6567_s30 + $0xc54] sm:$0xf]  ;;  %v5531_v33 = vor.u32 %v6323_v56, %v5528_v37  ;;  %3524 = vmatpush.bf16.msra.mxu1 %v5819_v35  ;;  %3537 = vmatpush.bf16.msra.mxu2 %v4287_v36  ;;  %v5182_v13 = vld [vmem:[%s6567_s30 + $0x798] sm:$0xf]  ;;  %v4927_v31 = vor.u32 %v6176_v12, %v4926_v15 }
 0x1ca   : > { %v5784_v42 = vld [vmem:[%s6567_s30 + $0xc70] sm:$0xf0]  ;;  %v6304_v26 = vld [vmem:[%s6567_s30 + $0x9b4] sm:$0xf0]  ;;  %v5183_v16 = vor.u32 %v6240_v19, %v5182_v13  ;;  %v3333_v13 = vpop.f32.mrf.mxu2 }
 0x1cb   : > { %v6315_v46 = vld [vmem:[%s6567_s30 + $0xa14] sm:$0xf]  ;;  %v5787_v48 = vor.u32 %v6387_v39, %v5784_v42  ;;  %3512 = vmatpush.bf16.msra.mxu0 %v5531_v33  ;;  %v5694_v28 = vld [vmem:[%s6567_s30 + $0xb98] sm:$0xf]  ;;  %v5439_v35 = vor.u32 %v6304_v26, %v5438_v20  ;;  %v3217_v39 = vadd.f32 %v7269_v11, %v3204_v14  ;;  %v3295_v33 = vadd.f32 %v7364_v25, %v3282_v60 }
 0x1cc   : > { %v5496_v47 = vld [vmem:[%s6567_s30 + $0xa30] sm:$0xf0]  ;;  %3551 = vmatpush.bf16.msra.mxu3 %v4511_v51  ;;  %v6368_v29 = vld [vmem:[%s6567_s30 + $0xbb4] sm:$0xf0] }
 0x1cd   : > { %v6379_v50 = vld [vmem:[%s6567_s30 + $0xc14] sm:$0xf]  ;;  %v5499_v62 = vor.u32 %v6315_v46, %v5496_v47  ;;  %3525 = vmatpush.bf16.msra.mxu1 %v5787_v48  ;;  %3538 = vmatpush.bf16.msra.mxu2 %v4255_v27  ;;  %v4894_v36 = vld [vmem:[%s6567_s30 + $0x558] sm:$0xf]  ;;  %v5695_v41 = vor.u32 %v6368_v29, %v5694_v28  ;;  %v3308_v59 = vadd.f32 %v3307_v58, %v3295_v33  ;;  %v3346_v28 = vpop.f32.mrf.mxu3 }
 0x1ce   : > { %v5752_v49 = vld [vmem:[%s6567_s30 + $0xc30] sm:$0xf0]  ;;  %v6168_v56 = vld [vmem:[%s6567_s30 + $0x574] sm:$0xf0] }
 0x1cf   : > { %v5755_v4 = vor.u32 %v6379_v50, %v5752_v49  ;;  %3513 = vmatpush.bf16.msra.mxu0 %v5499_v62  ;;  %v5150_v37 = vld [vmem:[%s6567_s30 + $0x758] sm:$0xf]  ;;  %v7408_v40 = vld [vmem:[#allocation1 + $0x2d] sm:$0xff]  ;;  %v4895_v11 = vor.u32 %v6168_v56, %v4894_v36  ;;  %v3230_v49 = vadd.f32 %v7279_v34, %v3217_v39  ;;  %v3309_v39 = vpop.f32.mrf.mxu0 }
 0x1d0   : > { %3552 = vmatpush.bf16.msra.mxu3 %v4479_v8  ;;  %v6232_v42 = vld [vmem:[%s6567_s30 + $0x774] sm:$0xf0]  ;;  %v3321_v8 = vadd.f32 %v3320_v61, %v3308_v59 }
 0x1d1   : > { %3526 = vmatpush.bf16.msra.mxu1 %v5755_v4  ;;  %3539 = vmatpush.bf16.msra.mxu2 %v4223_v30  ;;  %v5406_v32 = vld [vmem:[%s6567_s30 + $0x958] sm:$0xf]  ;;  %v5151_v46 = vor.u32 %v6232_v42, %v5150_v37  ;;  %v3243_v0 = vadd.f32 %v7284_v38, %v3230_v49 }
 0x1d2   : > { %3514 = vmatmul.bf16.vlgmr.msra.gmra.mxu0 %v7408_v40  ;;  %v6296_v43 = vld [vmem:[%s6567_s30 + $0x974] sm:$0xf0]  ;;  %v3334_v26 = vadd.f32 %v3333_v13, %v3321_v8  ;;  %v3335_v59 = vpop.f32.mrf.mxu2  ;;  %v6116_v8 = vld [vmem:[%s6567_s30 + $0x3dc] sm:$0xf] }
 0x1d3   : > { %3558 = vmatpush.bf16.msrb.mxu0 %v4959_v22  ;;  %v7414_v3 = vld [vmem:[#allocation1 + $0x36] sm:$0xff]  ;;  %3553 = vmatmul.bf16.vlgmr.msra.gmra.mxu3 %v7327_v45  ;;  %v5407_v47 = vor.u32 %v6296_v43, %v5406_v32 }
 0x1d4   : > { %3597 = vmatpush.bf16.msrb.mxu3 %v5727_v17  ;;  %3527 = vmatmul.bf16.vlgmr.msra.gmra.mxu1 %v7414_v3  ;;  %v5662_v24 = vld [vmem:[%s6567_s30 + $0xb58] sm:$0xf]  ;;  %v3347_v36 = vadd.f32 %v3346_v28, %v3334_v26  ;;  %v6044_v26 = vld [vmem:[%s6567_s30 + $0x19c] sm:$0xf] }
 0x1d5   : > { %3571 = vmatpush.bf16.msrb.mxu1 %v5215_v10  ;;  %3584 = vmatpush.bf16.msrb.mxu2 %v5471_v23  ;;  %v6360_v44 = vld [vmem:[%s6567_s30 + $0xb74] sm:$0xf0]  ;;  %v3256_v23 = vadd.f32 %v7342_v55, %v3243_v0  ;;  %v3348_v0 = vpop.f32.mrf.mxu3 }
 0x1d6   : > { %3540 = vmatmul.bf16.vlgmr.msra.gmra.mxu2 %v7419_v21  ;;  %v4862_v48 = vld [vmem:[%s6567_s30 + $0x518] sm:$0xf]  ;;  %v5663_v7 = vor.u32 %v6360_v44, %v5662_v24  ;;  %v3322_v44 = vpop.f32.mrf.mxu1 }
 0x1d7   : > { %3559 = vmatpush.bf16.msrb.mxu0 %v4927_v31  ;;  %v6160_v27 = vld [vmem:[%s6567_s30 + $0x534] sm:$0xf0]  ;;  %v4640_v44 = vld [vmem:[%s6567_s30 + $0x378] sm:$0xf0] }
 0x1d8   : > { %v5118_v50 = vld [vmem:[%s6567_s30 + $0x718] sm:$0xf]  ;;  %3598 = vmatpush.bf16.msrb.mxu3 %v5695_v41  ;;  %v4863_v25 = vor.u32 %v6160_v27, %v4862_v48  ;;  %v279_v48 = vld [vmem:[#allocation2] sm:$0xff] }
 0x1d9   : > { %3572 = vmatpush.bf16.msrb.mxu1 %v5183_v16  ;;  %3585 = vmatpush.bf16.msrb.mxu2 %v5439_v35  ;;  %v6224_v51 = vld [vmem:[%s6567_s30 + $0x734] sm:$0xf0]  ;;  %v3723_v35 = vrot.slane %v3256_v23, 4 }
 0x1da   : > { %v5374_v52 = vld [vmem:[%s6567_s30 + $0x918] sm:$0xf]  ;;  %v5119_v34 = vor.u32 %v6224_v51, %v5118_v50 }
 0x1db   : > { %v6288_v53 = vld [vmem:[%s6567_s30 + $0x934] sm:$0xf0]  ;;  %3560 = vmatpush.bf16.msrb.mxu0 %v4895_v11  ;;  %v3724_v11 = vrot.slane %v3347_v36, 2 }
 0x1dc   : > { %v5630_v54 = vld [vmem:[%s6567_s30 + $0xb18] sm:$0xf]  ;;  %v5375_v9 = vor.u32 %v6288_v53, %v5374_v52  ;;  %3599 = vmatpush.bf16.msrb.mxu3 %v5663_v7 }
 0x1dd   : > { %v6352_v57 = vld [vmem:[%s6567_s30 + $0xb34] sm:$0xf0]  ;;  %3573 = vmatpush.bf16.msrb.mxu1 %v5151_v46  ;;  %3586 = vmatpush.bf16.msrb.mxu2 %v5407_v47  ;;  %v3731_v49 = vsel %vm3730_vm1, %v3723_v35, %v3724_v11  ;;  %v6164_v11 = vld [vmem:[%s6567_s30 + $0x55c] sm:$0xf] }
 0x1de   : > { %v4830_v62 = vld [vmem:[%s6567_s30 + $0x4d8] sm:$0xf]  ;;  %v5631_v4 = vor.u32 %v6352_v57, %v5630_v54  ;;  %v3733_v54 = vsel %vm3732_vm2, %v7203_v63, %v3731_v49 }
 0x1df   : > { %v6152_v1 = vld [vmem:[%s6567_s30 + $0x4f4] sm:$0xf0]  ;;  %3561 = vmatpush.bf16.msrb.mxu0 %v4863_v25  ;;  %v3739_v61 = vadd.f32 %v3733_v54, %v279_v48  ;;  %v4608_v54 = vld [vmem:[%s6567_s30 + $0x338] sm:$0xf0] }
 0x1e0   : > { %v5086_v2 = vld [vmem:[%s6567_s30 + $0x6d8] sm:$0xf]  ;;  %v4831_v15 = vor.u32 %v6152_v1, %v4830_v62  ;;  %3600 = vmatpush.bf16.msrb.mxu3 %v5631_v4 }
 0x1e1   : > { %v6216_v30 = vld [vmem:[%s6567_s30 + $0x6f4] sm:$0xf0]  ;;  %3574 = vmatpush.bf16.msrb.mxu1 %v5119_v34  ;;  %3587 = vmatpush.bf16.msrb.mxu2 %v5375_v9  ;;  %3741 = vst [vmem:[#allocation2] sm:$0xff] %v3739_v61 }
 0x1e2   : > { %v5342_v6 = vld [vmem:[%s6567_s30 + $0x8d8] sm:$0xf]  ;;  %v5087_v38 = vor.u32 %v6216_v30, %v5086_v2  ;;  %v6052_v30 = vld [vmem:[%s6567_s30 + $0x1dc] sm:$0xf] }
 0x1e3   : > { %v6280_v18 = vld [vmem:[%s6567_s30 + $0x8f4] sm:$0xf0]  ;;  %3562 = vmatpush.bf16.msrb.mxu0 %v4831_v15  ;;  %v6180_v15 = vld [vmem:[%s6567_s30 + $0x5dc] sm:$0xf] }
 0x1e4   : > { %v5598_v22 = vld [vmem:[%s6567_s30 + $0xad8] sm:$0xf]  ;;  %v5343_v12 = vor.u32 %v6280_v18, %v5342_v6  ;;  %v4448_v6 = vld [vmem:[%s6567_s30 + $0x1f8] sm:$0xf0] }
 0x1e5   : > { %v6344_v10 = vld [vmem:[%s6567_s30 + $0xaf4] sm:$0xf0]  ;;  %3575 = vmatpush.bf16.msrb.mxu1 %v5087_v38  ;;  %v4960_v38 = vld [vmem:[%s6567_s30 + $0x5f8] sm:$0xf0] }
 0x1e6   : > { %v4798_v14 = vld [vmem:[%s6567_s30 + $0x498] sm:$0xf]  ;;  %v5599_v20 = vor.u32 %v6344_v10, %v5598_v22  ;;  %3588 = vmatpush.bf16.msrb.mxu2 %v5343_v12  ;;  %v4704_v22 = vld [vmem:[%s6567_s30 + $0x3f8] sm:$0xf0]  ;;  %v4963_v28 = vor.u32 %v6180_v15, %v4960_v38 }
 0x1e7   : > { %v6144_v17 = vld [vmem:[%s6567_s30 + $0x4b4] sm:$0xf0] }
 0x1e8   : > { %v5054_v19 = vld [vmem:[%s6567_s30 + $0x698] sm:$0xf]  ;;  %v4799_v56 = vor.u32 %v6144_v17, %v4798_v14  ;;  %3601 = vmatpush.bf16.msrb.mxu3 %v5599_v20  ;;  %v4451_v14 = vor.u32 %v6052_v30, %v4448_v6  ;;  %v4707_v17 = vor.u32 %v6116_v8, %v4704_v22  ;;  %v6084_v30 = vld [vmem:[%s6567_s30 + $0x2dc] sm:$0xf] }
 0x1e9   : > { %v6208_v55 = vld [vmem:[%s6567_s30 + $0x6b4] sm:$0xf0]  ;;  %v4576_v6 = vld [vmem:[%s6567_s30 + $0x2f8] sm:$0xf0] }
 0x1ea   : > { %v5310_v29 = vld [vmem:[%s6567_s30 + $0x898] sm:$0xf]  ;;  %v5055_v41 = vor.u32 %v6208_v55, %v5054_v19  ;;  %3563 = vmatpush.bf16.msrb.mxu0 %v4799_v56  ;;  %v4416_v55 = vld [vmem:[%s6567_s30 + $0x1b8] sm:$0xf0] }
 0x1eb   : > { %v6272_v31 = vld [vmem:[%s6567_s30 + $0x8b4] sm:$0xf0]  ;;  %v4419_v36 = vor.u32 %v6044_v26, %v4416_v55  ;;  %v4832_v8 = vld [vmem:[%s6567_s30 + $0x4f8] sm:$0xf0] }
 0x1ec   : > { %v5566_v60 = vld [vmem:[%s6567_s30 + $0xa98] sm:$0xf]  ;;  %v5311_v42 = vor.u32 %v6272_v31, %v5310_v29  ;;  %3576 = vmatpush.bf16.msrb.mxu1 %v5055_v41  ;;  %v6108_v29 = vld [vmem:[%s6567_s30 + $0x39c] sm:$0xf] }
 0x1ed   : > { %v6336_v16 = vld [vmem:[%s6567_s30 + $0xab4] sm:$0xf0]  ;;  %v4672_v31 = vld [vmem:[%s6567_s30 + $0x3b8] sm:$0xf0] }
 0x1ee   : > { %v4766_v37 = vld [vmem:[%s6567_s30 + $0x458] sm:$0xf]  ;;  %v5567_v33 = vor.u32 %v6336_v16, %v5566_v60  ;;  %3589 = vmatpush.bf16.msrb.mxu2 %v5311_v42  ;;  %v6172_v60 = vld [vmem:[%s6567_s30 + $0x59c] sm:$0xf]  ;;  %v4675_v56 = vor.u32 %v6108_v29, %v4672_v31  ;;  %v3398_v29 = vpop.f32.mrf.mxu3 }
 0x1ef   : > { %v6136_v32 = vld [vmem:[%s6567_s30 + $0x474] sm:$0xf0]  ;;  %v4928_v16 = vld [vmem:[%s6567_s30 + $0x5b8] sm:$0xf0] }
 0x1f0   : > { %v5022_v43 = vld [vmem:[%s6567_s30 + $0x658] sm:$0xf]  ;;  %v4767_v7 = vor.u32 %v6136_v32, %v4766_v37  ;;  %3602 = vmatpush.bf16.msrb.mxu3 %v5567_v33  ;;  %v6036_v41 = vld [vmem:[%s6567_s30 + $0x15c] sm:$0xf]  ;;  %v4931_v42 = vor.u32 %v6172_v60, %v4928_v16  ;;  %v7489_v32 = vld [vmem:[#allocation1 + $0x24] sm:$0xff] }
 0x1f1   : > { %v6200_v24 = vld [vmem:[%s6567_s30 + $0x674] sm:$0xf0]  ;;  %v4896_v33 = vld [vmem:[%s6567_s30 + $0x578] sm:$0xf0] }
 0x1f2   : > { %v5278_v46 = vld [vmem:[%s6567_s30 + $0x858] sm:$0xf]  ;;  %v5023_v57 = vor.u32 %v6200_v24, %v5022_v43  ;;  %3564 = vmatpush.bf16.msrb.mxu0 %v4767_v7  ;;  %v4384_v43 = vld [vmem:[%s6567_s30 + $0x178] sm:$0xf0] }
 0x1f3   : > { %v6264_v47 = vld [vmem:[%s6567_s30 + $0x874] sm:$0xf0]  ;;  %v6100_v24 = vld [vmem:[%s6567_s30 + $0x35c] sm:$0xf]  ;;  %v4387_v48 = vor.u32 %v6036_v41, %v4384_v43 }
 0x1f4   : > { %v5534_v27 = vld [vmem:[%s6567_s30 + $0xa58] sm:$0xf]  ;;  %v5279_v25 = vor.u32 %v6264_v47, %v5278_v46  ;;  %3577 = vmatpush.bf16.msrb.mxu1 %v5023_v57  ;;  %v6028_v7 = vld [vmem:[%s6567_s30 + $0x11c] sm:$0xf] }
 0x1f5   : > { %v6328_v50 = vld [vmem:[%s6567_s30 + $0xa74] sm:$0xf0]  ;;  %v6156_v57 = vld [vmem:[%s6567_s30 + $0x51c] sm:$0xf] }
 0x1f6   : > { %v4734_v51 = vld [vmem:[%s6567_s30 + $0x418] sm:$0xf]  ;;  %v5535_v62 = vor.u32 %v6328_v50, %v5534_v27  ;;  %3590 = vmatpush.bf16.msrb.mxu2 %v5279_v25  ;;  %v4643_v27 = vor.u32 %v6100_v24, %v4640_v44  ;;  %v4864_v25 = vld [vmem:[%s6567_s30 + $0x538] sm:$0xf0] }
 0x1f7   : > { %v6128_v52 = vld [vmem:[%s6567_s30 + $0x434] sm:$0xf0]  ;;  %v4867_v0 = vor.u32 %v6156_v57, %v4864_v25  ;;  %v4800_v55 = vld [vmem:[%s6567_s30 + $0x4b8] sm:$0xf0] }
 0x1f8   : > { %v4990_v53 = vld [vmem:[%s6567_s30 + $0x618] sm:$0xf]  ;;  %v4735_v18 = vor.u32 %v6128_v52, %v4734_v51  ;;  %3603 = vmatpush.bf16.msrb.mxu3 %v5535_v62  ;;  %v4899_v51 = vor.u32 %v6164_v11, %v4896_v33  ;;  %v4352_v52 = vld [vmem:[%s6567_s30 + $0x138] sm:$0xf0] }
 0x1f9   : > { %v6192_v58 = vld [vmem:[%s6567_s30 + $0x634] sm:$0xf0]  ;;  %v4355_v59 = vor.u32 %v6028_v7, %v4352_v52  ;;  %v6004_v41 = vld [vmem:[%s6567_s30 + $0x5c] sm:$0xf] }
 0x1fa   : > { %v5246_v34 = vld [vmem:[%s6567_s30 + $0x818] sm:$0xf]  ;;  %v4991_v10 = vor.u32 %v6192_v58, %v4990_v53  ;;  %3565 = vmatpush.bf16.msrb.mxu0 %v4735_v18  ;;  %v6092_v53 = vld [vmem:[%s6567_s30 + $0x31c] sm:$0xf] }
 0x1fb   : > { %v6256_v9 = vld [vmem:[%s6567_s30 + $0x834] sm:$0xf0]  ;;  %v4611_v61 = vor.u32 %v6092_v53, %v4608_v54  ;;  %v6148_v18 = vld [vmem:[%s6567_s30 + $0x4dc] sm:$0xf] }
 0x1fc   : > { %v5502_v1 = vld [vmem:[%s6567_s30 + $0xa18] sm:$0xf]  ;;  %v5247_v23 = vor.u32 %v6256_v9, %v5246_v34  ;;  %3578 = vmatpush.bf16.msrb.mxu1 %v4991_v10  ;;  %v3359_v34 = vpop.f32.mrf.mxu0  ;;  %v3372_v9 = vpop.f32.mrf.mxu1  ;;  %v4256_v43 = vld [vmem:[%s6567_s30 + $0x78] sm:$0xf0] }
 0x1fd   : > { %v6320_v2 = vld [vmem:[%s6567_s30 + $0xa34] sm:$0xf0]  ;;  %3566 = vmatmul.bf16.vlgmr.msrb.gmra.mxu0 %v7333_v5  ;;  %v6068_v24 = vld [vmem:[%s6567_s30 + $0x25c] sm:$0xf] }
 0x1fe   : > { %v5982_v63 = vld [vmem:[%s6567_s30 + $0xdd8] sm:$0xf]  ;;  %v5503_v12 = vor.u32 %v6320_v2, %v5502_v1  ;;  %3591 = vmatpush.bf16.msrb.mxu2 %v5247_v23  ;;  %v6020_v2 = vld [vmem:[%s6567_s30 + $0xdc] sm:$0xf]  ;;  %v4579_v23 = vor.u32 %v6084_v30, %v4576_v6 }
 0x1ff   : > { %v6440_v4 = vld [vmem:[%s6567_s30 + $0xdf4] sm:$0xf0]  ;;  %v4512_v44 = vld [vmem:[%s6567_s30 + $0x278] sm:$0xf0] }
 0x200   : > { %v5983_v13 = vor.u32 %v6440_v4, %v5982_v63  ;;  %v5950_v19 = vld [vmem:[%s6567_s30 + $0xd98] sm:$0xf]  ;;  %3604 = vmatpush.bf16.msrb.mxu3 %v5503_v12  ;;  %3623 = vmatpush.bf16.msra.mxu1 %v4451_v14  ;;  %v3373_v63 = vadd.f32 %v3372_v9, %v3359_v34  ;;  %v4320_v4 = vld [vmem:[%s6567_s30 + $0xf8] sm:$0xf0]  ;;  %v4835_v14 = vor.u32 %v6148_v18, %v4832_v8 }
 0x201   : > { %v6432_v20 = vld [vmem:[%s6567_s30 + $0xdb4] sm:$0xf0]  ;;  %3592 = vmatmul.bf16.vlgmr.msrb.gmra.mxu2 %v7489_v32  ;;  %v4323_v10 = vor.u32 %v6020_v2, %v4320_v4  ;;  %v6012_v12 = vld [vmem:[%s6567_s30 + $0x9c] sm:$0xf] }
 0x202   : > { %3610 = vmatpush.bf16.msra.mxu0 %v5983_v13  ;;  %v5951_v35 = vor.u32 %v6432_v20, %v5950_v19  ;;  %3636 = vmatpush.bf16.msra.mxu2 %v4707_v17  ;;  %v5918_v37 = vld [vmem:[%s6567_s30 + $0xd58] sm:$0xf]  ;;  %v3385_v13 = vpop.f32.mrf.mxu2  ;;  %v4288_v17 = vld [vmem:[%s6567_s30 + $0xb8] sm:$0xf0] }
 0x203   : > { %v6424_v39 = vld [vmem:[%s6567_s30 + $0xd74] sm:$0xf0]  ;;  %3605 = vmatmul.bf16.vlgmr.msrb.gmra.mxu3 %v7408_v40  ;;  %v6076_v19 = vld [vmem:[%s6567_s30 + $0x29c] sm:$0xf]  ;;  %v3386_v26 = vadd.f32 %v3385_v13, %v3373_v63 }
 0x204   : > { %3649 = vmatpush.bf16.msra.mxu3 %v4963_v28  ;;  %v5919_v46 = vor.u32 %v6424_v39, %v5918_v37  ;;  %v7499_v47 = vld [vmem:[#allocation1 + $0x1b] sm:$0xff]  ;;  %3624 = vmatpush.bf16.msra.mxu1 %v4419_v36  ;;  %v3361_v60 = vpop.f32.mrf.mxu0  ;;  %v4291_v36 = vor.u32 %v6012_v12, %v4288_v17 }
 0x205   : > { %3579 = vmatmul.bf16.vlgmr.msrb.gmra.mxu1 %v7499_v47  ;;  %v5886_v50 = vld [vmem:[%s6567_s30 + $0xd18] sm:$0xf]  ;;  %v4544_v20 = vld [vmem:[%s6567_s30 + $0x2b8] sm:$0xf0]  ;;  %v7526_v16 = vadd.f32 %v3398_v29, %v3386_v26 }
 0x206   : > { %3611 = vmatpush.bf16.msra.mxu0 %v5951_v35  ;;  %3637 = vmatpush.bf16.msra.mxu2 %v4675_v56  ;;  %v6416_v49 = vld [vmem:[%s6567_s30 + $0xd34] sm:$0xf0]  ;;  %v6140_v28 = vld [vmem:[%s6567_s30 + $0x49c] sm:$0xf]  ;;  %v3374_v35 = vpop.f32.mrf.mxu1  ;;  %v4547_v56 = vor.u32 %v6076_v19, %v4544_v20 }
 0x207   : > { %v5887_v58 = vor.u32 %v6416_v49, %v5886_v50  ;;  %v5854_v62 = vld [vmem:[%s6567_s30 + $0xcd8] sm:$0xf]  ;;  %v6132_v11 = vld [vmem:[%s6567_s30 + $0x45c] sm:$0xf]  ;;  %v4259_v50 = vor.u32 %v6004_v41, %v4256_v43  ;;  %v4515_v49 = vor.u32 %v6068_v24, %v4512_v44 }
 0x208   : > { %3650 = vmatpush.bf16.msra.mxu3 %v4931_v42  ;;  %3625 = vmatpush.bf16.msra.mxu1 %v4387_v48  ;;  %v6408_v1 = vld [vmem:[%s6567_s30 + $0xcf4] sm:$0xf0]  ;;  %v4803_v42 = vor.u32 %v6140_v28, %v4800_v55  ;;  %v4768_v33 = vld [vmem:[%s6567_s30 + $0x478] sm:$0xf0] }
 0x209   : > { %v5855_v22 = vor.u32 %v6408_v1, %v5854_v62  ;;  %v5822_v15 = vld [vmem:[%s6567_s30 + $0xc98] sm:$0xf]  ;;  %v5996_v7 = vld [vmem:[%s6567_s30 + $0x1c] sm:$0xf]  ;;  %v4771_v54 = vor.u32 %v6132_v11, %v4768_v33 }
 0x20a   : > { %3612 = vmatpush.bf16.msra.mxu0 %v5919_v46  ;;  %3638 = vmatpush.bf16.msra.mxu2 %v4643_v27  ;;  %v6400_v38 = vld [vmem:[%s6567_s30 + $0xcb4] sm:$0xf0]  ;;  %v6060_v52 = vld [vmem:[%s6567_s30 + $0x21c] sm:$0xf]  ;;  %v3387_v53 = vpop.f32.mrf.mxu2 }
 0x20b   : > { %v5823_v31 = vor.u32 %v6400_v38, %v5822_v15  ;;  %v5790_v37 = vld [vmem:[%s6567_s30 + $0xc58] sm:$0xf]  ;;  %v4480_v57 = vld [vmem:[%s6567_s30 + $0x238] sm:$0xf0] }
 0x20c   : > { %3651 = vmatpush.bf16.msra.mxu3 %v4899_v51  ;;  %3626 = vmatpush.bf16.msra.mxu1 %v4355_v59  ;;  %v6392_v39 = vld [vmem:[%s6567_s30 + $0xc74] sm:$0xf0]  ;;  %v4224_v51 = vld [vmem:[%s6567_s30 + $0x38] sm:$0xf0]  ;;  %v4483_v4 = vor.u32 %v6060_v52, %v4480_v57 }
 0x20d   : > { %v5791_v46 = vor.u32 %v6392_v39, %v5790_v37  ;;  %v5758_v48 = vld [vmem:[%s6567_s30 + $0xc18] sm:$0xf]  ;;  %v6124_v25 = vld [vmem:[%s6567_s30 + $0x41c] sm:$0xf] }
 0x20e   : > { %3613 = vmatpush.bf16.msra.mxu0 %v5887_v58  ;;  %3639 = vmatpush.bf16.msra.mxu2 %v4611_v61  ;;  %v6384_v27 = vld [vmem:[%s6567_s30 + $0xc34] sm:$0xf0]  ;;  %v4736_v58 = vld [vmem:[%s6567_s30 + $0x438] sm:$0xf0]  ;;  %v3400_v61 = vpop.f32.mrf.mxu3 }
 0x20f   : > { %v6244_v34 = vld [vmem:[%s6567_s30 + $0x7dc] sm:$0xf]  ;;  %v5759_v62 = vor.u32 %v6384_v27, %v5758_v48  ;;  %v4739_v18 = vor.u32 %v6124_v25, %v4736_v58 }
 0x210   : > { %3652 = vmatpush.bf16.msra.mxu3 %v4867_v0  ;;  %3627 = vmatpush.bf16.msra.mxu1 %v4323_v10  ;;  %v5216_v9 = vld [vmem:[%s6567_s30 + $0x7f8] sm:$0xf0]  ;;  %v4227_v0 = vor.u32 %v5996_v7, %v4224_v51  ;;  %v3424_v7 = vpop.f32.mrf.mxu1 }
 0x211   : > { %v6308_v59 = vld [vmem:[%s6567_s30 + $0x9dc] sm:$0xf]  ;;  %v5219_v8 = vor.u32 %v6244_v34, %v5216_v9 }
 0x212   : > { %3614 = vmatpush.bf16.msra.mxu0 %v5855_v22  ;;  %3640 = vmatpush.bf16.msra.mxu2 %v4579_v23  ;;  %v5472_v1 = vld [vmem:[%s6567_s30 + $0x9f8] sm:$0xf0] }
 0x213   : > { %v6372_v2 = vld [vmem:[%s6567_s30 + $0xbdc] sm:$0xf]  ;;  %v5475_v22 = vor.u32 %v6308_v59, %v5472_v1 }
 0x214   : > { %3653 = vmatpush.bf16.msra.mxu3 %v4835_v14  ;;  %3628 = vmatpush.bf16.msra.mxu1 %v4291_v36  ;;  %v5728_v63 = vld [vmem:[%s6567_s30 + $0xbf8] sm:$0xf0] }
 0x215   : > { %v6436_v30 = vld [vmem:[%s6567_s30 + $0xddc] sm:$0xf]  ;;  %v5731_v10 = vor.u32 %v6372_v2, %v5728_v63 }
 0x216   : > { %3615 = vmatpush.bf16.msra.mxu0 %v5823_v31  ;;  %3641 = vmatpush.bf16.msra.mxu2 %v4547_v56  ;;  %v5984_v6 = vld [vmem:[%s6567_s30 + $0xdf8] sm:$0xf0] }
 0x217   : > { %v6236_v23 = vld [vmem:[%s6567_s30 + $0x79c] sm:$0xf]  ;;  %v5987_v12 = vor.u32 %v6436_v30, %v5984_v6  ;;  %v3437_v6 = vpop.f32.mrf.mxu2 }
 0x218   : > { %3654 = vmatpush.bf16.msra.mxu3 %v4803_v42  ;;  %3629 = vmatpush.bf16.msra.mxu1 %v4259_v50  ;;  %v5184_v15 = vld [vmem:[%s6567_s30 + $0x7b8] sm:$0xf0] }
 0x219   : > { %v6300_v38 = vld [vmem:[%s6567_s30 + $0x99c] sm:$0xf]  ;;  %v5187_v26 = vor.u32 %v6236_v23, %v5184_v15 }
 0x21a   : > { %3616 = vmatpush.bf16.msra.mxu0 %v5791_v46  ;;  %3642 = vmatpush.bf16.msra.mxu2 %v4515_v49  ;;  %v5440_v13 = vld [vmem:[%s6567_s30 + $0x9b8] sm:$0xf0]  ;;  %v3411_v49 = vpop.f32.mrf.mxu0 }
 0x21b   : > { %v6364_v14 = vld [vmem:[%s6567_s30 + $0xb9c] sm:$0xf]  ;;  %v5443_v28 = vor.u32 %v6300_v38, %v5440_v13  ;;  %v3412_v25 = vadd.f32 %v3411_v49, %v7526_v16 }
 0x21c   : > { %3655 = vmatpush.bf16.msra.mxu3 %v4771_v54  ;;  %v5696_v17 = vld [vmem:[%s6567_s30 + $0xbb8] sm:$0xf0]  ;;  %3630 = vmatpush.bf16.msra.mxu1 %v4227_v0 }
 0x21d   : > { %v6428_v19 = vld [vmem:[%s6567_s30 + $0xd9c] sm:$0xf]  ;;  %v5699_v55 = vor.u32 %v6364_v14, %v5696_v17  ;;  %v3425_v1 = vadd.f32 %v3424_v7, %v3412_v25  ;;  %v3426_v17 = vpop.f32.mrf.mxu1 }
 0x21e   : > { %3617 = vmatpush.bf16.msra.mxu0 %v5759_v62  ;;  %3643 = vmatpush.bf16.msra.mxu2 %v4483_v4  ;;  %v5952_v20 = vld [vmem:[%s6567_s30 + $0xdb8] sm:$0xf0] }
 0x21f   : > { %v6228_v29 = vld [vmem:[%s6567_s30 + $0x75c] sm:$0xf]  ;;  %v5955_v35 = vor.u32 %v6428_v19, %v5952_v20  ;;  %3631 = vmatmul.bf16.vlgmr.msra.gmra.mxu1 %v7419_v21  ;;  %v7595_v23 = vadd.f32 %v3437_v6, %v3425_v1 }
 0x220   : > { %3656 = vmatpush.bf16.msra.mxu3 %v4739_v18  ;;  %3675 = vmatpush.bf16.msrb.mxu1 %v5475_v22  ;;  %v5152_v31 = vld [vmem:[%s6567_s30 + $0x778] sm:$0xf0] }
 0x221   : > { %v6292_v60 = vld [vmem:[%s6567_s30 + $0x95c] sm:$0xf]  ;;  %3618 = vmatmul.bf16.vlgmr.msra.gmra.mxu0 %v7414_v3  ;;  %3644 = vmatmul.bf16.vlgmr.msra.gmra.mxu2 %v7327_v45  ;;  %v5155_v42 = vor.u32 %v6228_v29, %v5152_v31 }
 0x222   : > { %3662 = vmatpush.bf16.msrb.mxu0 %v5219_v8  ;;  %3688 = vmatpush.bf16.msrb.mxu2 %v5731_v10  ;;  %v5408_v36 = vld [vmem:[%s6567_s30 + $0x978] sm:$0xf0]  ;;  %v3413_v14 = vpop.f32.mrf.mxu0 }
 0x223   : > { %v6356_v56 = vld [vmem:[%s6567_s30 + $0xb5c] sm:$0xf]  ;;  %3657 = vmatmul.bf16.vlgmr.msra.gmra.mxu3 %v7333_v5  ;;  %v5411_v43 = vor.u32 %v6292_v60, %v5408_v36 }
 0x224   : > { %3701 = vmatpush.bf16.msrb.mxu3 %v5987_v12  ;;  %v5664_v37 = vld [vmem:[%s6567_s30 + $0xb78] sm:$0xf0]  ;;  %3676 = vmatpush.bf16.msrb.mxu1 %v5443_v28  ;;  %v3450_v12 = vpop.f32.mrf.mxu3 }
 0x225   : > { %v6420_v39 = vld [vmem:[%s6567_s30 + $0xd5c] sm:$0xf]  ;;  %v5667_v24 = vor.u32 %v6356_v56, %v5664_v37 }
 0x226   : > { %v5920_v41 = vld [vmem:[%s6567_s30 + $0xd78] sm:$0xf0]  ;;  %3663 = vmatpush.bf16.msrb.mxu0 %v5187_v26  ;;  %3689 = vmatpush.bf16.msrb.mxu2 %v5699_v55 }
 0x227   : > { %v6220_v44 = vld [vmem:[%s6567_s30 + $0x71c] sm:$0xf]  ;;  %v5923_v33 = vor.u32 %v6420_v39, %v5920_v41 }
 0x228   : > { %v5120_v11 = vld [vmem:[%s6567_s30 + $0x738] sm:$0xf0]  ;;  %3702 = vmatpush.bf16.msrb.mxu3 %v5955_v35  ;;  %3677 = vmatpush.bf16.msrb.mxu1 %v5411_v43 }
 0x229   : > { %v6284_v45 = vld [vmem:[%s6567_s30 + $0x91c] sm:$0xf]  ;;  %v5123_v21 = vor.u32 %v6220_v44, %v5120_v11  ;;  %v3439_v44 = vpop.f32.mrf.mxu2 }
 0x22a   : > { %v5376_v46 = vld [vmem:[%s6567_s30 + $0x938] sm:$0xf0]  ;;  %3664 = vmatpush.bf16.msrb.mxu0 %v5155_v42  ;;  %3690 = vmatpush.bf16.msrb.mxu2 %v5667_v24 }
 0x22b   : > { %v6348_v5 = vld [vmem:[%s6567_s30 + $0xb1c] sm:$0xf]  ;;  %v5379_v51 = vor.u32 %v6284_v45, %v5376_v46 }
 0x22c   : > { %v5632_v48 = vld [vmem:[%s6567_s30 + $0xb38] sm:$0xf0]  ;;  %3703 = vmatpush.bf16.msrb.mxu3 %v5923_v33 }
 0x22d   : > { %v6412_v27 = vld [vmem:[%s6567_s30 + $0xd1c] sm:$0xf]  ;;  %v5635_v52 = vor.u32 %v6348_v5, %v5632_v48  ;;  %3678 = vmatpush.bf16.msrb.mxu1 %v5379_v51  ;;  %v3463_v51 = vpop.f32.mrf.mxu0 }
 0x22e   : > { %v5888_v50 = vld [vmem:[%s6567_s30 + $0xd38] sm:$0xf0]  ;;  %3665 = vmatpush.bf16.msrb.mxu0 %v5123_v21 }
 0x22f   : > { %v6212_v53 = vld [vmem:[%s6567_s30 + $0x6dc] sm:$0xf]  ;;  %v5891_v58 = vor.u32 %v6412_v27, %v5888_v50  ;;  %3691 = vmatpush.bf16.msrb.mxu2 %v5635_v52  ;;  %v3452_v27 = vpop.f32.mrf.mxu3  ;;  %v3464_v52 = vadd.f32 %v3463_v51, %v3450_v12 }
 0x230   : > { %v5088_v54 = vld [vmem:[%s6567_s30 + $0x6f8] sm:$0xf0] }
 0x231   : > { %v6276_v57 = vld [vmem:[%s6567_s30 + $0x8dc] sm:$0xf]  ;;  %v5091_v2 = vor.u32 %v6212_v53, %v5088_v54  ;;  %3704 = vmatpush.bf16.msrb.mxu3 %v5891_v58 }
 0x232   : > { %v5344_v34 = vld [vmem:[%s6567_s30 + $0x8f8] sm:$0xf0] }
 0x233   : > { %v6340_v9 = vld [vmem:[%s6567_s30 + $0xadc] sm:$0xf]  ;;  %v5347_v16 = vor.u32 %v6276_v57, %v5344_v34  ;;  %3666 = vmatpush.bf16.msrb.mxu0 %v5091_v2 }
 0x234   : > { %v5600_v59 = vld [vmem:[%s6567_s30 + $0xaf8] sm:$0xf0] }
 0x235   : > { %v6404_v61 = vld [vmem:[%s6567_s30 + $0xcdc] sm:$0xf]  ;;  %v5603_v63 = vor.u32 %v6340_v9, %v5600_v59  ;;  %3679 = vmatpush.bf16.msrb.mxu1 %v5347_v16  ;;  %v3465_v9 = vpop.f32.mrf.mxu0 }
 0x236   : > { %v5856_v62 = vld [vmem:[%s6567_s30 + $0xcf8] sm:$0xf0] }
 0x237   : > { %v6204_v0 = vld [vmem:[%s6567_s30 + $0x69c] sm:$0xf]  ;;  %v5859_v18 = vor.u32 %v6404_v61, %v5856_v62  ;;  %3692 = vmatpush.bf16.msrb.mxu2 %v5603_v63  ;;  %v3502_v58 = vpop.f32.mrf.mxu3 }
 0x238   : > { %v5056_v4 = vld [vmem:[%s6567_s30 + $0x6b8] sm:$0xf0]  ;;  %v3476_v53 = vpop.f32.mrf.mxu1 }
 0x239   : > { %v6268_v30 = vld [vmem:[%s6567_s30 + $0x89c] sm:$0xf]  ;;  %v5059_v13 = vor.u32 %v6204_v0, %v5056_v4  ;;  %3705 = vmatpush.bf16.msrb.mxu3 %v5859_v18  ;;  %v3477_v54 = vadd.f32 %v3476_v53, %v3464_v52  ;;  %v3489_v57 = vpop.f32.mrf.mxu2 }
 0x23a   : > { %v5312_v8 = vld [vmem:[%s6567_s30 + $0x8b8] sm:$0xf0] }
 0x23b   : > { %v6332_v22 = vld [vmem:[%s6567_s30 + $0xa9c] sm:$0xf]  ;;  %v5315_v19 = vor.u32 %v6268_v30, %v5312_v8  ;;  %3667 = vmatpush.bf16.msrb.mxu0 %v5059_v13  ;;  %v3490_v25 = vadd.f32 %v3489_v57, %v3477_v54 }
 0x23c   : > { %v5568_v10 = vld [vmem:[%s6567_s30 + $0xab8] sm:$0xf0] }
 0x23d   : > { %v6396_v15 = vld [vmem:[%s6567_s30 + $0xc9c] sm:$0xf]  ;;  %v5571_v20 = vor.u32 %v6332_v22, %v5568_v10  ;;  %3680 = vmatpush.bf16.msrb.mxu1 %v5315_v19  ;;  %v3503_v34 = vadd.f32 %v3502_v58, %v3490_v25 }
 0x23e   : > { %v5824_v38 = vld [vmem:[%s6567_s30 + $0xcb8] sm:$0xf0] }
 0x23f   : > { %v6196_v26 = vld [vmem:[%s6567_s30 + $0x65c] sm:$0xf]  ;;  %v5827_v29 = vor.u32 %v6396_v15, %v5824_v38  ;;  %3693 = vmatpush.bf16.msrb.mxu2 %v5571_v20  ;;  %v3504_v62 = vpop.f32.mrf.mxu3 }
 0x240   : > { %v5024_v28 = vld [vmem:[%s6567_s30 + $0x678] sm:$0xf0]  ;;  %v3478_v59 = vpop.f32.mrf.mxu1 }
 0x241   : > { %v6260_v55 = vld [vmem:[%s6567_s30 + $0x85c] sm:$0xf]  ;;  %v5027_v37 = vor.u32 %v6196_v26, %v5024_v28  ;;  %3706 = vmatpush.bf16.msrb.mxu3 %v5827_v29  ;;  %v3491_v61 = vpop.f32.mrf.mxu2 }
 0x242   : > { %v5280_v31 = vld [vmem:[%s6567_s30 + $0x878] sm:$0xf0] }
 0x243   : > { %v6324_v60 = vld [vmem:[%s6567_s30 + $0xa5c] sm:$0xf]  ;;  %v5283_v39 = vor.u32 %v6260_v55, %v5280_v31  ;;  %3668 = vmatpush.bf16.msrb.mxu0 %v5027_v37 }
 0x244   : > { %v5536_v35 = vld [vmem:[%s6567_s30 + $0xa78] sm:$0xf0] }
 0x245   : > { %v6388_v36 = vld [vmem:[%s6567_s30 + $0xc5c] sm:$0xf]  ;;  %v5539_v41 = vor.u32 %v6324_v60, %v5536_v35  ;;  %3681 = vmatpush.bf16.msrb.mxu1 %v5283_v39 }
 0x246   : > { %v5792_v56 = vld [vmem:[%s6567_s30 + $0xc78] sm:$0xf0] }
 0x247   : > { %v6188_v42 = vld [vmem:[%s6567_s30 + $0x61c] sm:$0xf]  ;;  %v5795_v11 = vor.u32 %v6388_v36, %v5792_v56  ;;  %3694 = vmatpush.bf16.msrb.mxu2 %v5539_v41 }
 0x248   : > { %v4992_v43 = vld [vmem:[%s6567_s30 + $0x638] sm:$0xf0] }
 0x249   : > { %v6252_v24 = vld [vmem:[%s6567_s30 + $0x81c] sm:$0xf]  ;;  %v4995_v50 = vor.u32 %v6188_v42, %v4992_v43  ;;  %3707 = vmatpush.bf16.msrb.mxu3 %v5795_v11 }
 0x24a   : > { %v5248_v45 = vld [vmem:[%s6567_s30 + $0x838] sm:$0xf0] }
 0x24b   : > { %v6316_v33 = vld [vmem:[%s6567_s30 + $0xa1c] sm:$0xf]  ;;  %v5251_v21 = vor.u32 %v6252_v24, %v5248_v45  ;;  %3669 = vmatpush.bf16.msrb.mxu0 %v4995_v50  ;;  %v280_v50 = vld [vmem:[#allocation2 + $0x8] sm:$0xff] }
 0x24c   : > { %v5504_v46 = vld [vmem:[%s6567_s30 + $0xa38] sm:$0xf0] }
 0x24d   : > { %v6380_v5 = vld [vmem:[%s6567_s30 + $0xc1c] sm:$0xf]  ;;  %v5507_v49 = vor.u32 %v6316_v33, %v5504_v46  ;;  %3682 = vmatpush.bf16.msrb.mxu1 %v5251_v21 }
 0x24e   : > { %v5760_v48 = vld [vmem:[%s6567_s30 + $0xc38] sm:$0xf0]  ;;  %3670 = vmatmul.bf16.vlgmr.msrb.gmra.mxu0 %v7499_v47 }
 0x24f   : > { %v5763_v7 = vor.u32 %v6380_v5, %v5760_v48  ;;  %3695 = vmatpush.bf16.msrb.mxu2 %v5507_v49  ;;  %v3515_v1 = vpop.f32.mrf.mxu0 }
 0x250   : > { %3683 = vmatmul.bf16.vlgmr.msrb.gmra.mxu1 %v7489_v32  ;;  %v3516_v47 = vadd.f32 %v3515_v1, %v3503_v34 }
 0x251   : > { %3708 = vmatpush.bf16.msrb.mxu3 %v5763_v7  ;;  %v3528_v2 = vpop.f32.mrf.mxu1 }
 0x252   : > { %3696 = vmatmul.bf16.vlgmr.msrb.gmra.mxu2 %v7408_v40  ;;  %v3529_v32 = vadd.f32 %v3528_v2, %v3516_v47 }
 0x254   : > { %3709 = vmatmul.bf16.vlgmr.msrb.gmra.mxu3 %v7414_v3  ;;  %v3725_v16 = vrot.slane %v3529_v32, 6 }
 0x256   : > { %v3734_v40 = vsel %vm3728_vm0, %v7595_v23, %v3725_v16  ;;  %v3554_v63 = vpop.f32.mrf.mxu3 }
 0x257   : > { %v3517_v0 = vpop.f32.mrf.mxu0 }
 0x259   : > { %v3541_v3 = vpop.f32.mrf.mxu2  ;;  %v3530_v30 = vpop.f32.mrf.mxu1 }
 0x25a   : > { %v3555_v4 = vadd.f32 %v3554_v63, %v3541_v3 }
 0x25e   : > { %v3556_v18 = vpop.f32.mrf.mxu3 }
 0x261   : > { %v3543_v6 = vpop.f32.mrf.mxu2 }
 0x27a   : > { %v3567_v8 = vpop.f32.mrf.mxu0 }
 0x27b   : > { %v3568_v31 = vadd.f32 %v3567_v8, %v3555_v4 }
 0x282   : > { %v3580_v22 = vpop.f32.mrf.mxu1  ;;  %v3569_v38 = vpop.f32.mrf.mxu0 }
 0x283   : > { %v3581_v35 = vadd.f32 %v3580_v22, %v3568_v31 }
 0x284   : > { %v3593_v10 = vpop.f32.mrf.mxu2 }
 0x285   : > { %v3594_v39 = vadd.f32 %v3593_v10, %v3581_v35 }
 0x286   : > { %v3606_v15 = vpop.f32.mrf.mxu3 }
 0x287   : > { %v3607_v42 = vadd.f32 %v3606_v15, %v3594_v39 }
 0x28a   : > { %v3582_v12 = vpop.f32.mrf.mxu1 }
 0x28c   : > { %v3595_v13 = vpop.f32.mrf.mxu2 }
 0x28e   : > { %v3608_v14 = vpop.f32.mrf.mxu3 }
 0x29c   : > { %v3632_v19 = vpop.f32.mrf.mxu1 }
 0x29e   : > { %v3619_v17 = vpop.f32.mrf.mxu0 }
 0x29f   : > { %v3620_v44 = vadd.f32 %v3619_v17, %v3607_v42 }
 0x2a1   : > { %v3726_v48 = vrot.slane %v3620_v44, 4 }
 0x2a4   : > { %v3645_v20 = vpop.f32.mrf.mxu2  ;;  %v3634_v28 = vpop.f32.mrf.mxu1 }
 0x2a5   : > { %v3646_v60 = vadd.f32 %v3645_v20, %v3632_v19 }
 0x2a6   : > { %v3658_v26 = vpop.f32.mrf.mxu3  ;;  %v3621_v23 = vpop.f32.mrf.mxu0 }
 0x2a7   : > { %v3659_v36 = vadd.f32 %v3658_v26, %v3646_v60 }
 0x2ac   : > { %v3647_v55 = vpop.f32.mrf.mxu2 }
 0x2ae   : > { %v3660_v29 = vpop.f32.mrf.mxu3 }
 0x2cb   : > { %v3671_v56 = vpop.f32.mrf.mxu0 }
 0x2cc   : > { %v3672_v41 = vadd.f32 %v3671_v56, %v3659_v36 }
 0x2cd   : > { %v3684_v37 = vpop.f32.mrf.mxu1 }
 0x2ce   : > { %v3685_v43 = vadd.f32 %v3684_v37, %v3672_v41 }
 0x2d3   : > { %v3673_v33 = vpop.f32.mrf.mxu0 }
 0x2d5   : > { %v3697_v24 = vpop.f32.mrf.mxu2  ;;  %v3686_v46 = vpop.f32.mrf.mxu1 }
 0x2d6   : > { %v3698_v11 = vadd.f32 %v3697_v24, %v3685_v43 }
 0x2d7   : > { %v3710_v45 = vpop.f32.mrf.mxu3 }
 0x2d8   : > { %v3711_v5 = vadd.f32 %v3710_v45, %v3698_v11 }
 0x2da   : > { %v3727_v27 = vrot.slane %v3711_v5, 2 }
 0x2dc   : > { %v3735_v21 = vsel %vm3730_vm1, %v3726_v48, %v3727_v27  ;;  %3746 = sbr.rel (%p5988_p7) target bundleno = 1302 (0x516), region = 48 }
 0x2dd   : > { %v3736_v49 = vsel %vm3732_vm2, %v3734_v40, %v3735_v21  ;;  %v3699_v7 = vpop.f32.mrf.mxu2 }
 0x2de   : > { %v3740_v51 = vadd.f32 %v3736_v49, %v280_v50 }
 0x2df   : > { %v3712_v52 = vpop.f32.mrf.mxu3 }
 0x2e0   : > { %3742 = vst [vmem:[#allocation2 + $0x8] sm:$0xff] %v3740_v51 }
 0x2e1   : > { %v3824_v53 = vld [vmem:[%s8035_s3 + $0x178] sm:$0xff]  ;;  %v3823_v57 = vld [vmem:[%s8035_s3 + $0x170] sm:$0xff]  ;;  %v3822_v9 = vld [vmem:[%s8035_s3 + $0x168] sm:$0xff]  ;;  %vm4092_vm3 = vcmask 74752   ;;  %vm4113_vm6 = vcmask 1024  }
 0x2e2   : > { %v3792_v54 = vld [vmem:[%s8035_s3 + $0x78] sm:$0xff]  ;;  %3970 = vmatpush.msra.mxu2 %v3824_v53  ;;  %v3791_v58 = vld [vmem:[%s8035_s3 + $0x70] sm:$0xff]  ;;  %v3790_v61 = vld [vmem:[%s8035_s3 + $0x68] sm:$0xff] }
 0x2e3   : > { %3930 = vmatpush.msra.mxu0 %v3792_v54  ;;  %v3840_v25 = vld [vmem:[%s8035_s3 + $0x1f8] sm:$0xff]  ;;  %v3839_v59 = vld [vmem:[%s8035_s3 + $0x1f0] sm:$0xff]  ;;  %v3838_v1 = vld [vmem:[%s8035_s3 + $0x1e8] sm:$0xff] }
 0x2e4   : > { %v3808_v34 = vld [vmem:[%s8035_s3 + $0xf8] sm:$0xff]  ;;  %3990 = vmatpush.msra.mxu3 %v3840_v25  ;;  %3971 = vmatpush.msra.mxu2 %v3823_v57  ;;  %v3807_v62 = vld [vmem:[%s8035_s3 + $0xf0] sm:$0xff]  ;;  %v3821_v47 = vld [vmem:[%s8035_s3 + $0x160] sm:$0xff] }
 0x2e5   : > { %3950 = vmatpush.msra.mxu1 %v3808_v34  ;;  %3931 = vmatpush.msra.mxu0 %v3791_v58  ;;  %v3789_v2 = vld [vmem:[%s8035_s3 + $0x60] sm:$0xff]  ;;  %v3806_v32 = vld [vmem:[%s8035_s3 + $0xe8] sm:$0xff]  ;;  %v3820_v3 = vld [vmem:[%s8035_s3 + $0x158] sm:$0xff] }
 0x2e6   : > { %3991 = vmatpush.msra.mxu3 %v3839_v59  ;;  %3972 = vmatpush.msra.mxu2 %v3822_v9  ;;  %v3837_v16 = vld [vmem:[%s8035_s3 + $0x1e0] sm:$0xff]  ;;  %v3788_v63 = vld [vmem:[%s8035_s3 + $0x58] sm:$0xff]  ;;  %v3819_v30 = vld [vmem:[%s8035_s3 + $0x150] sm:$0xff] }
 0x2e7   : > { %3951 = vmatpush.msra.mxu1 %v3807_v62  ;;  %3932 = vmatpush.msra.mxu0 %v3790_v61  ;;  %v3805_v40 = vld [vmem:[%s8035_s3 + $0xe0] sm:$0xff]  ;;  %v3836_v0 = vld [vmem:[%s8035_s3 + $0x1d8] sm:$0xff]  ;;  %v3787_v6 = vld [vmem:[%s8035_s3 + $0x50] sm:$0xff] }
 0x2e8   : > { %3992 = vmatpush.msra.mxu3 %v3838_v1  ;;  %3973 = vmatpush.msra.mxu2 %v3821_v47  ;;  %v3804_v4 = vld [vmem:[%s8035_s3 + $0xd8] sm:$0xff]  ;;  %v3835_v18 = vld [vmem:[%s8035_s3 + $0x1d0] sm:$0xff]  ;;  %v3818_v22 = vld [vmem:[%s8035_s3 + $0x148] sm:$0xff] }
 0x2e9   : > { %3952 = vmatpush.msra.mxu1 %v3806_v32  ;;  %3933 = vmatpush.msra.mxu0 %v3789_v2  ;;  %v3803_v8 = vld [vmem:[%s8035_s3 + $0xd0] sm:$0xff]  ;;  %v3786_v10 = vld [vmem:[%s8035_s3 + $0x48] sm:$0xff]  ;;  %v3817_v12 = vld [vmem:[%s8035_s3 + $0x140] sm:$0xff] }
 0x2ea   : > { %3993 = vmatpush.msra.mxu3 %v3837_v16  ;;  %3974 = vmatpush.msra.mxu2 %v3820_v3  ;;  %v3834_v15 = vld [vmem:[%s8035_s3 + $0x1c8] sm:$0xff]  ;;  %v3785_v13 = vld [vmem:[%s8035_s3 + $0x40] sm:$0xff]  ;;  %v3816_v19 = vld [vmem:[%s8035_s3 + $0x138] sm:$0xff] }
 0x2eb   : > { %3953 = vmatpush.msra.mxu1 %v3805_v40  ;;  %3934 = vmatpush.msra.mxu0 %v3788_v63  ;;  %v3802_v38 = vld [vmem:[%s8035_s3 + $0xc8] sm:$0xff]  ;;  %v3833_v14 = vld [vmem:[%s8035_s3 + $0x1c0] sm:$0xff]  ;;  %v3784_v20 = vld [vmem:[%s8035_s3 + $0x38] sm:$0xff] }
 0x2ec   : > { %3994 = vmatpush.msra.mxu3 %v3836_v0  ;;  %3975 = vmatpush.msra.mxu2 %v3819_v30  ;;  %v3801_v17 = vld [vmem:[%s8035_s3 + $0xc0] sm:$0xff]  ;;  %v3832_v26 = vld [vmem:[%s8035_s3 + $0x1b8] sm:$0xff]  ;;  %v3815_v28 = vld [vmem:[%s8035_s3 + $0x130] sm:$0xff] }
 0x2ed   : > { %3954 = vmatpush.msra.mxu1 %v3804_v4  ;;  %3935 = vmatpush.msra.mxu0 %v3787_v6  ;;  %v3800_v23 = vld [vmem:[%s8035_s3 + $0xb8] sm:$0xff]  ;;  %v3783_v55 = vld [vmem:[%s8035_s3 + $0x30] sm:$0xff]  ;;  %v3814_v60 = vld [vmem:[%s8035_s3 + $0x128] sm:$0xff] }
 0x2ee   : > { %3995 = vmatpush.msra.mxu3 %v3835_v18  ;;  %3976 = vmatpush.msra.mxu2 %v3818_v22  ;;  %v3831_v29 = vld [vmem:[%s8035_s3 + $0x1b0] sm:$0xff]  ;;  %v3782_v35 = vld [vmem:[%s8035_s3 + $0x28] sm:$0xff]  ;;  %v3813_v37 = vld [vmem:[%s8035_s3 + $0x120] sm:$0xff] }
 0x2ef   : > { %3955 = vmatpush.msra.mxu1 %v3803_v8  ;;  %3936 = vmatpush.msra.mxu0 %v3786_v10  ;;  %v3799_v31 = vld [vmem:[%s8035_s3 + $0xb0] sm:$0xff]  ;;  %v3830_v36 = vld [vmem:[%s8035_s3 + $0x1a8] sm:$0xff]  ;;  %v3781_v39 = vld [vmem:[%s8035_s3 + $0x20] sm:$0xff] }
 0x2f0   : > { %3996 = vmatpush.msra.mxu3 %v3834_v15  ;;  %3977 = vmatpush.msra.mxu2 %v3817_v12  ;;  %v3798_v56 = vld [vmem:[%s8035_s3 + $0xa8] sm:$0xff]  ;;  %v3829_v41 = vld [vmem:[%s8035_s3 + $0x1a0] sm:$0xff]  ;;  %v3812_v43 = vld [vmem:[%s8035_s3 + $0x118] sm:$0xff] }
 0x2f1   : > { %3956 = vmatpush.msra.mxu1 %v3802_v38  ;;  %3937 = vmatpush.msra.mxu0 %v3785_v13  ;;  %v3797_v42 = vld [vmem:[%s8035_s3 + $0xa0] sm:$0xff]  ;;  %v3780_v24 = vld [vmem:[%s8035_s3 + $0x18] sm:$0xff]  ;;  %v3811_v45 = vld [vmem:[%s8035_s3 + $0x110] sm:$0xff] }
 0x2f2   : > { %3997 = vmatpush.msra.mxu3 %v3833_v14  ;;  %3978 = vmatpush.msra.mxu2 %v3816_v19  ;;  %v3828_v44 = vld [vmem:[%s8035_s3 + $0x198] sm:$0xff]  ;;  %v3779_v33 = vld [vmem:[%s8035_s3 + $0x10] sm:$0xff]  ;;  %v3810_v48 = vld [vmem:[%s8035_s3 + $0x108] sm:$0xff] }
 0x2f3   : > { %3957 = vmatpush.msra.mxu1 %v3801_v17  ;;  %3938 = vmatpush.msra.mxu0 %v3784_v20  ;;  %v3796_v11 = vld [vmem:[%s8035_s3 + $0x98] sm:$0xff]  ;;  %v3827_v46 = vld [vmem:[%s8035_s3 + $0x190] sm:$0xff]  ;;  %v3778_v27 = vld [vmem:[%s8035_s3 + $0x8] sm:$0xff] }
 0x2f4   : > { %3998 = vmatpush.msra.mxu3 %v3832_v26  ;;  %3979 = vmatpush.msra.mxu2 %v3815_v28  ;;  %v3795_v5 = vld [vmem:[%s8035_s3 + $0x90] sm:$0xff]  ;;  %v3826_v50 = vld [vmem:[%s8035_s3 + $0x188] sm:$0xff]  ;;  %v3809_v49 = vld [vmem:[%s8035_s3 + $0x100] sm:$0xff] }
 0x2f5   : > { %3958 = vmatpush.msra.mxu1 %v3800_v23  ;;  %3939 = vmatpush.msra.mxu0 %v3783_v55  ;;  %v3794_v21 = vld [vmem:[%s8035_s3 + $0x88] sm:$0xff]  ;;  %v3777_v7 = vld [vmem:[%s8035_s3] sm:$0xff]  ;;  %v3888_v51 = vld [vmem:[%s8035_s3 + $0x378] sm:$0xff] }
 0x2f6   : > { %3999 = vmatpush.msra.mxu3 %v3831_v29  ;;  %3980 = vmatpush.msra.mxu2 %v3814_v60  ;;  %v3825_v52 = vld [vmem:[%s8035_s3 + $0x180] sm:$0xff]  ;;  %v3856_v53 = vld [vmem:[%s8035_s3 + $0x278] sm:$0xff]  ;;  %v3887_v57 = vld [vmem:[%s8035_s3 + $0x370] sm:$0xff] }
 0x2f7   : > { %3959 = vmatpush.msra.mxu1 %v3799_v31  ;;  %3940 = vmatpush.msra.mxu0 %v3782_v35  ;;  %v3904_v54 = vld [vmem:[%s8035_s3 + $0x3f8] sm:$0xff]  ;;  %v3793_v25 = vld [vmem:[%s8035_s3 + $0x80] sm:$0xff]  ;;  %v3855_v58 = vld [vmem:[%s8035_s3 + $0x270] sm:$0xff] }
 0x2f8   : > { %4000 = vmatpush.msra.mxu3 %v3830_v36  ;;  %3981 = vmatpush.msra.mxu2 %v3813_v37  ;;  %v3872_v34 = vld [vmem:[%s8035_s3 + $0x2f8] sm:$0xff]  ;;  %v3886_v9 = vld [vmem:[%s8035_s3 + $0x368] sm:$0xff]  ;;  %v3903_v59 = vld [vmem:[%s8035_s3 + $0x3f0] sm:$0xff] }
 0x2f9   : > { %3960 = vmatpush.msra.mxu1 %v3798_v56  ;;  %3941 = vmatpush.msra.mxu0 %v3781_v39  ;;  %v3854_v61 = vld [vmem:[%s8035_s3 + $0x268] sm:$0xff]  ;;  %v3871_v62 = vld [vmem:[%s8035_s3 + $0x2f0] sm:$0xff]  ;;  %v3885_v1 = vld [vmem:[%s8035_s3 + $0x360] sm:$0xff] }
 0x2fa   : > { %4001 = vmatpush.msra.mxu3 %v3829_v41  ;;  %3982 = vmatpush.msra.mxu2 %v3812_v43  ;;  %v3902_v47 = vld [vmem:[%s8035_s3 + $0x3e8] sm:$0xff]  ;;  %v3853_v2 = vld [vmem:[%s8035_s3 + $0x260] sm:$0xff]  ;;  %v3884_v40 = vld [vmem:[%s8035_s3 + $0x358] sm:$0xff] }
 0x2fb   : > { %3961 = vmatpush.msra.mxu1 %v3797_v42  ;;  %3942 = vmatpush.msra.mxu0 %v3780_v24  ;;  %v3870_v32 = vld [vmem:[%s8035_s3 + $0x2e8] sm:$0xff]  ;;  %v3749_v16 = vld [vmem:[%s8034_s2] sm:$0xff]  ;;  %v3852_v6 = vld [vmem:[%s8035_s3 + $0x258] sm:$0xff] }
 0x2fc   : > { %4002 = vmatpush.msra.mxu3 %v3828_v44  ;;  %3983 = vmatpush.msra.mxu2 %v3811_v45  ;;  %v3901_v3 = vld [vmem:[%s8035_s3 + $0x3e0] sm:$0xff]  ;;  %v3751_v63 = vperm.slane %v3749_v16, 0  ;;  %v3752_v0 = vperm.slane %v3749_v16, 1  ;;  %v3753_v4 = vperm.slane %v3749_v16, 2  ;;  %v3754_v30 = vperm.slane %v3749_v16, 3  ;;  %v3883_v15 = vld [vmem:[%s8035_s3 + $0x350] sm:$0xff] }
 0x2fd   : > { %3962 = vmatpush.msra.mxu1 %v3796_v11  ;;  %3943 = vmatpush.msra.mxu0 %v3779_v33  ;;  %v3869_v18 = vld [vmem:[%s8035_s3 + $0x2e0] sm:$0xff]  ;;  %v3755_v8 = vperm.slane %v3749_v16, 4  ;;  %v3756_v22 = vperm.slane %v3749_v16, 5  ;;  %v3757_v10 = vperm.slane %v3749_v16, 6  ;;  %v3900_v38 = vld [vmem:[%s8035_s3 + $0x3d8] sm:$0xff]  ;;  %v3851_v17 = vld [vmem:[%s8035_s3 + $0x250] sm:$0xff] }
 0x2fe   : > { %4003 = vmatpush.msra.mxu3 %v3827_v46  ;;  %3984 = vmatpush.msra.mxu2 %v3810_v48  ;;  %v3759_v12 = vrot.slane %v3752_v0, 6  ;;  %v3760_v13 = vrot.slane %v3753_v4, 4  ;;  %v3761_v14 = vrot.slane %v3754_v30, 2  ;;  %v3868_v19 = vld [vmem:[%s8035_s3 + $0x2d8] sm:$0xff]  ;;  %v3747_v20 = vld [vmem:[#allocation2] sm:$0xff]  ;;  %v3758_v26 = vperm.slane %v3749_v16, 7 }
 0x2ff   : > { %3963 = vmatpush.msra.mxu1 %v3795_v5  ;;  %3944 = vmatpush.msra.mxu0 %v3778_v27  ;;  %v3762_v23 = vrot.slane %v3756_v22, 6  ;;  %v3763_v28 = vrot.slane %v3757_v10, 4  ;;  %v3882_v55 = vld [vmem:[%s8035_s3 + $0x348] sm:$0xff]  ;;  %v3899_v29 = vld [vmem:[%s8035_s3 + $0x3d0] sm:$0xff]  ;;  %v3881_v41 = vld [vmem:[%s8035_s3 + $0x340] sm:$0xff] }
 0x300   : > { %4004 = vmatpush.msra.mxu3 %v3826_v50  ;;  %3985 = vmatpush.msra.mxu2 %v3809_v49  ;;  %v3765_v31 = vsel %vm3728_vm0, %v3751_v63, %v3759_v12  ;;  %v3766_v60 = vsel %vm3730_vm1, %v3760_v13, %v3761_v14  ;;  %v3850_v35 = vld [vmem:[%s8035_s3 + $0x248] sm:$0xff]  ;;  %v3867_v36 = vld [vmem:[%s8035_s3 + $0x2d0] sm:$0xff]  ;;  %v3764_v37 = vrot.slane %v3758_v26, 2  ;;  %v3849_v44 = vld [vmem:[%s8035_s3 + $0x240] sm:$0xff] }
 0x301   : > { %3964 = vmatpush.msra.mxu1 %v3794_v21  ;;  %3945 = vmatpush.msra.mxu0 %v3777_v7  ;;  %v3767_v56 = vsel %vm3732_vm2, %v3765_v31, %v3766_v60  ;;  %v3768_v39 = vsel %vm3728_vm0, %v3755_v8, %v3762_v23  ;;  %v3898_v42 = vld [vmem:[%s8035_s3 + $0x3c8] sm:$0xff]  ;;  %v3748_v24 = vld [vmem:[#allocation2 + $0x8] sm:$0xff]  ;;  %v3880_v33 = vld [vmem:[%s8035_s3 + $0x338] sm:$0xff] }
 0x302   : > { %4050 = vmatpush.msrb.mxu2 %v3888_v51  ;;  %4005 = vmatpush.msra.mxu3 %v3825_v52  ;;  %v3773_v43 = vadd.f32 %v3767_v56, %v3747_v20  ;;  %v3866_v11 = vld [vmem:[%s8035_s3 + $0x2c8] sm:$0xff]  ;;  %v3769_v45 = vsel %vm3730_vm1, %v3763_v28, %v3764_v37  ;;  %v3897_v46 = vld [vmem:[%s8035_s3 + $0x3c0] sm:$0xff]  ;;  %v3848_v27 = vld [vmem:[%s8035_s3 + $0x238] sm:$0xff] }
 0x303   : > { %4010 = vmatpush.msrb.mxu0 %v3856_v53  ;;  %3965 = vmatpush.msra.mxu1 %v3793_v25  ;;  %v3770_v48 = vsel %vm3732_vm2, %v3768_v39, %v3769_v45  ;;  %v3865_v50 = vld [vmem:[%s8035_s3 + $0x2c0] sm:$0xff]  ;;  %v3879_v49 = vld [vmem:[%s8035_s3 + $0x330] sm:$0xff]  ;;  %v3896_v7 = vld [vmem:[%s8035_s3 + $0x3b8] sm:$0xff] }
 0x304   : > { %4070 = vmatpush.msrb.mxu3 %v3904_v54  ;;  %4051 = vmatpush.msrb.mxu2 %v3887_v57  ;;  %v3775_v5 = vmax.f32 %v3773_v43, 0.0  ;;  %v3774_v21 = vadd.f32 %v3770_v48, %v3748_v24  ;;  %v3847_v51 = vld [vmem:[%s8035_s3 + $0x230] sm:$0xff]  ;;  %v3864_v52 = vld [vmem:[%s8035_s3 + $0x2b8] sm:$0xff]  ;;  %v3878_v54 = vld [vmem:[%s8035_s3 + $0x328] sm:$0xff] }
 0x305   : > { %4011 = vmatpush.msrb.mxu0 %v3855_v58  ;;  %4030 = vmatpush.msrb.mxu1 %v3872_v34  ;;  %v3895_v57 = vld [vmem:[%s8035_s3 + $0x3b0] sm:$0xff]  ;;  %v3846_v25 = vld [vmem:[%s8035_s3 + $0x228] sm:$0xff]  ;;  %v3877_v34 = vld [vmem:[%s8035_s3 + $0x320] sm:$0xff] }
 0x306   : > { %4052 = vmatpush.msrb.mxu2 %v3886_v9  ;;  %4071 = vmatpush.msrb.mxu3 %v3903_v59  ;;  %3911 = vst [vmem:[#allocation1] ss:$4 sm:$0xff] %v3775_v5  ;;  %v3776_v53 = vmax.f32 %v3774_v21, 0.0  ;;  %v3863_v58 = vld [vmem:[%s8035_s3 + $0x2b0] sm:$0xff]  ;;  %v3894_v9 = vld [vmem:[%s8035_s3 + $0x3a8] sm:$0xff]  ;;  %v3845_v59 = vld [vmem:[%s8035_s3 + $0x220] sm:$0xff] }
 0x307   : > { %4012 = vmatpush.msrb.mxu0 %v3854_v61  ;;  %4031 = vmatpush.msrb.mxu1 %v3871_v62  ;;  %v3862_v61 = vld [vmem:[%s8035_s3 + $0x2a8] sm:$0xff]  ;;  %v3876_v62 = vld [vmem:[%s8035_s3 + $0x318] sm:$0xff]  ;;  %v3843_v4 = vld [vmem:[%s8035_s3 + $0x210] sm:$0xff] }
 0x308   : > { %4053 = vmatpush.msrb.mxu2 %v3885_v1  ;;  %4072 = vmatpush.msrb.mxu3 %v3902_v47  ;;  %3913 = vst [vmem:[#allocation1 + $0x20] ss:$4 sm:$0xff] %v3776_v53  ;;  %v3893_v1 = vld [vmem:[%s8035_s3 + $0x3a0] sm:$0xff]  ;;  %v3844_v16 = vld [vmem:[%s8035_s3 + $0x218] sm:$0xff]  ;;  %v3842_v8 = vld [vmem:[%s8035_s3 + $0x208] sm:$0xff] }
 0x309   : > { %4013 = vmatpush.msrb.mxu0 %v3853_v2  ;;  %4032 = vmatpush.msrb.mxu1 %v3870_v32  ;;  %v3892_v63 = vld [vmem:[%s8035_s3 + $0x398] sm:$0xff]  ;;  %v3859_v22 = vld [vmem:[%s8035_s3 + $0x290] sm:$0xff]  ;;  %v3873_v10 = vld [vmem:[%s8035_s3 + $0x300] sm:$0xff] }
 0x30a   : > { %4054 = vmatpush.msrb.mxu2 %v3884_v40  ;;  %4073 = vmatpush.msrb.mxu3 %v3901_v3  ;;  %v3861_v40 = vld [vmem:[%s8035_s3 + $0x2a0] sm:$0xff]  ;;  %v3875_v3 = vld [vmem:[%s8035_s3 + $0x310] sm:$0xff]  ;;  %v3860_v30 = vld [vmem:[%s8035_s3 + $0x298] sm:$0xff] }
 0x30b   : > { %4014 = vmatpush.msrb.mxu0 %v3852_v6  ;;  %4033 = vmatpush.msrb.mxu1 %v3869_v18  ;;  %v3874_v6 = vld [vmem:[%s8035_s3 + $0x308] sm:$0xff]  ;;  %v3891_v18 = vld [vmem:[%s8035_s3 + $0x390] sm:$0xff]  ;;  %v3841_v12 = vld [vmem:[%s8035_s3 + $0x200] sm:$0xff] }
 0x30c   : > { %4055 = vmatpush.msrb.mxu2 %v3883_v15  ;;  %4074 = vmatpush.msrb.mxu3 %v3900_v38  ;;  %v3890_v15 = vld [vmem:[%s8035_s3 + $0x388] sm:$0xff]  ;;  %v3889_v14 = vld [vmem:[%s8035_s3 + $0x380] sm:$0xff] }
 0x30d   : > { %4015 = vmatpush.msrb.mxu0 %v3851_v17  ;;  %4034 = vmatpush.msrb.mxu1 %v3868_v19  ;;  %v3916_v47 = vld.sshfl [vmem:[#allocation1 + $0x10] sm:$0xff pattern:$0x73625140]  ;;  %v3914_v2 = vld.sshfl [vmem:[#allocation1] sm:$0xff pattern:$0x73625140] }
 0x30e   : > { %4056 = vmatpush.msrb.mxu2 %v3882_v55  ;;  %4075 = vmatpush.msrb.mxu3 %v3899_v29  ;;  %v3917_v32 = vld.sshfl [vmem:[#allocation1 + $0x18] sm:$0xff pattern:$0x73625140]  ;;  %v3915_v0 = vld.sshfl [vmem:[#allocation1 + $0x8] sm:$0xff pattern:$0x73625140] }
 0x30f   : > { %4016 = vmatpush.msrb.mxu0 %v3850_v35  ;;  %4035 = vmatpush.msrb.mxu1 %v3867_v36  ;;  %v3920_v38 = vld.sshfl [vmem:[#allocation1 + $0x30] sm:$0xff pattern:$0x73625140]  ;;  %v3858_v13 = vld [vmem:[%s8035_s3 + $0x288] sm:$0xff]  ;;  %v3857_v20 = vld [vmem:[%s8035_s3 + $0x280] sm:$0xff] }
 0x310   : > { %4057 = vmatpush.msrb.mxu2 %v3881_v41  ;;  %4076 = vmatpush.msrb.mxu3 %v3898_v42  ;;  %v3918_v17 = vld.sshfl [vmem:[#allocation1 + $0x20] sm:$0xff pattern:$0x73625140]  ;;  %v3921_v19 = vld.sshfl [vmem:[#allocation1 + $0x38] sm:$0xff pattern:$0x73625140] }
 0x311   : > { %4017 = vmatpush.msrb.mxu0 %v3849_v44  ;;  %4036 = vmatpush.msrb.mxu1 %v3866_v11  ;;  %v3919_v26 = vld.sshfl [vmem:[#allocation1 + $0x28] sm:$0xff pattern:$0x73625140]  ;;  %v6480_v23 = vld [vmem:[%s8036_s4] ss:$0 sm:$0xff] }
 0x312   : > { %4058 = vmatpush.msrb.mxu2 %v3880_v33  ;;  %4077 = vmatpush.msrb.mxu3 %v3897_v46  ;;  %v4090_v33 = vlaneseq }
 0x313   : > { %4018 = vmatpush.msrb.mxu0 %v3848_v27  ;;  %4037 = vmatpush.msrb.mxu1 %v3865_v50 }
 0x314   : > { %4059 = vmatpush.msrb.mxu2 %v3879_v49  ;;  %4078 = vmatpush.msrb.mxu3 %v3896_v7  ;;  %v4091_v46 = vand.u32 127, %v4090_v33 }
 0x315   : > { %4019 = vmatpush.msrb.mxu0 %v3847_v51  ;;  %4038 = vmatpush.msrb.mxu1 %v3864_v52 }
 0x316   : > { %4060 = vmatpush.msrb.mxu2 %v3878_v54  ;;  %4079 = vmatpush.msrb.mxu3 %v3895_v57 }
 0x317   : > { %4020 = vmatpush.msrb.mxu0 %v3846_v25  ;;  %4039 = vmatpush.msrb.mxu1 %v3863_v58 }
 0x318   : > { %4061 = vmatpush.msrb.mxu2 %v3877_v34  ;;  %4080 = vmatpush.msrb.mxu3 %v3894_v9 }
 0x319   : > { %3986 = vmatmul.f32.vlgmr.msra.gmra.mxu2 %v3916_v47  ;;  %4021 = vmatpush.msrb.mxu0 %v3845_v59 }
 0x31a   : > { %4040 = vmatpush.msrb.mxu1 %v3862_v61  ;;  %4062 = vmatpush.msrb.mxu2 %v3876_v62 }
 0x31b   : > { %4081 = vmatpush.msrb.mxu3 %v3893_v1  ;;  %3946 = vmatmul.f32.vlgmr.msra.gmra.mxu0 %v3914_v2 }
 0x31c   : > { %4006 = vmatmul.f32.vlgmr.msra.gmra.mxu3 %v3917_v32  ;;  %4022 = vmatpush.msrb.mxu0 %v3844_v16 }
 0x31d   : > { %4041 = vmatpush.msrb.mxu1 %v3861_v40  ;;  %4063 = vmatpush.msrb.mxu2 %v3875_v3 }
 0x31e   : > { %4082 = vmatpush.msrb.mxu3 %v3892_v63  ;;  %3966 = vmatmul.f32.vlgmr.msra.gmra.mxu1 %v3915_v0 }
 0x31f   : > { %4023 = vmatpush.msrb.mxu0 %v3843_v4  ;;  %4042 = vmatpush.msrb.mxu1 %v3860_v30 }
 0x320   : > { %4064 = vmatpush.msrb.mxu2 %v3874_v6  ;;  %4083 = vmatpush.msrb.mxu3 %v3891_v18 }
 0x321   : > { %4024 = vmatpush.msrb.mxu0 %v3842_v8  ;;  %4043 = vmatpush.msrb.mxu1 %v3859_v22 }
 0x322   : > { %4065 = vmatpush.msrb.mxu2 %v3873_v10  ;;  %4084 = vmatpush.msrb.mxu3 %v3890_v15 }
 0x323   : > { %4066 = vmatmul.f32.vlgmr.msrb.gmra.mxu2 %v3920_v38  ;;  %4025 = vmatpush.msrb.mxu0 %v3841_v12 }
 0x324   : > { %4044 = vmatpush.msrb.mxu1 %v3858_v13  ;;  %4085 = vmatpush.msrb.mxu3 %v3889_v14 }
 0x325   : > { %4026 = vmatmul.f32.vlgmr.msrb.gmra.mxu0 %v3918_v17  ;;  %4086 = vmatmul.f32.vlgmr.msrb.gmra.mxu3 %v3921_v19 }
 0x326   : > { %4045 = vmatpush.msrb.mxu1 %v3857_v20 }
 0x327   : > { %4046 = vmatmul.f32.vlgmr.msrb.gmra.mxu1 %v3919_v26 }
 0x398   : > { %v3947_v28 = vpop.f32.mrf.mxu0 }
 0x399   : > { %v3948_v55 = vadd.f32 %v6480_v23, %v3947_v28 }
 0x39b   : > { %v3967_v29 = vpop.f32.mrf.mxu1 }
 0x39c   : > { %v3968_v31 = vadd.f32 %v3967_v29, %v3948_v55  ;;  %v3987_v60 = vpop.f32.mrf.mxu2 }
 0x39e   : > { %v3988_v35 = vadd.f32 %v3987_v60, %v3968_v31 }
 0x39f   : > { %v4007_v36 = vpop.f32.mrf.mxu3 }
 0x3a0   : > { %v4008_v56 = vadd.f32 %v4007_v36, %v3988_v35 }
 0x3a2   : > { %v4027_v37 = vpop.f32.mrf.mxu0 }
 0x3a3   : > { %v4028_v39 = vadd.f32 %v4027_v37, %v4008_v56 }
 0x3a4   : > { %v4047_v41 = vpop.f32.mrf.mxu1 }
 0x3a5   : > { %v4048_v42 = vadd.f32 %v4047_v41, %v4028_v39 }
 0x3a6   : > { %v4067_v43 = vpop.f32.mrf.mxu2 }
 0x3a7   : > { %v4068_v24 = vadd.f32 %v4067_v43, %v4048_v42 }
 0x3a8   : > { %v4087_v44 = vpop.f32.mrf.mxu3 }
 0x3a9   : > { %v4088_v11 = vadd.f32 %v4087_v44, %v4068_v24 }
 0x3ab   : > { %v4093_v45 = vsel %vm4092_vm3, %v4088_v11, -inf }
 0x3ac   : > { %4094 = vmax.xlane.f32.xlu0 %v4093_v45 }
 0x41f   : > { %v4095_v5 = vpop.xlane.xlu0 %4094 }
 0x420   : > { %vm4096_vm4 = vcmp.eq.f32.partialorder %v4088_v11, %v4095_v5 }
 0x421   : > { %v4097_v48 = vsel %vm4096_vm4, %v4091_v46, 10 }
 0x422   : > { %v4098_v27 = vsel %vm4092_vm3, %v4097_v48, 2147483647 }
 0x423   : > { %v4100_v50 = vshra.s32 %v4098_v27, 16  ;;  %v4099_v49 = vand.u32 65535, %v4098_v27 }
 0x425   : > { %v4102_v21 = vcvt.s32.f32 %v4100_v50  ;;  %v4101_v51 = vcvt.s32.f32 %v4099_v49 }
 0x427   : > { %4103 = vmin.xlane.f32.xlu0 %v4102_v21 }
 0x49a   : > { %v4104_v7 = vpop.xlane.xlu0 %4103 }
 0x49b   : > { %vm4105_vm5 = vcmp.eq.f32.partialorder %v4102_v21, %v4104_v7  ;;  %v4110_v53 = vcvt.f32.s32 %v4104_v7 }
 0x49c   : > { %v4106_v52 = vsel %vm4105_vm5, %v4101_v51, inf }
 0x49d   : > { %4107 = vmin.xlane.f32.xlu1 %v4106_v52  ;;  %v4111_v57 = vshll.u32 %v4110_v53, 16 }
 0x510   : > { %v4108_v54 = vpop.xlane.xlu1 %4107 }
 0x511   : > { %v4109_v25 = vcvt.f32.s32 %v4108_v54 }
 0x513   : > { %v4112_v58 = vadd.s32 %v4111_v57, %v4109_v25 }
 0x515   : > { %4114 = vst.msk [vmem:[%s8037_s5] sm:$0x3] %vm4113_vm6, %v4112_v58 }
 0x516 PF: > { %s15_s20 = sadd.s32 1, %s6503_s20   ;;  %s8038_s18 = smov %s6499_s19 }
 0x517   : > { %p12_p8 = scmp.ge.s32.totalorder %s15_s20, 9   ;;  %s8039_s19 = smov %s8041_s21 }
 0x519   :  { %14 = sbr.rel (!%p12_p8) target bundleno = 2 (0x2), region = 82 }

</bundles_post_ra>
